<compile_context>
chip_gen: v6e
topology: v6e:2x2x1
jax: 0.10.0
libtpu: 0.0.40
codegen_flags: <defaults>
</compile_context>

<pallas_src>
import functools

import jax
import jax.numpy as jnp
from jax.experimental import pallas as pl
from jax.experimental.pallas import tpu as pltpu

LANE = 128
VMEM_LIMIT = 48 * 1024 * 1024      # <= 64 MiB physical VMEM on v7x; fine on v5e/v6e


def _round_up(x, m):
    return (x + m - 1) // m * m


def _masked_sigmoid(t, real_dim):
    """Sigmoid on the tangent; zero-padded lanes are kept exactly 0."""
    s = pl.reciprocal(1.0 + jnp.exp(-t), approx=True)
    lane = jax.lax.broadcasted_iota(jnp.int32, t.shape, dimension=1)
    return jnp.where(lane < real_dim, s, 0.0)


# ------------------------------- kernels --------------------------------------
def _pre_kernel(feat_ref, w1_ref, b1_ref, dinv_ref, h1_ref):
    """Stage 1: per-node tangent linear 1 (exp0/log0 maps cancel exactly).

    The D^-1/2 row scale is pre-applied so stages 2/3 can stream an exact 0/1
    adjacency matrix.
    """
    h = jnp.dot(feat_ref[...], w1_ref[...],
                preferred_element_type=jnp.float32) + b1_ref[...]
    h1_ref[...] = (h * dinv_ref[...]).astype(h1_ref.dtype)


def _agg_mid_kernel(adj_ref, h1_ref, w2_ref, b2_ref, dinv_ref, h2_ref,
                    acc_ref, *, tk, real_h0):
    """Stage 2: A @ h1 (adj streamed, h1 VMEM-resident) -> sigmoid -> linear 2."""
    k = pl.program_id(1)

    @pl.when(k == 0)
    def _():
        acc_ref[...] = jnp.zeros_like(acc_ref)

    off = pl.multiple_of(k * tk, tk)
    acc_ref[...] += jnp.dot(adj_ref[...], h1_ref[pl.ds(off, tk), :],
                            preferred_element_type=jnp.float32)

    @pl.when(k == pl.num_programs(1) - 1)
    def _():
        agg = acc_ref[...] * dinv_ref[...]          # finish D^-1/2 (A+I) D^-1/2 h
        s = _masked_sigmoid(agg, real_h0)           # hyperbolic sigmoid (origin maps cancel)
        h2 = jnp.dot(s.astype(jnp.bfloat16), w2_ref[...],
                     preferred_element_type=jnp.float32) + b2_ref[...]
        # pre-scale by D^-1/2 for stage 3's aggregation
        h2_ref[...] = (h2 * dinv_ref[...]).astype(h2_ref.dtype)


def _agg_head_kernel(adj_ref, h2_ref, wm1_ref, bm1_ref, wm2_ref, bm2_ref,
                     dinv_ref, out_ref, acc_ref, *, tk, real_h1):
    """Stage 3: A @ h2 (adj streamed, h2 VMEM-resident) -> sigmoid -> MLP head."""
    k = pl.program_id(1)

    @pl.when(k == 0)
    def _():
        acc_ref[...] = jnp.zeros_like(acc_ref)

    off = pl.multiple_of(k * tk, tk)
    acc_ref[...] += jnp.dot(adj_ref[...], h2_ref[pl.ds(off, tk), :],
                            preferred_element_type=jnp.float32)

    @pl.when(k == pl.num_programs(1) - 1)
    def _():
        agg = acc_ref[...] * dinv_ref[...]
        s = _masked_sigmoid(agg, real_h1)           # final sigmoid + log map (maps cancel)
        # MLP head: Linear -> ReLU -> Linear.
        # TODO(synk): dropout (p=0.2) omitted — inference-mode identity.
        m = jnp.dot(s.astype(jnp.bfloat16), wm1_ref[...],
                    preferred_element_type=jnp.float32) + bm1_ref[...]
        m = jnp.maximum(m, 0.0)
        o = jnp.dot(m.astype(jnp.bfloat16), wm2_ref[...],
                    preferred_element_type=jnp.float32) + bm2_ref[...]
        out_ref[...] = o.astype(out_ref.dtype)


# ------------------------------ host wrapper ----------------------------------
def _pad2(a, rows, cols, dtype=None):
    out = jnp.zeros((rows, cols), dtype or a.dtype)
    return out.at[:a.shape[0], :a.shape[1]].set(a.astype(out.dtype))


def hgcn_forward(features, edge_index, params):
    """features: [N, F] float32; edge_index: [2, E] int32."""
    N, F = features.shape
    H0 = params["w1"].shape[1]
    H1 = params["w2"].shape[1]
    HM = params["wm1"].shape[1]
    OUT = params["wm2"].shape[1]

    # --- tile selection: big streamed tiles on the (last) reduction axis, row
    #     ("parallel") axis kept at >= 2 tiles whenever possible (v7x megacore).
    base = _round_up(N, LANE)
    if base >= 1024:
        tm, tk = 256, 512
    elif base >= 512:
        tm, tk = 256, 256
    elif base >= 256:
        tm, tk = 128, 256
    else:
        tm, tk = 128, 128
    Np = _round_up(N, tk)            # tk is a multiple of tm in every branch
    n_i, n_k = Np // tm, Np // tk
    tm1 = tk                         # stage-1 row tile (per-step work is tiny)

    Fp = _round_up(F, LANE)
    H0p = _round_up(H0, LANE)
    H1p = _round_up(H1, LANE)
    HMp = _round_up(HM, LANE)
    Op = _round_up(OUT, LANE)

    # GCN-style aggregation: exact 0/1 (A + I) streamed in bf16, D^-1/2 kept in
    # f32 and folded as row scales (pre-scale h, post-scale the accumulator).
    # TODO(synk): for large sparse graphs precompute adj_p/dinv outside the
    # per-call path or switch to a scalar-prefetch gather/segment-sum kernel.
    src, dst = edge_index[0], edge_index[1]
    A = jnp.zeros((N, N), jnp.float32)
    A = A.at[src, dst].set(1.0)
    A = A.at[dst, src].set(1.0)
    A = jnp.maximum(A, jnp.eye(N, dtype=jnp.float32))          # self loops
    dinv = 1.0 / jnp.sqrt(jnp.maximum(A.sum(axis=1), 1.0))
    adj_p = _pad2(A, Np, Np, jnp.bfloat16)                     # exact 0/1 values
    dinv_p = _pad2(dinv[:, None], Np, 1, jnp.float32)

    feat_p = _pad2(features, Np, Fp, jnp.bfloat16)
    w1 = _pad2(params["w1"], Fp, H0p, jnp.bfloat16)
    b1 = _pad2(params["b1"], 1, H0p, jnp.float32)
    w2 = _pad2(params["w2"], H0p, H1p, jnp.bfloat16)
    b2 = _pad2(params["b2"], 1, H1p, jnp.float32)
    wm1 = _pad2(params["wm1"], H1p, HMp, jnp.bfloat16)
    bm1 = _pad2(params["bm1"], 1, HMp, jnp.float32)
    wm2 = _pad2(params["wm2"], HMp, Op, jnp.bfloat16)
    bm2 = _pad2(params["bm2"], 1, Op, jnp.float32)

    cp_rows = pltpu.CompilerParams(
        dimension_semantics=("parallel",), vmem_limit_bytes=VMEM_LIMIT)
    cp_rows_k = pltpu.CompilerParams(
        dimension_semantics=("parallel", "arbitrary"), vmem_limit_bytes=VMEM_LIMIT)

    # --- stage 1: per-node tangent linear 1 (+ D^-1/2 pre-scale), row-parallel --
    h1 = pl.pallas_call(
        _pre_kernel,
        out_shape=jax.ShapeDtypeStruct((Np, H0p), jnp.bfloat16),
        grid=(Np // tm1,),
        in_specs=[
            pl.BlockSpec((tm1, Fp), lambda i: (i, 0)),
            pl.BlockSpec((Fp, H0p), lambda i: (0, 0)),
            pl.BlockSpec((1, H0p), lambda i: (0, 0)),
            pl.BlockSpec((tm1, 1), lambda i: (i, 0)),
        ],
        out_specs=pl.BlockSpec((tm1, H0p), lambda i: (i, 0)),
        compiler_params=cp_rows,
    )(feat_p, w1, b1, dinv_p)

    # --- stage 2: adj @ h1 (adj streamed, h1 resident) + sigmoid + linear 2 ----
    h2 = pl.pallas_call(
        functools.partial(_agg_mid_kernel, tk=tk, real_h0=H0),
        out_shape=jax.ShapeDtypeStruct((Np, H1p), jnp.bfloat16),
        grid=(n_i, n_k),
        in_specs=[
            pl.BlockSpec((tm, tk), lambda i, k: (i, k)),      # adjacency streamed
            pl.BlockSpec((Np, H0p), lambda i, k: (0, 0)),     # h1 VMEM-resident (1 fetch)
            pl.BlockSpec((H0p, H1p), lambda i, k: (0, 0)),
            pl.BlockSpec((1, H1p), lambda i, k: (0, 0)),
            pl.BlockSpec((tm, 1), lambda i, k: (i, 0)),
        ],
        out_specs=pl.BlockSpec((tm, H1p), lambda i, k: (i, 0)),
        scratch_shapes=[pltpu.VMEM((tm, H0p), jnp.float32)],
        compiler_params=cp_rows_k,
    )(adj_p, h1, w2, b2, dinv_p)

    # --- stage 3: adj @ h2 (adj streamed, h2 resident) + sigmoid + MLP head ----
    out_p = pl.pallas_call(
        functools.partial(_agg_head_kernel, tk=tk, real_h1=H1),
        out_shape=jax.ShapeDtypeStruct((Np, Op), jnp.float32),
        grid=(n_i, n_k),
        in_specs=[
            pl.BlockSpec((tm, tk), lambda i, k: (i, k)),
            pl.BlockSpec((Np, H1p), lambda i, k: (0, 0)),     # h2 VMEM-resident (1 fetch)
            pl.BlockSpec((H1p, HMp), lambda i, k: (0, 0)),
            pl.BlockSpec((1, HMp), lambda i, k: (0, 0)),
            pl.BlockSpec((HMp, Op), lambda i, k: (0, 0)),
            pl.BlockSpec((1, Op), lambda i, k: (0, 0)),
            pl.BlockSpec((tm, 1), lambda i, k: (i, 0)),
        ],
        out_specs=pl.BlockSpec((tm, Op), lambda i, k: (i, 0)),
        scratch_shapes=[pltpu.VMEM((tm, H1p), jnp.float32)],
        compiler_params=cp_rows_k,
    )(adj_p, h2, wm1, bm1, wm2, bm2, dinv_p)

    return out_p[:N, :OUT]


# ------------------------------ reference & init -------------------------------
def _ref_forward(features, edge_index, params):
    """Pure-JAX f32 reference (same math: origin exp/log maps cancel exactly)."""
    N = features.shape[0]
    src, dst = edge_index[0], edge_index[1]
    A = jnp.zeros((N, N), jnp.float32)
    A = A.at[src, dst].set(1.0)
    A = A.at[dst, src].set(1.0)
    A = jnp.maximum(A, jnp.eye(N, dtype=jnp.float32))
    dinv = 1.0 / jnp.sqrt(jnp.maximum(A.sum(axis=1), 1.0))
    adj = A * dinv[:, None] * dinv[None, :]

    h = features @ params["w1"] + params["b1"]
    h = jax.nn.sigmoid(adj @ h)
    h = h @ params["w2"] + params["b2"]
    h = jax.nn.sigmoid(adj @ h)
    m = jnp.maximum(h @ params["wm1"] + params["bm1"], 0.0)
    return m @ params["wm2"] + params["bm2"]


def init_params(key, input_dim, hidden_dims, output_dim):
    h0, h1, hm = hidden_dims
    ks = jax.random.split(key, 8)

    def lin(kw, kb, fan_in, fan_out):
        bound = 1.0 / jnp.sqrt(jnp.float32(fan_in))
        w = jax.random.uniform(kw, (fan_in, fan_out), jnp.float32, -bound, bound)
        b = jax.random.uniform(kb, (1, fan_out), jnp.float32, -bound, bound)
        return w, b

    w1, b1 = lin(ks[0], ks[1], input_dim, h0)
    w2, b2 = lin(ks[2], ks[3], h0, h1)
    wm1, bm1 = lin(ks[4], ks[5], h1, hm)
    wm2, bm2 = lin(ks[6], ks[7], hm, output_dim)
    return dict(w1=w1, b1=b1, w2=w2, b2=b2,
                wm1=wm1, bm1=bm1, wm2=wm2, bm2=bm2)


if __name__ == "__main__":
    key = jax.random.PRNGKey(0)
    # Small but grid-exercising example: N=512 -> tm=256, tk=256, 2x2 grid
    # (row axis has 2 "parallel" tiles; reduction axis has 2 streamed steps).
    N, input_dim = 512, 8
    hidden_dims = [16, 32, 32]
    output_dim = 4

    kf, kp = jax.random.split(key)
    features = jax.random.normal(kf, (N, input_dim), jnp.float32)
    # deterministic graph: ring edges i->(i+1)%N plus longer-range i->(i+7)%N
    idx = jnp.arange(N, dtype=jnp.int32)
    edge_index = jnp.stack(
        [jnp.concatenate([idx, idx]),
         jnp.concatenate([(idx + 1) % N, (idx + 7) % N])], axis=0)   # [2, 2N]

    params = init_params(kp, input_dim, hidden_dims, output_dim)

    fwd = jax.jit(hgcn_forward)
    out = jax.block_until_ready(fwd(features, edge_index, params))
    assert out.shape == (N, output_dim)
    assert bool(jnp.all(jnp.isfinite(out)))

    ref = _ref_forward(features, edge_index, params)
    err = float(jnp.max(jnp.abs(out - ref)))
    assert err < 0.2, f"max abs error vs reference too large: {err}"

    print("KERNEL_OK")
</pallas_src>

<mosaic_0001>
module attributes {stable_mosaic.version = 11 : i64} {
  func.func @_pre_kernel(%arg0: i32, %arg1: memref<256x128xbf16, #tpu.memory_space<vmem>>, %arg2: memref<128x128xbf16, #tpu.memory_space<vmem>>, %arg3: memref<1x128xf32, #tpu.memory_space<vmem>>, %arg4: memref<256x1xf32, #tpu.memory_space<vmem>>, %arg5: memref<256x128xbf16, #tpu.memory_space<vmem>>) attributes {dimension_semantics = [#tpu.dimension_semantics<parallel>], iteration_bounds = array<i64: 2>, scalar_prefetch = 0 : i64, scratch_operands = 0 : i64, tpu.core_type = #tpu.core_type<tc>, window_params = [{transform_indices = @transform_0, window_bounds = array<i64: 256, 128>}, {pipeline_mode = #tpu.pipeline_mode<synchronous>, transform_indices = @transform_1, window_bounds = array<i64: 128, 128>}, {pipeline_mode = #tpu.pipeline_mode<synchronous>, transform_indices = @transform_2, window_bounds = array<i64: 1, 128>}, {transform_indices = @transform_3, window_bounds = array<i64: 256, 1>}, {transform_indices = @transform_4, window_bounds = array<i64: 256, 128>}]} {
    %c0 = arith.constant 0 : index
    %c0_0 = arith.constant 0 : index
    %0 = vector.load %arg1[%c0, %c0_0] : memref<256x128xbf16, #tpu.memory_space<vmem>>, vector<256x128xbf16>
    %c0_1 = arith.constant 0 : index
    %c0_2 = arith.constant 0 : index
    %1 = vector.load %arg2[%c0_1, %c0_2] : memref<128x128xbf16, #tpu.memory_space<vmem>>, vector<128x128xbf16>
    %cst = arith.constant dense<0.000000e+00> : vector<256x128xf32>
    %2 = tpu.matmul %0, %1, %cst {dimension_numbers = #tpu.dot_dimension_numbers<[1], [0], [0], [1], [0, 0, 1, 1], [], []>} : vector<256x128xbf16>, vector<128x128xbf16>, vector<256x128xf32> -> vector<256x128xf32>
    %c0_3 = arith.constant 0 : index
    %c0_4 = arith.constant 0 : index
    %3 = vector.load %arg3[%c0_3, %c0_4] : memref<1x128xf32, #tpu.memory_space<vmem>>, vector<1x128xf32>
    %4 = vector.broadcast %3 : vector<1x128xf32> to vector<256x128xf32>
    %5 = arith.addf %2, %4 : vector<256x128xf32>
    %c0_5 = arith.constant 0 : index
    %c0_6 = arith.constant 0 : index
    %6 = vector.load %arg4[%c0_5, %c0_6] : memref<256x1xf32, #tpu.memory_space<vmem>>, vector<256x1xf32>
    %7 = vector.broadcast %6 : vector<256x1xf32> to vector<256x128xf32>
    %8 = arith.mulf %5, %7 : vector<256x128xf32>
    %9 = arith.truncf %8 : vector<256x128xf32> to vector<256x128xbf16>
    %c0_7 = arith.constant 0 : index
    %c0_8 = arith.constant 0 : index
    %10 = vector.load %arg5[%c0_7, %c0_8] : memref<256x128xbf16, #tpu.memory_space<vmem>>, vector<256x128xbf16>
    tpu.vector_store %arg5[%c0_7, %c0_8], %9 {strides = array<i32>} : memref<256x128xbf16, #tpu.memory_space<vmem>>, vector<256x128xbf16>,
    return
  }
  func.func @transform_0(%arg0: i32) -> (i32, i32) {
    %c0_i32 = arith.constant 0 : i32
    %c0_i32_0 = arith.constant 0 : i32
    return %arg0, %c0_i32 : i32, i32
  }
  func.func @transform_1(%arg0: i32) -> (i32, i32) {
    %c0_i32 = arith.constant 0 : i32
    %c0_i32_0 = arith.constant 0 : i32
    %c0_i32_1 = arith.constant 0 : i32
    return %c0_i32, %c0_i32_0 : i32, i32
  }
  func.func @transform_2(%arg0: i32) -> (i32, i32) {
    %c0_i32 = arith.constant 0 : i32
    %c0_i32_0 = arith.constant 0 : i32
    %c0_i32_1 = arith.constant 0 : i32
    return %c0_i32, %c0_i32_0 : i32, i32
  }
  func.func @transform_3(%arg0: i32) -> (i32, i32) {
    %c0_i32 = arith.constant 0 : i32
    %c0_i32_0 = arith.constant 0 : i32
    return %arg0, %c0_i32 : i32, i32
  }
  func.func @transform_4(%arg0: i32) -> (i32, i32) {
    %c0_i32 = arith.constant 0 : i32
    %c0_i32_0 = arith.constant 0 : i32
    return %arg0, %c0_i32 : i32, i32
  }
}

module attributes {stable_mosaic.version = 11 : i64} {
  func.func @_agg_mid_kernel(%arg0: i32, %arg1: i32, %arg2: memref<256x256xbf16, #tpu.memory_space<vmem>>, %arg3: memref<512x128xbf16, #tpu.memory_space<vmem>>, %arg4: memref<128x128xbf16, #tpu.memory_space<vmem>>, %arg5: memref<1x128xf32, #tpu.memory_space<vmem>>, %arg6: memref<256x1xf32, #tpu.memory_space<vmem>>, %arg7: memref<256x128xbf16, #tpu.memory_space<vmem>>, %arg8: memref<256x128xf32, #tpu.memory_space<vmem>>) attributes {dimension_semantics = [#tpu.dimension_semantics<parallel>, #tpu.dimension_semantics<arbitrary>], iteration_bounds = array<i64: 2, 2>, scalar_prefetch = 0 : i64, scratch_operands = 1 : i64, tpu.core_type = #tpu.core_type<tc>, window_params = [{transform_indices = @transform_0, window_bounds = array<i64: 256, 256>}, {pipeline_mode = #tpu.pipeline_mode<synchronous>, transform_indices = @transform_1, window_bounds = array<i64: 512, 128>}, {pipeline_mode = #tpu.pipeline_mode<synchronous>, transform_indices = @transform_2, window_bounds = array<i64: 128, 128>}, {pipeline_mode = #tpu.pipeline_mode<synchronous>, transform_indices = @transform_3, window_bounds = array<i64: 1, 128>}, {transform_indices = @transform_4, window_bounds = array<i64: 256, 1>}, {transform_indices = @transform_5, window_bounds = array<i64: 256, 128>}]} {
    %c0_i32 = arith.constant 0 : i32
    %0 = arith.cmpi eq, %arg1, %c0_i32 : i32
    %1 = arith.extui %0 : i1 to i32
    %c0_i32_0 = arith.constant 0 : i32
    %2 = arith.cmpi ne, %1, %c0_i32_0 : i32
    scf.if %2 {
      %cst_8 = arith.constant 0.000000e+00 : f32
      %15 = vector.broadcast %cst_8 : f32 to vector<256x128xf32>
      %c0_9 = arith.constant 0 : index
      %c0_10 = arith.constant 0 : index
      %16 = vector.load %arg8[%c0_9, %c0_10] : memref<256x128xf32, #tpu.memory_space<vmem>>, vector<256x128xf32>
      tpu.vector_store %arg8[%c0_9, %c0_10], %15 {strides = array<i32>} : memref<256x128xf32, #tpu.memory_space<vmem>>, vector<256x128xf32>,
    } else {
    }
    %c256_i32 = arith.constant 256 : i32
    %3 = arith.muli %arg1, %c256_i32 : i32
    %4 = tpu.assume_multiple %3, 256 : i32
    %c0 = arith.constant 0 : index
    %c0_1 = arith.constant 0 : index
    %5 = vector.load %arg8[%c0, %c0_1] : memref<256x128xf32, #tpu.memory_space<vmem>>, vector<256x128xf32>
    %c0_2 = arith.constant 0 : index
    %c0_3 = arith.constant 0 : index
    %6 = vector.load %arg2[%c0_2, %c0_3] : memref<256x256xbf16, #tpu.memory_space<vmem>>, vector<256x256xbf16>
    %7 = arith.index_cast %4 : i32 to index
    %c0_4 = arith.constant 0 : index
    %8 = vector.load %arg3[%7, %c0_4] : memref<512x128xbf16, #tpu.memory_space<vmem>>, vector<256x128xbf16>
    %cst = arith.constant dense<0.000000e+00> : vector<256x128xf32>
    %9 = tpu.matmul %6, %8, %cst {dimension_numbers = #tpu.dot_dimension_numbers<[1], [0], [0], [1], [0, 0, 1, 1], [], []>} : vector<256x256xbf16>, vector<256x128xbf16>, vector<256x128xf32> -> vector<256x128xf32>
    %10 = arith.addf %5, %9 : vector<256x128xf32>
    %c0_5 = arith.constant 0 : index
    %c0_6 = arith.constant 0 : index
    %11 = vector.load %arg8[%c0_5, %c0_6] : memref<256x128xf32, #tpu.memory_space<vmem>>, vector<256x128xf32>
    tpu.vector_store %arg8[%c0_5, %c0_6], %10 {strides = array<i32>} : memref<256x128xf32, #tpu.memory_space<vmem>>, vector<256x128xf32>,
    %c1_i32 = arith.constant 1 : i32
    %12 = arith.cmpi eq, %arg1, %c1_i32 : i32
    %13 = arith.extui %12 : i1 to i32
    %c0_i32_7 = arith.constant 0 : i32
    %14 = arith.cmpi ne, %13, %c0_i32_7 : i32
    scf.if %14 {
      %c0_8 = arith.constant 0 : index
      %c0_9 = arith.constant 0 : index
      %15 = vector.load %arg8[%c0_8, %c0_9] : memref<256x128xf32, #tpu.memory_space<vmem>>, vector<256x128xf32>
      %c0_10 = arith.constant 0 : index
      %c0_11 = arith.constant 0 : index
      %16 = vector.load %arg6[%c0_10, %c0_11] : memref<256x1xf32, #tpu.memory_space<vmem>>, vector<256x1xf32>
      %17 = vector.broadcast %16 : vector<256x1xf32> to vector<256x128xf32>
      %18 = arith.mulf %15, %17 : vector<256x128xf32>
      %cst_12 = arith.constant 0.000000e+00 : f32
      %19 = vector.broadcast %cst_12 : f32 to vector<256x128xf32>
      %20 = arith.subf %19, %18 : vector<256x128xf32>
      %21 = math.exp %20 : vector<256x128xf32>
      %cst_13 = arith.constant 1.000000e+00 : f32
      %22 = vector.broadcast %cst_13 : f32 to vector<256x128xf32>
      %23 = arith.addf %22, %21 : vector<256x128xf32>
      %24 = tpu.reciprocal %23 {approx = true} : vector<256x128xf32> -> vector<256x128xf32>
      %25 = tpu.iota {dimensions = array<i32: 1>} : vector<256x128xi32>
      %c16_i32 = arith.constant 16 : i32
      %26 = vector.broadcast %c16_i32 : i32 to vector<256x128xi32>
      %27 = arith.cmpi slt, %25, %26 : vector<256x128xi32>
      %cst_14 = arith.constant 0.000000e+00 : f32
      %28 = vector.broadcast %cst_14 : f32 to vector<256x128xf32>
      %29 = arith.select %27, %24, %28 : vector<256x128xi1>, vector<256x128xf32>
      %30 = arith.truncf %29 : vector<256x128xf32> to vector<256x128xbf16>
      %c0_15 = arith.constant 0 : index
      %c0_16 = arith.constant 0 : index
      %31 = vector.load %arg4[%c0_15, %c0_16] : memref<128x128xbf16, #tpu.memory_space<vmem>>, vector<128x128xbf16>
      %cst_17 = arith.constant dense<0.000000e+00> : vector<256x128xf32>
      %32 = tpu.matmul %30, %31, %cst_17 {dimension_numbers = #tpu.dot_dimension_numbers<[1], [0], [0], [1], [0, 0, 1, 1], [], []>} : vector<256x128xbf16>, vector<128x128xbf16>, vector<256x128xf32> -> vector<256x128xf32>
      %c0_18 = arith.constant 0 : index
      %c0_19 = arith.constant 0 : index
      %33 = vector.load %arg5[%c0_18, %c0_19] : memref<1x128xf32, #tpu.memory_space<vmem>>, vector<1x128xf32>
      %34 = vector.broadcast %33 : vector<1x128xf32> to vector<256x128xf32>
      %35 = arith.addf %32, %34 : vector<256x128xf32>
      %c0_20 = arith.constant 0 : index
      %c0_21 = arith.constant 0 : index
      %36 = vector.load %arg6[%c0_20, %c0_21] : memref<256x1xf32, #tpu.memory_space<vmem>>, vector<256x1xf32>
      %37 = vector.broadcast %36 : vector<256x1xf32> to vector<256x128xf32>
      %38 = arith.mulf %35, %37 : vector<256x128xf32>
      %39 = arith.truncf %38 : vector<256x128xf32> to vector<256x128xbf16>
      %c0_22 = arith.constant 0 : index
      %c0_23 = arith.constant 0 : index
      %40 = vector.load %arg7[%c0_22, %c0_23] : memref<256x128xbf16, #tpu.memory_space<vmem>>, vector<256x128xbf16>
      tpu.vector_store %arg7[%c0_22, %c0_23], %39 {strides = array<i32>} : memref<256x128xbf16, #tpu.memory_space<vmem>>, vector<256x128xbf16>,
    } else {
    }
    return
  }
  func.func @transform_0(%arg0: i32, %arg1: i32) -> (i32, i32) {
    %c0_i32 = arith.constant 0 : i32
    return %arg0, %arg1 : i32, i32
  }
  func.func @transform_1(%arg0: i32, %arg1: i32) -> (i32, i32) {
    %c0_i32 = arith.constant 0 : i32
    %c0_i32_0 = arith.constant 0 : i32
    %c0_i32_1 = arith.constant 0 : i32
    return %c0_i32, %c0_i32_0 : i32, i32
  }
  func.func @transform_2(%arg0: i32, %arg1: i32) -> (i32, i32) {
    %c0_i32 = arith.constant 0 : i32
    %c0_i32_0 = arith.constant 0 : i32
    %c0_i32_1 = arith.constant 0 : i32
    return %c0_i32, %c0_i32_0 : i32, i32
  }
  func.func @transform_3(%arg0: i32, %arg1: i32) -> (i32, i32) {
    %c0_i32 = arith.constant 0 : i32
    %c0_i32_0 = arith.constant 0 : i32
    %c0_i32_1 = arith.constant 0 : i32
    return %c0_i32, %c0_i32_0 : i32, i32
  }
  func.func @transform_4(%arg0: i32, %arg1: i32) -> (i32, i32) {
    %c0_i32 = arith.constant 0 : i32
    %c0_i32_0 = arith.constant 0 : i32
    return %arg0, %c0_i32 : i32, i32
  }
  func.func @transform_5(%arg0: i32, %arg1: i32) -> (i32, i32) {
    %c0_i32 = arith.constant 0 : i32
    %c0_i32_0 = arith.constant 0 : i32
    return %arg0, %c0_i32 : i32, i32
  }
}

module attributes {stable_mosaic.version = 11 : i64} {
  func.func @_agg_head_kernel(%arg0: i32, %arg1: i32, %arg2: memref<256x256xbf16, #tpu.memory_space<vmem>>, %arg3: memref<512x128xbf16, #tpu.memory_space<vmem>>, %arg4: memref<128x128xbf16, #tpu.memory_space<vmem>>, %arg5: memref<1x128xf32, #tpu.memory_space<vmem>>, %arg6: memref<128x128xbf16, #tpu.memory_space<vmem>>, %arg7: memref<1x128xf32, #tpu.memory_space<vmem>>, %arg8: memref<256x1xf32, #tpu.memory_space<vmem>>, %arg9: memref<256x128xf32, #tpu.memory_space<vmem>>, %arg10: memref<256x128xf32, #tpu.memory_space<vmem>>) attributes {dimension_semantics = [#tpu.dimension_semantics<parallel>, #tpu.dimension_semantics<arbitrary>], iteration_bounds = array<i64: 2, 2>, scalar_prefetch = 0 : i64, scratch_operands = 1 : i64, tpu.core_type = #tpu.core_type<tc>, window_params = [{transform_indices = @transform_0, window_bounds = array<i64: 256, 256>}, {pipeline_mode = #tpu.pipeline_mode<synchronous>, transform_indices = @transform_1, window_bounds = array<i64: 512, 128>}, {pipeline_mode = #tpu.pipeline_mode<synchronous>, transform_indices = @transform_2, window_bounds = array<i64: 128, 128>}, {pipeline_mode = #tpu.pipeline_mode<synchronous>, transform_indices = @transform_3, window_bounds = array<i64: 1, 128>}, {pipeline_mode = #tpu.pipeline_mode<synchronous>, transform_indices = @transform_4, window_bounds = array<i64: 128, 128>}, {pipeline_mode = #tpu.pipeline_mode<synchronous>, transform_indices = @transform_5, window_bounds = array<i64: 1, 128>}, {transform_indices = @transform_6, window_bounds = array<i64: 256, 1>}, {transform_indices = @transform_7, window_bounds = array<i64: 256, 128>}]} {
    %c0_i32 = arith.constant 0 : i32
    %0 = arith.cmpi eq, %arg1, %c0_i32 : i32
    %1 = arith.extui %0 : i1 to i32
    %c0_i32_0 = arith.constant 0 : i32
    %2 = arith.cmpi ne, %1, %c0_i32_0 : i32
    scf.if %2 {
      %cst_8 = arith.constant 0.000000e+00 : f32
      %15 = vector.broadcast %cst_8 : f32 to vector<256x128xf32>
      %c0_9 = arith.constant 0 : index
      %c0_10 = arith.constant 0 : index
      %16 = vector.load %arg10[%c0_9, %c0_10] : memref<256x128xf32, #tpu.memory_space<vmem>>, vector<256x128xf32>
      tpu.vector_store %arg10[%c0_9, %c0_10], %15 {strides = array<i32>} : memref<256x128xf32, #tpu.memory_space<vmem>>, vector<256x128xf32>,
    } else {
    }
    %c256_i32 = arith.constant 256 : i32
    %3 = arith.muli %arg1, %c256_i32 : i32
    %4 = tpu.assume_multiple %3, 256 : i32
    %c0 = arith.constant 0 : index
    %c0_1 = arith.constant 0 : index
    %5 = vector.load %arg10[%c0, %c0_1] : memref<256x128xf32, #tpu.memory_space<vmem>>, vector<256x128xf32>
    %c0_2 = arith.constant 0 : index
    %c0_3 = arith.constant 0 : index
    %6 = vector.load %arg2[%c0_2, %c0_3] : memref<256x256xbf16, #tpu.memory_space<vmem>>, vector<256x256xbf16>
    %7 = arith.index_cast %4 : i32 to index
    %c0_4 = arith.constant 0 : index
    %8 = vector.load %arg3[%7, %c0_4] : memref<512x128xbf16, #tpu.memory_space<vmem>>, vector<256x128xbf16>
    %cst = arith.constant dense<0.000000e+00> : vector<256x128xf32>
    %9 = tpu.matmul %6, %8, %cst {dimension_numbers = #tpu.dot_dimension_numbers<[1], [0], [0], [1], [0, 0, 1, 1], [], []>} : vector<256x256xbf16>, vector<256x128xbf16>, vector<256x128xf32> -> vector<256x128xf32>
    %10 = arith.addf %5, %9 : vector<256x128xf32>
    %c0_5 = arith.constant 0 : index
    %c0_6 = arith.constant 0 : index
    %11 = vector.load %arg10[%c0_5, %c0_6] : memref<256x128xf32, #tpu.memory_space<vmem>>, vector<256x128xf32>
    tpu.vector_store %arg10[%c0_5, %c0_6], %10 {strides = array<i32>} : memref<256x128xf32, #tpu.memory_space<vmem>>, vector<256x128xf32>,
    %c1_i32 = arith.constant 1 : i32
    %12 = arith.cmpi eq, %arg1, %c1_i32 : i32
    %13 = arith.extui %12 : i1 to i32
    %c0_i32_7 = arith.constant 0 : i32
    %14 = arith.cmpi ne, %13, %c0_i32_7 : i32
    scf.if %14 {
      %c0_8 = arith.constant 0 : index
      %c0_9 = arith.constant 0 : index
      %15 = vector.load %arg10[%c0_8, %c0_9] : memref<256x128xf32, #tpu.memory_space<vmem>>, vector<256x128xf32>
      %c0_10 = arith.constant 0 : index
      %c0_11 = arith.constant 0 : index
      %16 = vector.load %arg8[%c0_10, %c0_11] : memref<256x1xf32, #tpu.memory_space<vmem>>, vector<256x1xf32>
      %17 = vector.broadcast %16 : vector<256x1xf32> to vector<256x128xf32>
      %18 = arith.mulf %15, %17 : vector<256x128xf32>
      %cst_12 = arith.constant 0.000000e+00 : f32
      %19 = vector.broadcast %cst_12 : f32 to vector<256x128xf32>
      %20 = arith.subf %19, %18 : vector<256x128xf32>
      %21 = math.exp %20 : vector<256x128xf32>
      %cst_13 = arith.constant 1.000000e+00 : f32
      %22 = vector.broadcast %cst_13 : f32 to vector<256x128xf32>
      %23 = arith.addf %22, %21 : vector<256x128xf32>
      %24 = tpu.reciprocal %23 {approx = true} : vector<256x128xf32> -> vector<256x128xf32>
      %25 = tpu.iota {dimensions = array<i32: 1>} : vector<256x128xi32>
      %c32_i32 = arith.constant 32 : i32
      %26 = vector.broadcast %c32_i32 : i32 to vector<256x128xi32>
      %27 = arith.cmpi slt, %25, %26 : vector<256x128xi32>
      %cst_14 = arith.constant 0.000000e+00 : f32
      %28 = vector.broadcast %cst_14 : f32 to vector<256x128xf32>
      %29 = arith.select %27, %24, %28 : vector<256x128xi1>, vector<256x128xf32>
      %30 = arith.truncf %29 : vector<256x128xf32> to vector<256x128xbf16>
      %c0_15 = arith.constant 0 : index
      %c0_16 = arith.constant 0 : index
      %31 = vector.load %arg4[%c0_15, %c0_16] : memref<128x128xbf16, #tpu.memory_space<vmem>>, vector<128x128xbf16>
      %cst_17 = arith.constant dense<0.000000e+00> : vector<256x128xf32>
      %32 = tpu.matmul %30, %31, %cst_17 {dimension_numbers = #tpu.dot_dimension_numbers<[1], [0], [0], [1], [0, 0, 1, 1], [], []>} : vector<256x128xbf16>, vector<128x128xbf16>, vector<256x128xf32> -> vector<256x128xf32>
      %c0_18 = arith.constant 0 : index
      %c0_19 = arith.constant 0 : index
      %33 = vector.load %arg5[%c0_18, %c0_19] : memref<1x128xf32, #tpu.memory_space<vmem>>, vector<1x128xf32>
      %34 = vector.broadcast %33 : vector<1x128xf32> to vector<256x128xf32>
      %35 = arith.addf %32, %34 : vector<256x128xf32>
      %cst_20 = arith.constant 0.000000e+00 : f32
      %36 = vector.broadcast %cst_20 : f32 to vector<256x128xf32>
      %37 = arith.maximumf %35, %36 : vector<256x128xf32>
      %38 = arith.truncf %37 : vector<256x128xf32> to vector<256x128xbf16>
      %c0_21 = arith.constant 0 : index
      %c0_22 = arith.constant 0 : index
      %39 = vector.load %arg6[%c0_21, %c0_22] : memref<128x128xbf16, #tpu.memory_space<vmem>>, vector<128x128xbf16>
      %cst_23 = arith.constant dense<0.000000e+00> : vector<256x128xf32>
      %40 = tpu.matmul %38, %39, %cst_23 {dimension_numbers = #tpu.dot_dimension_numbers<[1], [0], [0], [1], [0, 0, 1, 1], [], []>} : vector<256x128xbf16>, vector<128x128xbf16>, vector<256x128xf32> -> vector<256x128xf32>
      %c0_24 = arith.constant 0 : index
      %c0_25 = arith.constant 0 : index
      %41 = vector.load %arg7[%c0_24, %c0_25] : memref<1x128xf32, #tpu.memory_space<vmem>>, vector<1x128xf32>
      %42 = vector.broadcast %41 : vector<1x128xf32> to vector<256x128xf32>
      %43 = arith.addf %40, %42 : vector<256x128xf32>
      %c0_26 = arith.constant 0 : index
      %c0_27 = arith.constant 0 : index
      %44 = vector.load %arg9[%c0_26, %c0_27] : memref<256x128xf32, #tpu.memory_space<vmem>>, vector<256x128xf32>
      tpu.vector_store %arg9[%c0_26, %c0_27], %43 {strides = array<i32>} : memref<256x128xf32, #tpu.memory_space<vmem>>, vector<256x128xf32>,
    } else {
    }
    return
  }
  func.func @transform_0(%arg0: i32, %arg1: i32) -> (i32, i32) {
    %c0_i32 = arith.constant 0 : i32
    return %arg0, %arg1 : i32, i32
  }
  func.func @transform_1(%arg0: i32, %arg1: i32) -> (i32, i32) {
    %c0_i32 = arith.constant 0 : i32
    %c0_i32_0 = arith.constant 0 : i32
    %c0_i32_1 = arith.constant 0 : i32
    return %c0_i32, %c0_i32_0 : i32, i32
  }
  func.func @transform_2(%arg0: i32, %arg1: i32) -> (i32, i32) {
    %c0_i32 = arith.constant 0 : i32
    %c0_i32_0 = arith.constant 0 : i32
    %c0_i32_1 = arith.constant 0 : i32
    return %c0_i32, %c0_i32_0 : i32, i32
  }
  func.func @transform_3(%arg0: i32, %arg1: i32) -> (i32, i32) {
    %c0_i32 = arith.constant 0 : i32
    %c0_i32_0 = arith.constant 0 : i32
    %c0_i32_1 = arith.constant 0 : i32
    return %c0_i32, %c0_i32_0 : i32, i32
  }
  func.func @transform_4(%arg0: i32, %arg1: i32) -> (i32, i32) {
    %c0_i32 = arith.constant 0 : i32
    %c0_i32_0 = arith.constant 0 : i32
    %c0_i32_1 = arith.constant 0 : i32
    return %c0_i32, %c0_i32_0 : i32, i32
  }
  func.func @transform_5(%arg0: i32, %arg1: i32) -> (i32, i32) {
    %c0_i32 = arith.constant 0 : i32
    %c0_i32_0 = arith.constant 0 : i32
    %c0_i32_1 = arith.constant 0 : i32
    return %c0_i32, %c0_i32_0 : i32, i32
  }
  func.func @transform_6(%arg0: i32, %arg1: i32) -> (i32, i32) {
    %c0_i32 = arith.constant 0 : i32
    %c0_i32_0 = arith.constant 0 : i32
    return %arg0, %c0_i32 : i32, i32
  }
  func.func @transform_7(%arg0: i32, %arg1: i32) -> (i32, i32) {
    %c0_i32 = arith.constant 0 : i32
    %c0_i32_0 = arith.constant 0 : i32
    return %arg0, %c0_i32 : i32, i32
  }
}

</mosaic_0001>

<bundles_post_ra>
// kernel: hgcn_forward.3
= control target key start
LH: loop header
LB: loop body
LE: loop exit
PB: predicated region body
PF: predicated region fallthrough
CT: control target
= control target key end

     0   :  { %s1390_s15 = smov 0   ;;  %s1591_s0 = inlined_call_operand.vmem [shape: bf16[512,128], index: 0, kind: input, shape index: {}]   ;;  %s1592_s1 = inlined_call_operand.vmem [shape: bf16[128,128], index: 1, kind: input, shape index: {}]   ;;  %s1593_s2 = inlined_call_operand.vmem [shape: f32[1,128], index: 2, kind: input, shape index: {}]   ;;  %s1594_s3 = inlined_call_operand.vmem [shape: f32[512,1], index: 3, kind: input, shape index: {}]   ;;  %s1595_s4 = inlined_call_operand.vmem [shape: bf16[512,128], index: 4, kind: output, shape index: {}]  }
   0x1 LB: > { %s1036_s16 = sadd.s32 4294967295, %s1362_s15   ;;  %p1040_p0 = scmp.ge.s32.totalorder %s1362_s15, 1  ;;  %s1362_s15 = sphi %s1390_s15, %s14_s15  }
   0x2   : > { %p174_p1 = scmp.lt.s32.totalorder %s1362_s15, 3 }
   0x4   : > { %p175_p2 = pnand %p1040_p0, %p174_p1 }
   0x5   : > { %s1041_s21 = sshll.u32 (!%p175_p2), %s1036_s16, 5 }
   0x6   : > { %178 = sbr.rel (%p175_p2) target bundleno = 275 (0x113), region = 36  ;;  %p206_p3 = scmp.lt.s32.totalorder (!%p175_p2), %s1041_s21, 63 }
   0xb   : > { %v1332_v0 = vld [vmem:[%s1592_s1 + $0x38] sm:$0xff]   ;;  %v1333_v1 = vld [vmem:[%s1592_s1 + $0x30] sm:$0xff]   ;;  %v1364_v2 = vmov 0   ;;  %v1334_v3 = vld [vmem:[%s1592_s1 + $0x28] sm:$0xff]   ;;  %s1597_s21 = smov (!%p206_p3, %s1041_s21), 63 }
   0xc   : > { %1331 = vset.pattern.permute.xlu1 %v1364_v2  ;;  %1330 = vset.pattern.permute.xlu0 %v1364_v2  ;;  %s1044_s24 = sshll.u32 %s1597_s21, 3  ;;  %s1042_s28 = sshll.u32 %s1597_s21, 2  ;;  %v1335_v4 = vld [vmem:[%s1592_s1 + $0x20] sm:$0xff]   ;;  %v1336_v9 = vld [vmem:[%s1592_s1 + $0x18] sm:$0xff]   ;;  %v1337_v14 = vld [vmem:[%s1592_s1 + $0x10] sm:$0xff]  }
   0xd   : > { %1257 = vmatprep.subr.bf16.mxu0 %v1332_v0  ;;  %1305 = vmatprep.subr.bf16.mxu1 %v1332_v0  ;;  %s1413_s27 = scalar_lea.vmem %s1594_s3, %s1044_s24  ;;  %s1426_s7 = scalar_lea.vmem %s1591_s0, %s1042_s28  ;;  %v1338_v17 = vld [vmem:[%s1592_s1 + $0x8] sm:$0xff]   ;;  %v1339_v20 = vld [vmem:[%s1592_s1] sm:$0xff]  }
   0xe   : > { %1258 = vmatpush3.bf16.msra.mxu0 %v1332_v0  ;;  %1313 = vmatpush3.bf16.msra.mxu1 %v1332_v0  ;;  %v586_v5 = vld [vmem:[%s1413_s27 + $0x10] sm:$0xff]  ;;  %v584_v6 = vld [vmem:[%s1413_s27] sm:$0xff]  ;;  %v587_v7 = vld [vmem:[%s1413_s27 + $0x18] sm:$0xff]  ;;  %s1530_s22 = scalar_lea.vmem %s1595_s4, %s1042_s28 }
   0xf   : > { %1259 = vmatprep.subr.bf16.mxu0 %v1333_v1  ;;  %1306 = vmatprep.subr.bf16.mxu1 %v1333_v1  ;;  %v585_v8 = vld [vmem:[%s1413_s27 + $0x8] sm:$0xff]  ;;  %v1340_v11 = vld [vmem:[%s1426_s7] sm:$0xff]   ;;  %v591_v15 = vld [vmem:[%s1413_s27 + $0x38] sm:$0xff] }
  0x10   : > { %628 = vperm.xlu1 %1331, %v586_v5   ;;  %618 = vperm.xlu0 %1330, %v584_v6   ;;  %v589_v10 = vld [vmem:[%s1413_s27 + $0x28] sm:$0xff]  ;;  %v588_v12 = vld [vmem:[%s1413_s27 + $0x20] sm:$0xff]  ;;  %v590_v16 = vld [vmem:[%s1413_s27 + $0x30] sm:$0xff] }
  0x11   : > { %1273 = vmatprep.mubr.bf16.mxu0 %v1340_v11  ;;  %v1341_v13 = vld [vmem:[%s1426_s7 + $0x40] sm:$0xff]   ;;  %v593_v18 = vld [vmem:[%s1413_s27 + $0x48] sm:$0xff]  ;;  %v595_v21 = vld [vmem:[%s1413_s27 + $0x58] sm:$0xff] }
  0x12   : > { %1260 = vmatpush3.bf16.msra.mxu0 %v1333_v1  ;;  %1314 = vmatpush3.bf16.msra.mxu1 %v1333_v1  ;;  %v592_v19 = vld [vmem:[%s1413_s27 + $0x40] sm:$0xff]  ;;  %v594_v22 = vld [vmem:[%s1413_s27 + $0x50] sm:$0xff]  ;;  %v1342_v23 = vld [vmem:[%s1426_s7 + $0x8] sm:$0xff]  }
  0x13   : > { %1261 = vmatprep.subr.bf16.mxu0 %v1334_v3  ;;  %1307 = vmatprep.subr.bf16.mxu1 %v1334_v3  ;;  %v1343_v24 = vld [vmem:[%s1426_s7 + $0x48] sm:$0xff]   ;;  %v596_v26 = vld [vmem:[%s1413_s27 + $0x60] sm:$0xff]  ;;  %v1344_v27 = vld [vmem:[%s1426_s7 + $0x10] sm:$0xff]  }
  0x14   : > { %633 = vperm.xlu1 %1331, %v587_v7   ;;  %623 = vperm.xlu0 %1330, %v585_v8   ;;  %v597_v25 = vld [vmem:[%s1413_s27 + $0x68] sm:$0xff]  ;;  %v1345_v28 = vld [vmem:[%s1426_s7 + $0x50] sm:$0xff]   ;;  %v599_v29 = vld [vmem:[%s1413_s27 + $0x78] sm:$0xff] }
  0x15   : > { %1289 = vmatprep.mubr.bf16.mxu1 %v1341_v13  ;;  %v598_v30 = vld [vmem:[%s1413_s27 + $0x70] sm:$0xff]  ;;  %v1346_v31 = vld [vmem:[%s1426_s7 + $0x18] sm:$0xff]   ;;  %v601_v33 = vld [vmem:[%s1413_s27 + $0x88] sm:$0xff] }
  0x16   : > { %1262 = vmatpush3.bf16.msra.mxu0 %v1334_v3  ;;  %1315 = vmatpush3.bf16.msra.mxu1 %v1334_v3  ;;  %v1347_v32 = vld [vmem:[%s1426_s7 + $0x58] sm:$0xff]   ;;  %v600_v34 = vld [vmem:[%s1413_s27 + $0x80] sm:$0xff]  ;;  %v602_v38 = vld [vmem:[%s1413_s27 + $0x90] sm:$0xff] }
  0x17   : > { %1263 = vmatprep.subr.bf16.mxu0 %v1335_v4  ;;  %1308 = vmatprep.subr.bf16.mxu1 %v1335_v4  ;;  %v1348_v35 = vld [vmem:[%s1426_s7 + $0x20] sm:$0xff]   ;;  %v603_v37 = vld [vmem:[%s1413_s27 + $0x98] sm:$0xff]  ;;  %v1350_v39 = vld [vmem:[%s1426_s7 + $0x28] sm:$0xff]  }
  0x18   : > { %643 = vperm.xlu1 %1331, %v589_v10   ;;  %638 = vperm.xlu0 %1330, %v588_v12   ;;  %v1349_v36 = vld [vmem:[%s1426_s7 + $0x60] sm:$0xff]   ;;  %v1351_v40 = vld [vmem:[%s1426_s7 + $0x68] sm:$0xff]   ;;  %v1352_v43 = vld [vmem:[%s1426_s7 + $0x30] sm:$0xff]  }
  0x19   : > { %v605_v41 = vld [vmem:[%s1413_s27 + $0xa8] sm:$0xff]  ;;  %v604_v42 = vld [vmem:[%s1413_s27 + $0xa0] sm:$0xff]  ;;  %v1353_v44 = vld [vmem:[%s1426_s7 + $0x70] sm:$0xff]  }
  0x1a   : > { %1264 = vmatpush3.bf16.msra.mxu0 %v1335_v4  ;;  %1316 = vmatpush3.bf16.msra.mxu1 %v1335_v4  ;;  %v607_v45 = vld [vmem:[%s1413_s27 + $0xb8] sm:$0xff]  ;;  %v606_v46 = vld [vmem:[%s1413_s27 + $0xb0] sm:$0xff]  ;;  %v609_v49 = vld [vmem:[%s1413_s27 + $0xc8] sm:$0xff] }
  0x1b   : > { %1265 = vmatprep.subr.bf16.mxu0 %v1336_v9  ;;  %1309 = vmatprep.subr.bf16.mxu1 %v1336_v9  ;;  %v1354_v47 = vld [vmem:[%s1426_s7 + $0x38] sm:$0xff]   ;;  %v608_v50 = vld [vmem:[%s1413_s27 + $0xc0] sm:$0xff]  ;;  %v610_v52 = vld [vmem:[%s1413_s27 + $0xd0] sm:$0xff] }
  0x1c   : > { %653 = vperm.xlu1 %1331, %v591_v15   ;;  %648 = vperm.xlu0 %1330, %v590_v16   ;;  %v1355_v48 = vld [vmem:[%s1426_s7 + $0x78] sm:$0xff]   ;;  %v613_v53 = vld [vmem:[%s1413_s27 + $0xe8] sm:$0xff]  ;;  %v612_v54 = vld [vmem:[%s1413_s27 + $0xe0] sm:$0xff] }
  0x1d   : > { %v611_v51 = vld [vmem:[%s1413_s27 + $0xd8] sm:$0xff]  ;;  %v614_v56 = vld [vmem:[%s1413_s27 + $0xf0] sm:$0xff]  ;;  %v1515_v15 = vld [vmem:[%s1593_s2] ss:$0 sm:$0xff] }
  0x1e   : > { %1266 = vmatpush3.bf16.msra.mxu0 %v1336_v9  ;;  %1317 = vmatpush3.bf16.msra.mxu1 %v1336_v9  ;;  %v615_v55 = vld [vmem:[%s1413_s27 + $0xf8] sm:$0xff] }
  0x1f   : > { %1267 = vmatprep.subr.bf16.mxu0 %v1337_v14  ;;  %1310 = vmatprep.subr.bf16.mxu1 %v1337_v14 }
  0x20   : > { %663 = vperm.xlu1 %1331, %v593_v18   ;;  %658 = vperm.xlu0 %1330, %v592_v19  }
  0x22   : > { %1268 = vmatpush3.bf16.msra.mxu0 %v1337_v14  ;;  %1318 = vmatpush3.bf16.msra.mxu1 %v1337_v14 }
  0x23   : > { %1269 = vmatprep.subr.bf16.mxu0 %v1338_v17  ;;  %1311 = vmatprep.subr.bf16.mxu1 %v1338_v17 }
  0x24   : > { %673 = vperm.xlu1 %1331, %v595_v21   ;;  %668 = vperm.xlu0 %1330, %v594_v22  }
  0x26   : > { %1270 = vmatpush3.bf16.msra.mxu0 %v1338_v17  ;;  %1319 = vmatpush3.bf16.msra.mxu1 %v1338_v17 }
  0x27   : > { %1271 = vmatprep.subr.bf16.mxu0 %v1339_v20  ;;  %1312 = vmatprep.subr.bf16.mxu1 %v1339_v20 }
  0x28   : > { %683 = vperm.xlu1 %1331, %v597_v25   ;;  %678 = vperm.xlu0 %1330, %v596_v26  }
  0x2a   : > { %1272 = vmatpush3.bf16.msra.mxu0 %v1339_v20  ;;  %1320 = vmatpush3.bf16.msra.mxu1 %v1339_v20 }
  0x2c   : > { %693 = vperm.xlu1 %1331, %v599_v29   ;;  %688 = vperm.xlu0 %1330, %v598_v30  }
  0x2d   : > { %1274 = vmatmul.mubr.bf16.vlgmr.msra.gmra.mxu0 %v1342_v23  ;;  %1290 = vmatmul.mubr.bf16.vlgmr.msra.gmra.mxu1 %v1343_v24 }
  0x2e   : > { %1277 = vmatprep.mubr.bf16.mxu0 %v1344_v27  ;;  %1293 = vmatprep.mubr.bf16.mxu1 %v1345_v28 }
  0x30   : > { %703 = vperm.xlu1 %1331, %v601_v33   ;;  %698 = vperm.xlu0 %1330, %v600_v34  }
  0x34   : > { %713 = vperm.xlu1 %1331, %v603_v37   ;;  %708 = vperm.xlu0 %1330, %v602_v38  }
  0x35   : > { %1278 = vmatmul.mubr.bf16.gmra.mxu0 %v1346_v31  ;;  %1294 = vmatmul.mubr.bf16.gmra.mxu1 %v1347_v32 }
  0x36   : > { %1281 = vmatprep.mubr.bf16.mxu0 %v1348_v35  ;;  %1297 = vmatprep.mubr.bf16.mxu1 %v1349_v36 }
  0x38   : > { %723 = vperm.xlu1 %1331, %v605_v41   ;;  %718 = vperm.xlu0 %1330, %v604_v42  }
  0x3c   : > { %733 = vperm.xlu1 %1331, %v607_v45   ;;  %728 = vperm.xlu0 %1330, %v606_v46  }
  0x3d   : > { %1282 = vmatmul.mubr.bf16.gmra.mxu0 %v1350_v39  ;;  %1298 = vmatmul.mubr.bf16.gmra.mxu1 %v1351_v40 }
  0x3e   : > { %1285 = vmatprep.mubr.bf16.mxu0 %v1352_v43  ;;  %1301 = vmatprep.mubr.bf16.mxu1 %v1353_v44 }
  0x40   : > { %743 = vperm.xlu1 %1331, %v609_v49   ;;  %738 = vperm.xlu0 %1330, %v608_v50  }
  0x44   : > { %753 = vperm.xlu1 %1331, %v611_v51   ;;  %748 = vperm.xlu0 %1330, %v610_v52  }
  0x45   : > { %1286 = vmatmul.mubr.bf16.gmra.mxu0 %v1354_v47  ;;  %1302 = vmatmul.mubr.bf16.gmra.mxu1 %v1355_v48 }
  0x48   : > { %763 = vperm.xlu1 %1331, %v613_v53   ;;  %758 = vperm.xlu0 %1330, %v612_v54  }
  0x4c   : > { %773 = vperm.xlu1 %1331, %v615_v55   ;;  %768 = vperm.xlu0 %1330, %v614_v56  }
  0x8b   : > { %v629_v57 = vpop.permute.xlu1 %628  ;;  %v619_v58 = vpop.permute.xlu0 %618 }
  0x8f   : > { %v634_v59 = vpop.permute.xlu1 %633  ;;  %v624_v60 = vpop.permute.xlu0 %623 }
  0x93   : > { %v1486_v61 = vpop.permute.xlu1 %643  ;;  %v1488_v62 = vpop.permute.xlu0 %638 }
  0x97   : > { %v1490_v63 = vpop.permute.xlu1 %653  ;;  %v1492_v0 = vpop.permute.xlu0 %648 }
  0x9b   : > { %v1494_v1 = vpop.permute.xlu1 %663  ;;  %v1496_v2 = vpop.permute.xlu0 %658 }
  0x9f   : > { %v1498_v3 = vpop.permute.xlu1 %673  ;;  %v1500_v4 = vpop.permute.xlu0 %668 }
  0xa3   : > { %v1502_v5 = vpop.permute.xlu1 %683  ;;  %v1504_v6 = vpop.permute.xlu0 %678 }
  0xa7   : > { %v1506_v7 = vpop.permute.xlu1 %693  ;;  %v1508_v8 = vpop.permute.xlu0 %688 }
  0xab   : > { %v704_v9 = vpop.permute.xlu1 %703  ;;  %v699_v10 = vpop.permute.xlu0 %698 }
  0xaf   : > { %v714_v11 = vpop.permute.xlu1 %713  ;;  %v709_v12 = vpop.permute.xlu0 %708 }
  0xb3   : > { %v1510_v13 = vpop.permute.xlu1 %723  ;;  %v719_v14 = vpop.permute.xlu0 %718 }
  0xb7   : > { %v734_v26 = vpop.permute.xlu1 %733  ;;  %v729_v27 = vpop.permute.xlu0 %728 }
  0xbb   : > { %v1534_v50 = vpop.permute.xlu1 %743  ;;  %v739_v51 = vpop.permute.xlu0 %738 }
  0xed   : > { %v1275_v16 = vpop.f32.mrf.mxu0  ;;  %v1291_v17 = vpop.f32.mrf.mxu1 }
  0xee   : > { %v466_v18 = vadd.f32 %v1275_v16, %v1515_v15  ;;  %v530_v19 = vadd.f32 %v1291_v17, %v1515_v15 }
  0xef   : > { %v457_v20 = vpop.f32.mrf.mxu0  ;;  %v521_v21 = vpop.f32.mrf.mxu1 }
  0xf0   : > { %v458_v22 = vadd.f32 %v1515_v15, %v457_v20  ;;  %v522_v23 = vadd.f32 %v1515_v15, %v521_v21  ;;  %v778_v30 = vmul.f32 %v629_v57, %v466_v18  ;;  %v794_v31 = vmul.f32 %v709_v12, %v530_v19 }
  0xf1   : > { %v1276_v24 = vpop.f32.mrf.mxu0  ;;  %v1292_v25 = vpop.f32.mrf.mxu1 }
  0xf2   : > { %v469_v28 = vadd.f32 %v1276_v24, %v1515_v15  ;;  %v533_v29 = vadd.f32 %v1292_v25, %v1515_v15  ;;  %v776_v38 = vmul.f32 %v619_v58, %v458_v22  ;;  %v792_v39 = vmul.f32 %v699_v10, %v522_v23  ;;  %v754_v23 = vpop.permute.xlu1 %753  ;;  %v749_v24 = vpop.permute.xlu0 %748 }
  0xf3   : > { %v460_v32 = vpop.f32.mrf.mxu0  ;;  %v524_v33 = vpop.f32.mrf.mxu1 }
  0xf4   : > { %v779_v34 = vmul.f32 %v634_v59, %v469_v28  ;;  %v795_v35 = vmul.f32 %v714_v11, %v533_v29  ;;  %v461_v36 = vadd.f32 %v1515_v15, %v460_v32  ;;  %v525_v37 = vadd.f32 %v1515_v15, %v524_v33 }
  0xf5   : > { %v1279_v40 = vpop.f32.mrf.mxu0  ;;  %v1295_v41 = vpop.f32.mrf.mxu1 }
  0xf6   : > { %v1146_v42 = vpack.c.bf16 %v779_v34, %v778_v30  ;;  %v1186_v43 = vpack.c.bf16 %v795_v35, %v794_v31  ;;  %v777_v44 = vmul.f32 %v624_v60, %v461_v36  ;;  %v793_v45 = vmul.f32 %v704_v9, %v525_v37 }
  0xf7   : > { %v482_v46 = vadd.f32 %v1279_v40, %v1515_v15  ;;  %v546_v47 = vadd.f32 %v1295_v41, %v1515_v15  ;;  %v473_v48 = vpop.f32.mrf.mxu0  ;;  %v537_v49 = vpop.f32.mrf.mxu1 }
  0xf8   : > { %1218 = vst [vmem:[%s1530_s22 + $0x8] sm:$0xff] %v1146_v42   ;;  %1226 = vst [vmem:[%s1530_s22 + $0x48] sm:$0xff] %v1186_v43   ;;  %v1141_v52 = vpack.c.bf16 %v777_v44, %v776_v38  ;;  %v1181_v53 = vpack.c.bf16 %v793_v45, %v792_v39  ;;  %v474_v54 = vadd.f32 %v1515_v15, %v473_v48  ;;  %v764_v39 = vpop.permute.xlu1 %763  ;;  %v759_v40 = vpop.permute.xlu0 %758 }
  0xf9   : > { %v538_v55 = vadd.f32 %v1515_v15, %v537_v49  ;;  %v1280_v56 = vpop.f32.mrf.mxu0  ;;  %v1296_v57 = vpop.f32.mrf.mxu1  ;;  %v782_v60 = vmul.f32 %v1492_v0, %v482_v46  ;;  %v798_v9 = vmul.f32 %v729_v27, %v546_v47 }
  0xfa   : > { %1142 = vst [vmem:[%s1530_s22] sm:$0xff] %v1141_v52   ;;  %1225 = vst [vmem:[%s1530_s22 + $0x40] sm:$0xff] %v1181_v53   ;;  %v485_v58 = vadd.f32 %v1280_v56, %v1515_v15  ;;  %v549_v59 = vadd.f32 %v1296_v57, %v1515_v15  ;;  %v780_v19 = vmul.f32 %v1488_v62, %v474_v54 }
  0xfb   : > { %v476_v10 = vpop.f32.mrf.mxu0  ;;  %v540_v11 = vpop.f32.mrf.mxu1  ;;  %v796_v20 = vmul.f32 %v719_v14, %v538_v55 }
  0xfc   : > { %v783_v12 = vmul.f32 %v1490_v63, %v485_v58  ;;  %v799_v16 = vmul.f32 %v734_v26, %v549_v59  ;;  %v477_v17 = vadd.f32 %v1515_v15, %v476_v10  ;;  %v541_v18 = vadd.f32 %v1515_v15, %v540_v11 }
  0xfd   : > { %v1283_v21 = vpop.f32.mrf.mxu0  ;;  %v1299_v22 = vpop.f32.mrf.mxu1 }
  0xfe   : > { %v1156_v0 = vpack.c.bf16 %v783_v12, %v782_v60  ;;  %v1196_v25 = vpack.c.bf16 %v799_v16, %v798_v9  ;;  %v781_v63 = vmul.f32 %v1486_v61, %v477_v17  ;;  %v797_v26 = vmul.f32 %v1510_v13, %v541_v18  ;;  %v774_v60 = vpop.permute.xlu1 %773  ;;  %v769_v9 = vpop.permute.xlu0 %768 }
  0xff   : > { %v498_v27 = vadd.f32 %v1283_v21, %v1515_v15  ;;  %v562_v28 = vadd.f32 %v1299_v22, %v1515_v15  ;;  %v489_v29 = vpop.f32.mrf.mxu0  ;;  %v553_v30 = vpop.f32.mrf.mxu1 }
 0x100   : > { %1220 = vst [vmem:[%s1530_s22 + $0x18] sm:$0xff] %v1156_v0   ;;  %1228 = vst [vmem:[%s1530_s22 + $0x58] sm:$0xff] %v1196_v25   ;;  %v1151_v62 = vpack.c.bf16 %v781_v63, %v780_v19  ;;  %v1191_v14 = vpack.c.bf16 %v797_v26, %v796_v20  ;;  %v490_v31 = vadd.f32 %v1515_v15, %v489_v29 }
 0x101   : > { %v554_v32 = vadd.f32 %v1515_v15, %v553_v30  ;;  %v1284_v33 = vpop.f32.mrf.mxu0  ;;  %v1300_v34 = vpop.f32.mrf.mxu1  ;;  %v786_v35 = vmul.f32 %v1500_v4, %v498_v27  ;;  %v802_v36 = vmul.f32 %v749_v24, %v562_v28 }
 0x102   : > { %1219 = vst [vmem:[%s1530_s22 + $0x10] sm:$0xff] %v1151_v62   ;;  %1227 = vst [vmem:[%s1530_s22 + $0x50] sm:$0xff] %v1191_v14   ;;  %v501_v61 = vadd.f32 %v1284_v33, %v1515_v15  ;;  %v565_v13 = vadd.f32 %v1300_v34, %v1515_v15  ;;  %v784_v45 = vmul.f32 %v1496_v2, %v490_v31 }
 0x103   : > { %v492_v37 = vpop.f32.mrf.mxu0  ;;  %v556_v38 = vpop.f32.mrf.mxu1  ;;  %v800_v46 = vmul.f32 %v739_v51, %v554_v32 }
 0x104   : > { %v787_v41 = vmul.f32 %v1498_v3, %v501_v61  ;;  %v803_v42 = vmul.f32 %v754_v23, %v565_v13  ;;  %v493_v43 = vadd.f32 %v1515_v15, %v492_v37  ;;  %v557_v44 = vadd.f32 %v1515_v15, %v556_v38 }
 0x105   : > { %v1287_v47 = vpop.f32.mrf.mxu0  ;;  %v1303_v48 = vpop.f32.mrf.mxu1 }
 0x106   : > { %v1166_v4 = vpack.c.bf16 %v787_v41, %v786_v35  ;;  %v1206_v49 = vpack.c.bf16 %v803_v42, %v802_v36  ;;  %v785_v52 = vmul.f32 %v1494_v1, %v493_v43  ;;  %v801_v53 = vmul.f32 %v1534_v50, %v557_v44 }
 0x107   : > { %v514_v3 = vadd.f32 %v1287_v47, %v1515_v15  ;;  %v578_v54 = vadd.f32 %v1303_v48, %v1515_v15  ;;  %v505_v55 = vpop.f32.mrf.mxu0  ;;  %v569_v56 = vpop.f32.mrf.mxu1 }
 0x108   : > { %1222 = vst [vmem:[%s1530_s22 + $0x28] sm:$0xff] %v1166_v4   ;;  %1230 = vst [vmem:[%s1530_s22 + $0x68] sm:$0xff] %v1206_v49   ;;  %v1161_v2 = vpack.c.bf16 %v785_v52, %v784_v45  ;;  %v1201_v51 = vpack.c.bf16 %v801_v53, %v800_v46  ;;  %v506_v57 = vadd.f32 %v1515_v15, %v505_v55 }
 0x109   : > { %v570_v58 = vadd.f32 %v1515_v15, %v569_v56  ;;  %v1288_v59 = vpop.f32.mrf.mxu0  ;;  %v1304_v1 = vpop.f32.mrf.mxu1  ;;  %v790_v11 = vmul.f32 %v1508_v8, %v514_v3  ;;  %v806_v12 = vmul.f32 %v769_v9, %v578_v54 }
 0x10a   : > { %1221 = vst [vmem:[%s1530_s22 + $0x20] sm:$0xff] %v1161_v2   ;;  %1229 = vst [vmem:[%s1530_s22 + $0x60] sm:$0xff] %v1201_v51   ;;  %v517_v50 = vadd.f32 %v1288_v59, %v1515_v15  ;;  %v581_v10 = vadd.f32 %v1304_v1, %v1515_v15  ;;  %v788_v22 = vmul.f32 %v1504_v6, %v506_v57 }
 0x10b   : > { %v508_v16 = vpop.f32.mrf.mxu0  ;;  %v572_v17 = vpop.f32.mrf.mxu1  ;;  %v804_v23 = vmul.f32 %v759_v40, %v570_v58 }
 0x10c   : > { %v791_v18 = vmul.f32 %v1506_v7, %v517_v50  ;;  %v807_v19 = vmul.f32 %v774_v60, %v581_v10  ;;  %v509_v20 = vadd.f32 %v1515_v15, %v508_v16  ;;  %v573_v21 = vadd.f32 %v1515_v15, %v572_v17 }
 0x10e   : > { %v1176_v24 = vpack.c.bf16 %v791_v18, %v790_v11  ;;  %v1216_v0 = vpack.c.bf16 %v807_v19, %v806_v12  ;;  %v789_v25 = vmul.f32 %v1502_v5, %v509_v20  ;;  %v805_v8 = vmul.f32 %v764_v39, %v573_v21 }
 0x110   : > { %1224 = vst [vmem:[%s1530_s22 + $0x38] sm:$0xff] %v1176_v24   ;;  %1232 = vst [vmem:[%s1530_s22 + $0x78] sm:$0xff] %v1216_v0   ;;  %v1171_v63 = vpack.c.bf16 %v789_v25, %v788_v22  ;;  %v1211_v26 = vpack.c.bf16 %v805_v8, %v804_v23 }
 0x112   : > { %1223 = vst [vmem:[%s1530_s22 + $0x30] sm:$0xff] %v1171_v63   ;;  %1231 = vst [vmem:[%s1530_s22 + $0x70] sm:$0xff] %v1211_v26  }
 0x113 PF: > { %s14_s15 = sadd.s32 1, %s1362_s15  }
 0x114   : > { %p11_p4 = scmp.ge.s32.totalorder %s14_s15, 4  }
 0x116   :  { %13 = sbr.rel (!%p11_p4) target bundleno = 1 (0x1), region = 69 }

// kernel: hgcn_forward.4
= control target key start
LH: loop header
LB: loop body
LE: loop exit
PB: predicated region body
PF: predicated region fallthrough
CT: control target
= control target key end

     0   :  { %s2882_s18 = smov 0   ;;  %s2884_s19 = smov 0   ;;  %s3378_s0 = inlined_call_operand.vmem [shape: bf16[512,512], index: 0, kind: input, shape index: {}]   ;;  %s3379_s1 = inlined_call_operand.vmem [shape: bf16[512,128], index: 1, kind: input, shape index: {}]   ;;  %s3380_s2 = inlined_call_operand.vmem [shape: bf16[128,128], index: 2, kind: input, shape index: {}]   ;;  %s3381_s3 = inlined_call_operand.vmem [shape: f32[1,128], index: 3, kind: input, shape index: {}]   ;;  %s3382_s4 = inlined_call_operand.vmem [shape: f32[512,1], index: 4, kind: input, shape index: {}]   ;;  %s3383_s5 = inlined_call_operand.vmem [shape: bf16[512,128], index: 5, kind: output, shape index: {}]  }
   0x1   :  { %s2886_s20 = smov 0   ;;  %s2888_s21 = smov 0  }
   0x2   :  { %s2890_s22 = smov 0   ;;  %s2892_s23 = smov 0  }
   0x3   :  { %s2894_s24 = smov 0  }
   0x4 LB: > { %s24_s25 = sadd.s32 1, %s2840_s22  ;;  %s27_s26 = sadd.s32 1, %s2844_s23  ;;  %s2848_s24 = sphi %s2894_s24, %s15_s24   ;;  %s2844_s23 = sphi %s2892_s23, %s3391_s23   ;;  %s2840_s22 = sphi %s2890_s22, %s3390_s22   ;;  %s2836_s21 = sphi %s2888_s21, %s3389_s21   ;;  %s2832_s20 = sphi %s2886_s20, %s3388_s20   ;;  %s2828_s19 = sphi %s2884_s19, %s3387_s19   ;;  %s2824_s18 = sphi %s2882_s18, %s3386_s18  }
   0x5   : > { %p25_p0 = scmp.ge.s32.totalorder %s24_s25, 2  ;;  %p43_p1 = scmp.ne.s32.totalorder %s2828_s19, %s2824_s18 }
   0x6   : > { %p44_p2 = scmp.eq.s32.totalorder %s2848_s24, 0  ;;  %s36_s30 = sadd.s32 1, %s2828_s19 }
   0x7   : > { %s3393_s25 = smov (%p25_p0, %s24_s25), 0  ;;  %s3395_s26 = smov (!%p25_p0, %s27_s26), %s2844_s23 }
   0x8   : > { %p45_p3 = por %p44_p2, %p43_p1  ;;  %p29_p4 = scmp.ge.s32.totalorder %s3395_s26, 2 }
   0x9   : > { %s32_s27 = ssub.s32 %s2840_s22, %s3393_s25  ;;  %p2035_p6 = scmp.ge.s32.totalorder %s2848_s24, 4 }
   0xa   : > { %s3397_s26 = smov (%p29_p4, %s3395_s26), 0 }
   0xb   : > { %s31_s28 = ssub.s32 %s2844_s23, %s3397_s26  ;;  %193 = sbr.rel (%p2035_p6) target bundleno = 39 (0x27), region = 28 }
   0xc   : > { %s33_s29 = sor.u32 %s32_s27, %s31_s28 }
   0xd   : > { %p34_p5 = scmp.eq.s32.totalorder %s33_s29, 0 }
   0xf   : > { %s2933_s6 = scalar_select %p34_p5, %s2828_s19, %s36_s30  }
  0x10   : > { %196 = sbr.rel (!%p45_p3) target bundleno = 39 (0x27), region = 32  ;;  %s198_s7 = sand.u32 (%p45_p3), 1, %s2828_s19  }
  0x11   : > { %s2038_s8 = sshll.u32 (%p45_p3), %s2840_s22, 1  ;;  %s2036_s9 = sshll.u32 (%p45_p3), %s198_s7, 8 }
  0x12   : > { %s2190_s10 = sshll.u32 (%p45_p3), %s2844_s23, 7  ;;  %s2947_s16 = scalar_lea.vmem (%p45_p3), [#allocation3], %s2036_s9 }
  0x13   : > { %s204_s11 = sadd.s32 (%p45_p3), %s2190_s10, %s2038_s8 }
  0x14   : > { %s2040_s12 = sshll.u32 (%p45_p3), %s204_s11, 2 }
  0x15   : > { %s2942_s15 = scalar_lea.vmem %s3378_s0, %s2040_s12 }
  0x16   : > { %v297_v0 = vld [vmem:[%s2942_s15] sm:$0xff]  ;;  %v299_v1 = vld [vmem:[%s2942_s15 + $0x10] sm:$0xff] }
  0x17   : > { %v301_v2 = vld [vmem:[%s2942_s15 + $0x20] sm:$0xff]  ;;  %298 = vst [vmem:[%s2947_s16] sm:$0xff] %v297_v0  ;;  %300 = vst [vmem:[%s2947_s16 + $0x8] sm:$0xff] %v299_v1  ;;  %v303_v3 = vld [vmem:[%s2942_s15 + $0x30] sm:$0xff] }
  0x18   : > { %302 = vst [vmem:[%s2947_s16 + $0x10] sm:$0xff] %v301_v2  ;;  %v305_v4 = vld [vmem:[%s2942_s15 + $0x40] sm:$0xff]  ;;  %v307_v5 = vld [vmem:[%s2942_s15 + $0x50] sm:$0xff]  ;;  %304 = vst [vmem:[%s2947_s16 + $0x18] sm:$0xff] %v303_v3 }
  0x19   : > { %306 = vst [vmem:[%s2947_s16 + $0x20] sm:$0xff] %v305_v4  ;;  %308 = vst [vmem:[%s2947_s16 + $0x28] sm:$0xff] %v307_v5  ;;  %v309_v6 = vld [vmem:[%s2942_s15 + $0x60] sm:$0xff]  ;;  %v311_v7 = vld [vmem:[%s2942_s15 + $0x70] sm:$0xff] }
  0x1a   : > { %v313_v8 = vld [vmem:[%s2942_s15 + $0x80] sm:$0xff]  ;;  %310 = vst [vmem:[%s2947_s16 + $0x30] sm:$0xff] %v309_v6  ;;  %312 = vst [vmem:[%s2947_s16 + $0x38] sm:$0xff] %v311_v7  ;;  %v315_v9 = vld [vmem:[%s2942_s15 + $0x90] sm:$0xff] }
  0x1b   : > { %314 = vst [vmem:[%s2947_s16 + $0x40] sm:$0xff] %v313_v8  ;;  %v317_v10 = vld [vmem:[%s2942_s15 + $0xa0] sm:$0xff]  ;;  %v319_v11 = vld [vmem:[%s2942_s15 + $0xb0] sm:$0xff]  ;;  %316 = vst [vmem:[%s2947_s16 + $0x48] sm:$0xff] %v315_v9 }
  0x1c   : > { %318 = vst [vmem:[%s2947_s16 + $0x50] sm:$0xff] %v317_v10  ;;  %320 = vst [vmem:[%s2947_s16 + $0x58] sm:$0xff] %v319_v11  ;;  %v321_v12 = vld [vmem:[%s2942_s15 + $0xc0] sm:$0xff]  ;;  %v323_v13 = vld [vmem:[%s2942_s15 + $0xd0] sm:$0xff] }
  0x1d   : > { %v325_v14 = vld [vmem:[%s2942_s15 + $0xe0] sm:$0xff]  ;;  %322 = vst [vmem:[%s2947_s16 + $0x60] sm:$0xff] %v321_v12  ;;  %324 = vst [vmem:[%s2947_s16 + $0x68] sm:$0xff] %v323_v13  ;;  %v327_v15 = vld [vmem:[%s2942_s15 + $0xf0] sm:$0xff] }
  0x1e   : > { %326 = vst [vmem:[%s2947_s16 + $0x70] sm:$0xff] %v325_v14  ;;  %v329_v16 = vld [vmem:[%s2942_s15 + $0x100] sm:$0xff]  ;;  %v331_v17 = vld [vmem:[%s2942_s15 + $0x110] sm:$0xff]  ;;  %328 = vst [vmem:[%s2947_s16 + $0x78] sm:$0xff] %v327_v15 }
  0x1f   : > { %330 = vst [vmem:[%s2947_s16 + $0x80] sm:$0xff] %v329_v16  ;;  %332 = vst [vmem:[%s2947_s16 + $0x88] sm:$0xff] %v331_v17  ;;  %v333_v18 = vld [vmem:[%s2942_s15 + $0x120] sm:$0xff]  ;;  %v335_v19 = vld [vmem:[%s2942_s15 + $0x130] sm:$0xff] }
  0x20   : > { %v337_v20 = vld [vmem:[%s2942_s15 + $0x140] sm:$0xff]  ;;  %334 = vst [vmem:[%s2947_s16 + $0x90] sm:$0xff] %v333_v18  ;;  %336 = vst [vmem:[%s2947_s16 + $0x98] sm:$0xff] %v335_v19  ;;  %v339_v21 = vld [vmem:[%s2942_s15 + $0x150] sm:$0xff] }
  0x21   : > { %338 = vst [vmem:[%s2947_s16 + $0xa0] sm:$0xff] %v337_v20  ;;  %v341_v22 = vld [vmem:[%s2942_s15 + $0x160] sm:$0xff]  ;;  %v343_v23 = vld [vmem:[%s2942_s15 + $0x170] sm:$0xff]  ;;  %340 = vst [vmem:[%s2947_s16 + $0xa8] sm:$0xff] %v339_v21 }
  0x22   : > { %342 = vst [vmem:[%s2947_s16 + $0xb0] sm:$0xff] %v341_v22  ;;  %344 = vst [vmem:[%s2947_s16 + $0xb8] sm:$0xff] %v343_v23  ;;  %v345_v24 = vld [vmem:[%s2942_s15 + $0x180] sm:$0xff]  ;;  %v347_v25 = vld [vmem:[%s2942_s15 + $0x190] sm:$0xff] }
  0x23   : > { %v349_v26 = vld [vmem:[%s2942_s15 + $0x1a0] sm:$0xff]  ;;  %346 = vst [vmem:[%s2947_s16 + $0xc0] sm:$0xff] %v345_v24  ;;  %348 = vst [vmem:[%s2947_s16 + $0xc8] sm:$0xff] %v347_v25  ;;  %v351_v27 = vld [vmem:[%s2942_s15 + $0x1b0] sm:$0xff] }
  0x24   : > { %350 = vst [vmem:[%s2947_s16 + $0xd0] sm:$0xff] %v349_v26  ;;  %v353_v28 = vld [vmem:[%s2942_s15 + $0x1c0] sm:$0xff]  ;;  %v355_v29 = vld [vmem:[%s2942_s15 + $0x1d0] sm:$0xff]  ;;  %352 = vst [vmem:[%s2947_s16 + $0xd8] sm:$0xff] %v351_v27 }
  0x25   : > { %354 = vst [vmem:[%s2947_s16 + $0xe0] sm:$0xff] %v353_v28  ;;  %356 = vst [vmem:[%s2947_s16 + $0xe8] sm:$0xff] %v355_v29  ;;  %v357_v30 = vld [vmem:[%s2942_s15 + $0x1e0] sm:$0xff]  ;;  %v359_v31 = vld [vmem:[%s2942_s15 + $0x1f0] sm:$0xff] }
  0x26   : > { %358 = vst [vmem:[%s2947_s16 + $0xf0] sm:$0xff] %v357_v30  ;;  %360 = vst [vmem:[%s2947_s16 + $0xf8] sm:$0xff] %v359_v31 }
  0x27 PF: > { %p2041_p7 = scmp.ge.s32.totalorder %s2848_s24, 1  ;;  %p374_p8 = scmp.lt.s32.totalorder %s2848_s24, 5 }
  0x29   : > { %p375_p9 = pnand %p2041_p7, %p374_p8 }
  0x2a   : > { %s381_s17 = sand.u32 (!%p375_p9), 1, %s2824_s18   ;;  %s2043_s27 = sshll.u32 (!%p375_p9), %s2836_s21, 5 }
  0x2b   : > { %378 = sbr.rel (%p375_p9) target bundleno = 800 (0x320), region = 74  ;;  %s2042_s28 = sshll.u32 (!%p375_p9), %s381_s17, 8 }
  0x2c   : > { %p416_p10 = scmp.lt.s32.totalorder (!%p375_p9), %s2043_s27, 63  ;;  %s3024_s13 = scalar_lea.vmem (!%p375_p9), [#allocation3], %s2042_s28 }
  0x2d   : > { %p2047_p11 = scmp.ne.s32.totalorder (!%p375_p9), %s2832_s20, 0 }
  0x30   : > { %s3399_s27 = smov (!%p416_p10, %s2043_s27), 63  ;;  %431 = sbr.rel (%p2047_p11) target bundleno = 70 (0x46), region = 82 }
  0x31   : > { %s2044_s29 = sshll.u32 %s3399_s27, 3  ;;  %s2046_s30 = sshll.u32 %s3399_s27, 2 }
  0x32   : > { %s3017_s9 = scalar_lea.vmem %s3382_s4, %s2044_s29  ;;  %s3022_s12 = scalar_lea.vmem %s3383_s5, %s2046_s30 }
  0x35   : > { %v2850_v32 = vmov 0.0  }
  0x36   : > { %432 = vst [vmem:[#allocation2 + $0xb0] sm:$0xff] %v2850_v32  ;;  %433 = vst [vmem:[#allocation2] sm:$0xff] %v2850_v32 }
  0x37   : > { %434 = vst [vmem:[#allocation2 + $0xd8] sm:$0xff] %v2850_v32  ;;  %435 = vst [vmem:[#allocation2 + $0x18] sm:$0xff] %v2850_v32 }
  0x38   : > { %436 = vst [vmem:[#allocation2 + $0x50] sm:$0xff] %v2850_v32  ;;  %437 = vst [vmem:[#allocation2 + $0x68] sm:$0xff] %v2850_v32 }
  0x39   : > { %438 = vst [vmem:[#allocation2 + $0x30] sm:$0xff] %v2850_v32  ;;  %439 = vst [vmem:[#allocation2 + $0x48] sm:$0xff] %v2850_v32 }
  0x3a   : > { %440 = vst [vmem:[#allocation2 + $0x80] sm:$0xff] %v2850_v32  ;;  %441 = vst [vmem:[#allocation2 + $0x88] sm:$0xff] %v2850_v32 }
  0x3b   : > { %442 = vst [vmem:[#allocation2 + $0xe8] sm:$0xff] %v2850_v32  ;;  %443 = vst [vmem:[#allocation2 + $0xb8] sm:$0xff] %v2850_v32 }
  0x3c   : > { %444 = vst [vmem:[#allocation2 + $0x60] sm:$0xff] %v2850_v32  ;;  %445 = vst [vmem:[#allocation2 + $0xf0] sm:$0xff] %v2850_v32 }
  0x3d   : > { %446 = vst [vmem:[#allocation2 + $0x8] sm:$0xff] %v2850_v32  ;;  %447 = vst [vmem:[#allocation2 + $0x78] sm:$0xff] %v2850_v32 }
  0x3e   : > { %448 = vst [vmem:[#allocation2 + $0x38] sm:$0xff] %v2850_v32  ;;  %449 = vst [vmem:[#allocation2 + $0x58] sm:$0xff] %v2850_v32 }
  0x3f   : > { %450 = vst [vmem:[#allocation2 + $0x40] sm:$0xff] %v2850_v32  ;;  %451 = vst [vmem:[#allocation2 + $0xc8] sm:$0xff] %v2850_v32 }
  0x40   : > { %452 = vst [vmem:[#allocation2 + $0xe0] sm:$0xff] %v2850_v32  ;;  %453 = vst [vmem:[#allocation2 + $0x90] sm:$0xff] %v2850_v32 }
  0x41   : > { %454 = vst [vmem:[#allocation2 + $0x70] sm:$0xff] %v2850_v32  ;;  %455 = vst [vmem:[#allocation2 + $0xc0] sm:$0xff] %v2850_v32 }
  0x42   : > { %456 = vst [vmem:[#allocation2 + $0xa8] sm:$0xff] %v2850_v32  ;;  %457 = vst [vmem:[#allocation2 + $0xd0] sm:$0xff] %v2850_v32 }
  0x43   : > { %458 = vst [vmem:[#allocation2 + $0x10] sm:$0xff] %v2850_v32  ;;  %459 = vst [vmem:[#allocation2 + $0x28] sm:$0xff] %v2850_v32 }
  0x44   : > { %460 = vst [vmem:[#allocation2 + $0xa0] sm:$0xff] %v2850_v32  ;;  %461 = vst [vmem:[#allocation2 + $0xf8] sm:$0xff] %v2850_v32 }
  0x45   : > { %462 = vst [vmem:[#allocation2 + $0x20] sm:$0xff] %v2850_v32  ;;  %463 = vst [vmem:[#allocation2 + $0x98] sm:$0xff] %v2850_v32 }
  0x46 PF: > { %s2048_s18 = sshll.u32 %s2832_s20, 8  ;;  %v2610_v33 = vld [vmem:[%s3024_s13 + $0x4] ss:$8 sps:$4 sm:$0xff]   ;;  %v2608_v51 = vld [vmem:[%s3024_s13] ss:$8 sps:$4 sm:$0xff]   ;;  %v465_v19 = vld [vmem:[#allocation2 + $0xb0] sm:$0xff] }
  0x47   : > { %s529_s21 = sshra.s32 %s2048_s18, 3  ;;  %v2613_v34 = vld [vmem:[%s3024_s13 + $0x84] ss:$8 sps:$4 sm:$0xff]   ;;  %853 = vmatprep.mubr.bf16.mxu0 %v2610_v33  ;;  %v2611_v52 = vld [vmem:[%s3024_s13 + $0x80] ss:$8 sps:$4 sm:$0xff]   ;;  %v481_v21 = vld [vmem:[#allocation2 + $0x38] sm:$0xff] }
  0x48   : > { %s2049_s14 = sshll.u32 %s529_s21, 2  ;;  %917 = vmatprep.mubr.bf16.mxu1 %v2613_v34  ;;  %v2614_v53 = vld [vmem:[%s3024_s13 + $0x14] ss:$8 sps:$4 sm:$0xff]   ;;  %v2618_v55 = vld [vmem:[%s3024_s13 + $0x10] ss:$8 sps:$4 sm:$0xff]   ;;  %v466_v29 = vld [vmem:[#allocation2] sm:$0xff] }
  0x49   : > { %s3033_s17 = scalar_lea.vmem %s3379_s1, %s2049_s14  ;;  %v2616_v54 = vld [vmem:[%s3024_s13 + $0x94] ss:$8 sps:$4 sm:$0xff]   ;;  %v2619_v56 = vld [vmem:[%s3024_s13 + $0x90] ss:$8 sps:$4 sm:$0xff]   ;;  %v2620_v57 = vld [vmem:[%s3024_s13 + $0x24] ss:$8 sps:$4 sm:$0xff]  }
  0x4a   : > { %v2592_v35 = vld [vmem:[%s3033_s17 + $0x78] sm:$0xff]   ;;  %v2594_v37 = vld [vmem:[%s3033_s17 + $0x70] sm:$0xff]   ;;  %v2596_v39 = vld [vmem:[%s3033_s17 + $0x68] sm:$0xff]   ;;  %p2098_p12 = scmp.ne.s32.totalorder %s2832_s20, 1 }
  0x4b   : > { %v2593_v36 = vld [vmem:[%s3033_s17 + $0x38] sm:$0xff]   ;;  %2318 = vmatprep.subr.bf16.mxu0 %v2592_v35  ;;  %2502 = vmatprep.subr.bf16.mxu1 %v2592_v35  ;;  %v2595_v38 = vld [vmem:[%s3033_s17 + $0x30] sm:$0xff]   ;;  %v2597_v40 = vld [vmem:[%s3033_s17 + $0x28] sm:$0xff]  }
  0x4c   : > { %2319 = vmatpush3.bf16.msra.mxu0 %v2593_v36  ;;  %2510 = vmatpush3.bf16.msra.mxu1 %v2593_v36  ;;  %v2598_v41 = vld [vmem:[%s3033_s17 + $0x60] sm:$0xff]   ;;  %v2600_v43 = vld [vmem:[%s3033_s17 + $0x58] sm:$0xff]   ;;  %v2602_v45 = vld [vmem:[%s3033_s17 + $0x50] sm:$0xff]  }
  0x4d   : > { %2320 = vmatprep.subr.bf16.mxu0 %v2594_v37  ;;  %2503 = vmatprep.subr.bf16.mxu1 %v2594_v37  ;;  %v2599_v42 = vld [vmem:[%s3033_s17 + $0x20] sm:$0xff]   ;;  %v2601_v44 = vld [vmem:[%s3033_s17 + $0x18] sm:$0xff]   ;;  %v2603_v46 = vld [vmem:[%s3033_s17 + $0x10] sm:$0xff]  }
  0x4e   : > { %v2604_v47 = vld [vmem:[%s3033_s17 + $0x48] sm:$0xff]   ;;  %v2606_v49 = vld [vmem:[%s3033_s17 + $0x40] sm:$0xff]   ;;  %v2626_v61 = vld [vmem:[%s3024_s13 + $0x34] ss:$8 sps:$4 sm:$0xff]  }
  0x4f   : > { %v2605_v48 = vld [vmem:[%s3033_s17 + $0x8] sm:$0xff]   ;;  %v2607_v50 = vld [vmem:[%s3033_s17] sm:$0xff]   ;;  %v2628_v62 = vld [vmem:[%s3024_s13 + $0xb4] ss:$8 sps:$4 sm:$0xff]  }
  0x50   : > { %2321 = vmatpush3.bf16.msra.mxu0 %v2595_v38  ;;  %2511 = vmatpush3.bf16.msra.mxu1 %v2595_v38  ;;  %v2622_v58 = vld [vmem:[%s3024_s13 + $0xa4] ss:$8 sps:$4 sm:$0xff]   ;;  %v2624_v59 = vld [vmem:[%s3024_s13 + $0x20] ss:$8 sps:$4 sm:$0xff]   ;;  %v2630_v63 = vld [vmem:[%s3024_s13 + $0x30] ss:$8 sps:$4 sm:$0xff]  }
  0x51   : > { %2322 = vmatprep.subr.bf16.mxu0 %v2596_v39  ;;  %2504 = vmatprep.subr.bf16.mxu1 %v2596_v39  ;;  %v2625_v60 = vld [vmem:[%s3024_s13 + $0xa0] ss:$8 sps:$4 sm:$0xff]   ;;  %v2631_v0 = vld [vmem:[%s3024_s13 + $0xb0] ss:$8 sps:$4 sm:$0xff]   ;;  %v2632_v1 = vld [vmem:[%s3024_s13 + $0x44] ss:$8 sps:$4 sm:$0xff]  }
  0x52   : > { %v2634_v2 = vld [vmem:[%s3024_s13 + $0xc4] ss:$8 sps:$4 sm:$0xff]   ;;  %v2636_v3 = vld [vmem:[%s3024_s13 + $0x40] ss:$8 sps:$4 sm:$0xff]   ;;  %v2638_v5 = vld [vmem:[%s3024_s13 + $0x54] ss:$8 sps:$4 sm:$0xff]  }
  0x53   : > { %v2637_v4 = vld [vmem:[%s3024_s13 + $0xc0] ss:$8 sps:$4 sm:$0xff]   ;;  %v2640_v6 = vld [vmem:[%s3024_s13 + $0xd4] ss:$8 sps:$4 sm:$0xff]   ;;  %v2642_v7 = vld [vmem:[%s3024_s13 + $0x50] ss:$8 sps:$4 sm:$0xff]  }
  0x54   : > { %2323 = vmatpush3.bf16.msra.mxu0 %v2597_v40  ;;  %2512 = vmatpush3.bf16.msra.mxu1 %v2597_v40  ;;  %v2643_v8 = vld [vmem:[%s3024_s13 + $0xd0] ss:$8 sps:$4 sm:$0xff]   ;;  %v2644_v9 = vld [vmem:[%s3024_s13 + $0x64] ss:$8 sps:$4 sm:$0xff]   ;;  %v2648_v11 = vld [vmem:[%s3024_s13 + $0x60] ss:$8 sps:$4 sm:$0xff]  }
  0x55   : > { %2324 = vmatprep.subr.bf16.mxu0 %v2598_v41  ;;  %2505 = vmatprep.subr.bf16.mxu1 %v2598_v41  ;;  %v2646_v10 = vld [vmem:[%s3024_s13 + $0xe4] ss:$8 sps:$4 sm:$0xff]   ;;  %v2649_v12 = vld [vmem:[%s3024_s13 + $0xe0] ss:$8 sps:$4 sm:$0xff]   ;;  %v2650_v13 = vld [vmem:[%s3024_s13 + $0x74] ss:$8 sps:$4 sm:$0xff]  }
  0x56   : > { %v2652_v14 = vld [vmem:[%s3024_s13 + $0xf4] ss:$8 sps:$4 sm:$0xff]   ;;  %v2654_v15 = vld [vmem:[%s3024_s13 + $0x70] ss:$8 sps:$4 sm:$0xff]   ;;  %v483_v41 = vld [vmem:[#allocation2 + $0x40] sm:$0xff] }
  0x57   : > { %v2655_v16 = vld [vmem:[%s3024_s13 + $0xf0] ss:$8 sps:$4 sm:$0xff]  }
  0x58   : > { %2325 = vmatpush3.bf16.msra.mxu0 %v2599_v42  ;;  %2513 = vmatpush3.bf16.msra.mxu1 %v2599_v42  ;;  %v482_v31 = vld [vmem:[#allocation2 + $0x58] sm:$0xff] }
  0x59   : > { %2326 = vmatprep.subr.bf16.mxu0 %v2600_v43  ;;  %2506 = vmatprep.subr.bf16.mxu1 %v2600_v43  ;;  %v467_v39 = vld [vmem:[#allocation2 + $0xd8] sm:$0xff] }
  0x5c   : > { %2327 = vmatpush3.bf16.msra.mxu0 %v2601_v44  ;;  %2514 = vmatpush3.bf16.msra.mxu1 %v2601_v44 }
  0x5d   : > { %2328 = vmatprep.subr.bf16.mxu0 %v2602_v45  ;;  %2507 = vmatprep.subr.bf16.mxu1 %v2602_v45 }
  0x60   : > { %2329 = vmatpush3.bf16.msra.mxu0 %v2603_v46  ;;  %2515 = vmatpush3.bf16.msra.mxu1 %v2603_v46 }
  0x61   : > { %2330 = vmatprep.subr.bf16.mxu0 %v2604_v47  ;;  %2508 = vmatprep.subr.bf16.mxu1 %v2604_v47 }
  0x64   : > { %2331 = vmatpush3.bf16.msra.mxu0 %v2605_v48  ;;  %2516 = vmatpush3.bf16.msra.mxu1 %v2605_v48 }
  0x65   : > { %2332 = vmatprep.subr.bf16.mxu0 %v2606_v49  ;;  %2509 = vmatprep.subr.bf16.mxu1 %v2606_v49  ;;  %v468_v49 = vld [vmem:[#allocation2 + $0x18] sm:$0xff] }
  0x68   : > { %2333 = vmatpush3.bf16.msra.mxu0 %v2607_v50  ;;  %2517 = vmatpush3.bf16.msra.mxu1 %v2607_v50 }
  0x6b   : > { %854 = vmatmul.mubr.bf16.vlgmr.msra.gmra.mxu0 %v2608_v51  ;;  %918 = vmatmul.mubr.bf16.vlgmr.msra.gmra.mxu1 %v2611_v52  ;;  %v484_v51 = vld [vmem:[#allocation2 + $0xc8] sm:$0xff] }
  0x6c   : > { %861 = vmatprep.mubr.bf16.mxu0 %v2614_v53  ;;  %925 = vmatprep.mubr.bf16.mxu1 %v2616_v54 }
  0x73   : > { %862 = vmatmul.mubr.bf16.gmra.mxu0 %v2618_v55  ;;  %926 = vmatmul.mubr.bf16.gmra.mxu1 %v2619_v56 }
  0x74   : > { %869 = vmatprep.mubr.bf16.mxu0 %v2620_v57  ;;  %933 = vmatprep.mubr.bf16.mxu1 %v2622_v58 }
  0x7b   : > { %870 = vmatmul.mubr.bf16.gmra.mxu0 %v2624_v59  ;;  %934 = vmatmul.mubr.bf16.gmra.mxu1 %v2625_v60  ;;  %v469_v59 = vld [vmem:[#allocation2 + $0x50] sm:$0xff] }
  0x7c   : > { %877 = vmatprep.mubr.bf16.mxu0 %v2626_v61  ;;  %941 = vmatprep.mubr.bf16.mxu1 %v2628_v62  ;;  %v485_v61 = vld [vmem:[#allocation2 + $0xe0] sm:$0xff] }
  0x83   : > { %878 = vmatmul.mubr.bf16.gmra.mxu0 %v2630_v63  ;;  %942 = vmatmul.mubr.bf16.gmra.mxu1 %v2631_v0 }
  0x84   : > { %885 = vmatprep.mubr.bf16.mxu0 %v2632_v1  ;;  %949 = vmatprep.mubr.bf16.mxu1 %v2634_v2 }
  0x8b   : > { %886 = vmatmul.mubr.bf16.gmra.mxu0 %v2636_v3  ;;  %950 = vmatmul.mubr.bf16.gmra.mxu1 %v2637_v4 }
  0x8c   : > { %893 = vmatprep.mubr.bf16.mxu0 %v2638_v5  ;;  %957 = vmatprep.mubr.bf16.mxu1 %v2640_v6  ;;  %v470_v5 = vld [vmem:[#allocation2 + $0x68] sm:$0xff] }
  0x93   : > { %894 = vmatmul.mubr.bf16.gmra.mxu0 %v2642_v7  ;;  %958 = vmatmul.mubr.bf16.gmra.mxu1 %v2643_v8  ;;  %v486_v7 = vld [vmem:[#allocation2 + $0x90] sm:$0xff] }
  0x94   : > { %901 = vmatprep.mubr.bf16.mxu0 %v2644_v9  ;;  %965 = vmatprep.mubr.bf16.mxu1 %v2646_v10 }
  0x9b   : > { %902 = vmatmul.mubr.bf16.gmra.mxu0 %v2648_v11  ;;  %966 = vmatmul.mubr.bf16.gmra.mxu1 %v2649_v12 }
  0x9c   : > { %909 = vmatprep.mubr.bf16.mxu0 %v2650_v13  ;;  %973 = vmatprep.mubr.bf16.mxu1 %v2652_v14 }
  0xa3   : > { %910 = vmatmul.mubr.bf16.gmra.mxu0 %v2654_v15  ;;  %974 = vmatmul.mubr.bf16.gmra.mxu1 %v2655_v16  ;;  %v471_v15 = vld [vmem:[#allocation2 + $0x30] sm:$0xff] }
 0x12b   : > { %v2334_v17 = vpop.f32.mrf.mxu0  ;;  %v2382_v18 = vpop.f32.mrf.mxu1 }
 0x12d   : > { %v2335_v20 = vpop.f32.mrf.mxu0  ;;  %v2383_v22 = vpop.f32.mrf.mxu1 }
 0x12e   : > { %v2336_v23 = vadd.f32 %v2335_v20, %v2334_v17  ;;  %v2384_v24 = vadd.f32 %v2383_v22, %v2382_v18  ;;  %v487_v17 = vld [vmem:[#allocation2 + $0x70] sm:$0xff] }
 0x12f   : > { %v2337_v25 = vpop.f32.mrf.mxu0  ;;  %v2385_v26 = vpop.f32.mrf.mxu1 }
 0x130   : > { %v982_v27 = vadd.f32 %v2336_v23, %v465_v19  ;;  %v998_v28 = vadd.f32 %v2384_v24, %v481_v21 }
 0x131   : > { %v2338_v30 = vpop.f32.mrf.mxu0  ;;  %v2386_v32 = vpop.f32.mrf.mxu1 }
 0x132   : > { %1014 = vst [vmem:[#allocation2 + $0xb0] sm:$0xff] %v982_v27  ;;  %1030 = vst [vmem:[#allocation2 + $0x38] sm:$0xff] %v998_v28  ;;  %v2339_v33 = vadd.f32 %v2338_v30, %v2337_v25  ;;  %v2387_v34 = vadd.f32 %v2386_v32, %v2385_v26  ;;  %v472_v25 = vld [vmem:[#allocation2 + $0x48] sm:$0xff]  ;;  %v488_v27 = vld [vmem:[#allocation2 + $0xc0] sm:$0xff] }
 0x133   : > { %v2340_v35 = vpop.f32.mrf.mxu0  ;;  %v2388_v36 = vpop.f32.mrf.mxu1 }
 0x134   : > { %v983_v37 = vadd.f32 %v2339_v33, %v466_v29  ;;  %v999_v38 = vadd.f32 %v2387_v34, %v482_v31 }
 0x135   : > { %v2341_v40 = vpop.f32.mrf.mxu0  ;;  %v2389_v42 = vpop.f32.mrf.mxu1 }
 0x136   : > { %1015 = vst [vmem:[#allocation2] sm:$0xff] %v983_v37  ;;  %1031 = vst [vmem:[#allocation2 + $0x58] sm:$0xff] %v999_v38  ;;  %v2342_v43 = vadd.f32 %v2341_v40, %v2340_v35  ;;  %v2390_v44 = vadd.f32 %v2389_v42, %v2388_v36  ;;  %v473_v35 = vld [vmem:[#allocation2 + $0x80] sm:$0xff]  ;;  %v489_v37 = vld [vmem:[#allocation2 + $0xa8] sm:$0xff] }
 0x137   : > { %v2343_v45 = vpop.f32.mrf.mxu0  ;;  %v2391_v46 = vpop.f32.mrf.mxu1 }
 0x138   : > { %v984_v47 = vadd.f32 %v2342_v43, %v467_v39  ;;  %v1000_v48 = vadd.f32 %v2390_v44, %v483_v41 }
 0x139   : > { %v2344_v50 = vpop.f32.mrf.mxu0  ;;  %v2392_v52 = vpop.f32.mrf.mxu1 }
 0x13a   : > { %1016 = vst [vmem:[#allocation2 + $0xd8] sm:$0xff] %v984_v47  ;;  %1032 = vst [vmem:[#allocation2 + $0x40] sm:$0xff] %v1000_v48  ;;  %v2345_v53 = vadd.f32 %v2344_v50, %v2343_v45  ;;  %v2393_v54 = vadd.f32 %v2392_v52, %v2391_v46  ;;  %v474_v45 = vld [vmem:[#allocation2 + $0x88] sm:$0xff]  ;;  %v490_v47 = vld [vmem:[#allocation2 + $0xd0] sm:$0xff] }
 0x13b   : > { %v2346_v55 = vpop.f32.mrf.mxu0  ;;  %v2394_v56 = vpop.f32.mrf.mxu1 }
 0x13c   : > { %v985_v57 = vadd.f32 %v2345_v53, %v468_v49  ;;  %v1001_v58 = vadd.f32 %v2393_v54, %v484_v51 }
 0x13d   : > { %v2347_v60 = vpop.f32.mrf.mxu0  ;;  %v2395_v62 = vpop.f32.mrf.mxu1 }
 0x13e   : > { %1017 = vst [vmem:[#allocation2 + $0x18] sm:$0xff] %v985_v57  ;;  %1033 = vst [vmem:[#allocation2 + $0xc8] sm:$0xff] %v1001_v58  ;;  %v2348_v63 = vadd.f32 %v2347_v60, %v2346_v55  ;;  %v2396_v0 = vadd.f32 %v2395_v62, %v2394_v56  ;;  %v475_v55 = vld [vmem:[#allocation2 + $0xe8] sm:$0xff]  ;;  %v491_v57 = vld [vmem:[#allocation2 + $0x10] sm:$0xff] }
 0x13f   : > { %v2349_v1 = vpop.f32.mrf.mxu0  ;;  %v2397_v2 = vpop.f32.mrf.mxu1 }
 0x140   : > { %v986_v3 = vadd.f32 %v2348_v63, %v469_v59  ;;  %v1002_v4 = vadd.f32 %v2396_v0, %v485_v61 }
 0x141   : > { %v2350_v6 = vpop.f32.mrf.mxu0  ;;  %v2398_v8 = vpop.f32.mrf.mxu1 }
 0x142   : > { %1018 = vst [vmem:[#allocation2 + $0x50] sm:$0xff] %v986_v3  ;;  %1034 = vst [vmem:[#allocation2 + $0xe0] sm:$0xff] %v1002_v4  ;;  %v2351_v9 = vadd.f32 %v2350_v6, %v2349_v1  ;;  %v2399_v10 = vadd.f32 %v2398_v8, %v2397_v2  ;;  %v476_v1 = vld [vmem:[#allocation2 + $0xb8] sm:$0xff]  ;;  %v492_v3 = vld [vmem:[#allocation2 + $0x28] sm:$0xff] }
 0x143   : > { %v2352_v11 = vpop.f32.mrf.mxu0  ;;  %v2400_v12 = vpop.f32.mrf.mxu1 }
 0x144   : > { %v987_v13 = vadd.f32 %v2351_v9, %v470_v5  ;;  %v1003_v14 = vadd.f32 %v2399_v10, %v486_v7 }
 0x145   : > { %v2353_v16 = vpop.f32.mrf.mxu0  ;;  %v2401_v18 = vpop.f32.mrf.mxu1 }
 0x146   : > { %1019 = vst [vmem:[#allocation2 + $0x68] sm:$0xff] %v987_v13  ;;  %1035 = vst [vmem:[#allocation2 + $0x90] sm:$0xff] %v1003_v14  ;;  %v2354_v19 = vadd.f32 %v2353_v16, %v2352_v11  ;;  %v2402_v20 = vadd.f32 %v2401_v18, %v2400_v12  ;;  %v477_v11 = vld [vmem:[#allocation2 + $0x60] sm:$0xff] }
 0x147   : > { %v2355_v21 = vpop.f32.mrf.mxu0  ;;  %v2403_v22 = vpop.f32.mrf.mxu1  ;;  %v493_v13 = vld [vmem:[#allocation2 + $0xa0] sm:$0xff] }
 0x148   : > { %v988_v23 = vadd.f32 %v2354_v19, %v471_v15  ;;  %v1004_v24 = vadd.f32 %v2402_v20, %v487_v17 }
 0x149   : > { %v2356_v26 = vpop.f32.mrf.mxu0  ;;  %v2404_v28 = vpop.f32.mrf.mxu1 }
 0x14a   : > { %1020 = vst [vmem:[#allocation2 + $0x30] sm:$0xff] %v988_v23  ;;  %1036 = vst [vmem:[#allocation2 + $0x70] sm:$0xff] %v1004_v24  ;;  %v2357_v29 = vadd.f32 %v2356_v26, %v2355_v21  ;;  %v2405_v30 = vadd.f32 %v2404_v28, %v2403_v22  ;;  %v478_v21 = vld [vmem:[#allocation2 + $0xf0] sm:$0xff]  ;;  %v494_v23 = vld [vmem:[#allocation2 + $0xf8] sm:$0xff] }
 0x14b   : > { %v2358_v31 = vpop.f32.mrf.mxu0  ;;  %v2406_v32 = vpop.f32.mrf.mxu1 }
 0x14c   : > { %v989_v33 = vadd.f32 %v2357_v29, %v472_v25  ;;  %v1005_v34 = vadd.f32 %v2405_v30, %v488_v27 }
 0x14d   : > { %v2359_v36 = vpop.f32.mrf.mxu0  ;;  %v2407_v38 = vpop.f32.mrf.mxu1 }
 0x14e   : > { %1021 = vst [vmem:[#allocation2 + $0x48] sm:$0xff] %v989_v33  ;;  %1037 = vst [vmem:[#allocation2 + $0xc0] sm:$0xff] %v1005_v34  ;;  %v2360_v39 = vadd.f32 %v2359_v36, %v2358_v31  ;;  %v2408_v40 = vadd.f32 %v2407_v38, %v2406_v32  ;;  %v479_v31 = vld [vmem:[#allocation2 + $0x8] sm:$0xff]  ;;  %v495_v33 = vld [vmem:[#allocation2 + $0x20] sm:$0xff] }
 0x14f   : > { %v2361_v41 = vpop.f32.mrf.mxu0  ;;  %v2409_v42 = vpop.f32.mrf.mxu1 }
 0x150   : > { %v990_v43 = vadd.f32 %v2360_v39, %v473_v35  ;;  %v1006_v44 = vadd.f32 %v2408_v40, %v489_v37 }
 0x151   : > { %v2362_v46 = vpop.f32.mrf.mxu0  ;;  %v2410_v48 = vpop.f32.mrf.mxu1 }
 0x152   : > { %1022 = vst [vmem:[#allocation2 + $0x80] sm:$0xff] %v990_v43  ;;  %1038 = vst [vmem:[#allocation2 + $0xa8] sm:$0xff] %v1006_v44  ;;  %v2363_v49 = vadd.f32 %v2362_v46, %v2361_v41  ;;  %v2411_v50 = vadd.f32 %v2410_v48, %v2409_v42  ;;  %v480_v41 = vld [vmem:[#allocation2 + $0x78] sm:$0xff] }
 0x153   : > { %v2364_v51 = vpop.f32.mrf.mxu0  ;;  %v2412_v52 = vpop.f32.mrf.mxu1  ;;  %v496_v43 = vld [vmem:[#allocation2 + $0x98] sm:$0xff] }
 0x154   : > { %v991_v53 = vadd.f32 %v2363_v49, %v474_v45  ;;  %v1007_v54 = vadd.f32 %v2411_v50, %v490_v47 }
 0x155   : > { %v2365_v56 = vpop.f32.mrf.mxu0  ;;  %v2413_v58 = vpop.f32.mrf.mxu1 }
 0x156   : > { %1023 = vst [vmem:[#allocation2 + $0x88] sm:$0xff] %v991_v53  ;;  %1039 = vst [vmem:[#allocation2 + $0xd0] sm:$0xff] %v1007_v54  ;;  %v2366_v59 = vadd.f32 %v2365_v56, %v2364_v51  ;;  %v2414_v60 = vadd.f32 %v2413_v58, %v2412_v52 }
 0x157   : > { %v2367_v61 = vpop.f32.mrf.mxu0  ;;  %v2415_v62 = vpop.f32.mrf.mxu1 }
 0x158   : > { %v992_v63 = vadd.f32 %v2366_v59, %v475_v55  ;;  %v1008_v0 = vadd.f32 %v2414_v60, %v491_v57 }
 0x159   : > { %v2368_v2 = vpop.f32.mrf.mxu0  ;;  %v2416_v4 = vpop.f32.mrf.mxu1 }
 0x15a   : > { %1024 = vst [vmem:[#allocation2 + $0xe8] sm:$0xff] %v992_v63  ;;  %1040 = vst [vmem:[#allocation2 + $0x10] sm:$0xff] %v1008_v0  ;;  %v2369_v5 = vadd.f32 %v2368_v2, %v2367_v61  ;;  %v2417_v6 = vadd.f32 %v2416_v4, %v2415_v62 }
 0x15b   : > { %v2370_v7 = vpop.f32.mrf.mxu0  ;;  %v2418_v8 = vpop.f32.mrf.mxu1 }
 0x15c   : > { %v993_v9 = vadd.f32 %v2369_v5, %v476_v1  ;;  %v1009_v10 = vadd.f32 %v2417_v6, %v492_v3 }
 0x15d   : > { %v2371_v12 = vpop.f32.mrf.mxu0  ;;  %v2419_v14 = vpop.f32.mrf.mxu1 }
 0x15e   : > { %1025 = vst [vmem:[#allocation2 + $0xb8] sm:$0xff] %v993_v9  ;;  %1041 = vst [vmem:[#allocation2 + $0x28] sm:$0xff] %v1009_v10  ;;  %v2372_v15 = vadd.f32 %v2371_v12, %v2370_v7  ;;  %v2420_v16 = vadd.f32 %v2419_v14, %v2418_v8 }
 0x15f   : > { %v2373_v17 = vpop.f32.mrf.mxu0  ;;  %v2421_v18 = vpop.f32.mrf.mxu1 }
 0x160   : > { %v994_v19 = vadd.f32 %v2372_v15, %v477_v11  ;;  %v1010_v20 = vadd.f32 %v2420_v16, %v493_v13 }
 0x161   : > { %v2374_v22 = vpop.f32.mrf.mxu0  ;;  %v2422_v24 = vpop.f32.mrf.mxu1 }
 0x162   : > { %1026 = vst [vmem:[#allocation2 + $0x60] sm:$0xff] %v994_v19  ;;  %1042 = vst [vmem:[#allocation2 + $0xa0] sm:$0xff] %v1010_v20  ;;  %v2375_v25 = vadd.f32 %v2374_v22, %v2373_v17  ;;  %v2423_v26 = vadd.f32 %v2422_v24, %v2421_v18 }
 0x163   : > { %v2376_v27 = vpop.f32.mrf.mxu0  ;;  %v2424_v28 = vpop.f32.mrf.mxu1 }
 0x164   : > { %v995_v29 = vadd.f32 %v2375_v25, %v478_v21  ;;  %v1011_v30 = vadd.f32 %v2423_v26, %v494_v23 }
 0x165   : > { %v2377_v32 = vpop.f32.mrf.mxu0  ;;  %v2425_v34 = vpop.f32.mrf.mxu1 }
 0x166   : > { %1027 = vst [vmem:[#allocation2 + $0xf0] sm:$0xff] %v995_v29  ;;  %1043 = vst [vmem:[#allocation2 + $0xf8] sm:$0xff] %v1011_v30  ;;  %v2378_v35 = vadd.f32 %v2377_v32, %v2376_v27  ;;  %v2426_v36 = vadd.f32 %v2425_v34, %v2424_v28 }
 0x167   : > { %v2379_v37 = vpop.f32.mrf.mxu0  ;;  %v2427_v38 = vpop.f32.mrf.mxu1 }
 0x168   : > { %v996_v39 = vadd.f32 %v2378_v35, %v479_v31  ;;  %v1012_v40 = vadd.f32 %v2426_v36, %v495_v33 }
 0x169   : > { %v2380_v42 = vpop.f32.mrf.mxu0  ;;  %v2428_v44 = vpop.f32.mrf.mxu1 }
 0x16a   : > { %1028 = vst [vmem:[#allocation2 + $0x8] sm:$0xff] %v996_v39  ;;  %1044 = vst [vmem:[#allocation2 + $0x20] sm:$0xff] %v1012_v40  ;;  %v2381_v45 = vadd.f32 %v2380_v42, %v2379_v37  ;;  %v2429_v46 = vadd.f32 %v2428_v44, %v2427_v38  ;;  %1049 = sbr.rel (%p2098_p12) target bundleno = 800 (0x320), region = 86 }
 0x16c   : > { %v997_v47 = vadd.f32 %v2381_v45, %v480_v41  ;;  %v1013_v48 = vadd.f32 %v2429_v46, %v496_v43 }
 0x16e   : > { %1029 = vst [vmem:[#allocation2 + $0x78] sm:$0xff] %v997_v47  ;;  %1045 = vst [vmem:[#allocation2 + $0x98] sm:$0xff] %v1013_v48 }
 0x16f   : > { %v1098_v49 = vld [vmem:[%s3017_s9 + $0x80] sm:$0xff]  ;;  %v2851_v51 = vmov 0   ;;  %v1099_v52 = vld [vmem:[%s3017_s9 + $0x88] sm:$0xff]  ;;  %v1085_v54 = vld [vmem:[%s3017_s9 + $0x18] sm:$0xff] }
 0x170   : > { %v1082_v50 = vld [vmem:[%s3017_s9] sm:$0xff]  ;;  %2657 = vset.pattern.permute.xlu1 %v2851_v51  ;;  %2656 = vset.pattern.permute.xlu0 %v2851_v51  ;;  %v1083_v53 = vld [vmem:[%s3017_s9 + $0x8] sm:$0xff]  ;;  %v1084_v55 = vld [vmem:[%s3017_s9 + $0x10] sm:$0xff] }
 0x171   : > { %1196 = vperm.xlu1 %2657, %v1098_v49   ;;  %1116 = vperm.xlu0 %2656, %v1082_v50   ;;  %v1101_v56 = vld [vmem:[%s3017_s9 + $0x98] sm:$0xff]  ;;  %v1100_v57 = vld [vmem:[%s3017_s9 + $0x90] sm:$0xff]  ;;  %v1087_v58 = vld [vmem:[%s3017_s9 + $0x28] sm:$0xff] }
 0x172   : > { %v2658_v59 = vld [vmem:[%s3380_s2 + $0x38] sm:$0xff]   ;;  %v1086_v60 = vld [vmem:[%s3017_s9 + $0x20] sm:$0xff]  ;;  %v1103_v61 = vld [vmem:[%s3017_s9 + $0xa8] sm:$0xff] }
 0x173   : > { %2454 = vmatprep.subr.bf16.mxu0 %v2658_v59  ;;  %2518 = vmatprep.subr.bf16.mxu1 %v2658_v59  ;;  %v1102_v62 = vld [vmem:[%s3017_s9 + $0xa0] sm:$0xff]  ;;  %v2659_v63 = vld [vmem:[%s3380_s2 + $0x30] sm:$0xff]   ;;  %v2660_v0 = vld [vmem:[%s3380_s2 + $0x28] sm:$0xff]  }
 0x174   : > { %2455 = vmatpush3.bf16.msra.mxu0 %v2658_v59  ;;  %2526 = vmatpush3.bf16.msra.mxu1 %v2658_v59  ;;  %v1089_v1 = vld [vmem:[%s3017_s9 + $0x38] sm:$0xff]  ;;  %v1088_v2 = vld [vmem:[%s3017_s9 + $0x30] sm:$0xff]  ;;  %v2661_v3 = vld [vmem:[%s3380_s2 + $0x20] sm:$0xff]  }
 0x175   : > { %1201 = vperm.xlu1 %2657, %v1099_v52   ;;  %1121 = vperm.xlu0 %2656, %v1083_v53   ;;  %v1105_v4 = vld [vmem:[%s3017_s9 + $0xb8] sm:$0xff]  ;;  %v1104_v5 = vld [vmem:[%s3017_s9 + $0xb0] sm:$0xff]  ;;  %v1091_v7 = vld [vmem:[%s3017_s9 + $0x48] sm:$0xff] }
 0x176   : > { %2456 = vmatprep.subr.bf16.mxu0 %v2659_v63  ;;  %2519 = vmatprep.subr.bf16.mxu1 %v2659_v63  ;;  %v2662_v6 = vld [vmem:[%s3380_s2 + $0x18] sm:$0xff]   ;;  %v1090_v8 = vld [vmem:[%s3017_s9 + $0x40] sm:$0xff]  ;;  %v2663_v9 = vld [vmem:[%s3380_s2 + $0x10] sm:$0xff]  }
 0x177   : > { %v1107_v10 = vld [vmem:[%s3017_s9 + $0xc8] sm:$0xff]  ;;  %v1106_v11 = vld [vmem:[%s3017_s9 + $0xc0] sm:$0xff]  ;;  %v1093_v13 = vld [vmem:[%s3017_s9 + $0x58] sm:$0xff] }
 0x178   : > { %2457 = vmatpush3.bf16.msra.mxu0 %v2659_v63  ;;  %2527 = vmatpush3.bf16.msra.mxu1 %v2659_v63  ;;  %v2664_v12 = vld [vmem:[%s3380_s2 + $0x8] sm:$0xff]   ;;  %v1092_v14 = vld [vmem:[%s3017_s9 + $0x50] sm:$0xff]  ;;  %v2665_v15 = vld [vmem:[%s3380_s2] sm:$0xff]  }
 0x179   : > { %1131 = vperm.xlu1 %2657, %v1085_v54   ;;  %1126 = vperm.xlu0 %2656, %v1084_v55   ;;  %v1109_v16 = vld [vmem:[%s3017_s9 + $0xd8] sm:$0xff]  ;;  %v1108_v17 = vld [vmem:[%s3017_s9 + $0xd0] sm:$0xff]  ;;  %v1095_v18 = vld [vmem:[%s3017_s9 + $0x68] sm:$0xff] }
 0x17a   : > { %2458 = vmatprep.subr.bf16.mxu0 %v2660_v0  ;;  %2520 = vmatprep.subr.bf16.mxu1 %v2660_v0  ;;  %v1094_v19 = vld [vmem:[%s3017_s9 + $0x60] sm:$0xff]  ;;  %v1111_v20 = vld [vmem:[%s3017_s9 + $0xe8] sm:$0xff]  ;;  %v1097_v22 = vld [vmem:[%s3017_s9 + $0x78] sm:$0xff] }
 0x17b   : > { %v1110_v21 = vld [vmem:[%s3017_s9 + $0xe0] sm:$0xff]  ;;  %v1096_v23 = vld [vmem:[%s3017_s9 + $0x70] sm:$0xff]  ;;  %v1113_v24 = vld [vmem:[%s3017_s9 + $0xf8] sm:$0xff] }
 0x17c   : > { %2459 = vmatpush3.bf16.msra.mxu0 %v2660_v0  ;;  %2528 = vmatpush3.bf16.msra.mxu1 %v2660_v0  ;;  %v1112_v25 = vld [vmem:[%s3017_s9 + $0xf0] sm:$0xff]  ;;  %v1066_v26 = vld [vmem:[#allocation2 + $0x38] sm:$0xff]  ;;  %v1051_v33 = vld [vmem:[#allocation2] sm:$0xff] }
 0x17d   : > { %1211 = vperm.xlu1 %2657, %v1101_v56   ;;  %1206 = vperm.xlu0 %2656, %v1100_v57   ;;  %v1050_v27 = vld [vmem:[#allocation2 + $0xb0] sm:$0xff]  ;;  %v1067_v32 = vld [vmem:[#allocation2 + $0x58] sm:$0xff]  ;;  %v1069_v52 = vld [vmem:[#allocation2 + $0xc8] sm:$0xff] }
 0x17e   : > { %2460 = vmatprep.subr.bf16.mxu0 %v2661_v3  ;;  %2521 = vmatprep.subr.bf16.mxu1 %v2661_v3  ;;  %v1053_v42 = vld [vmem:[#allocation2 + $0x18] sm:$0xff]  ;;  %v1068_v53 = vld [vmem:[#allocation2 + $0x40] sm:$0xff]  ;;  %v1054_v63 = vld [vmem:[#allocation2 + $0x50] sm:$0xff] }
 0x17f   : > { %v1052_v43 = vld [vmem:[#allocation2 + $0xd8] sm:$0xff] }
 0x180   : > { %2461 = vmatpush3.bf16.msra.mxu0 %v2661_v3  ;;  %2529 = vmatpush3.bf16.msra.mxu1 %v2661_v3 }
 0x181   : > { %1141 = vperm.xlu1 %2657, %v1087_v58   ;;  %1136 = vperm.xlu0 %2656, %v1086_v60  }
 0x182   : > { %2462 = vmatprep.subr.bf16.mxu0 %v2662_v6  ;;  %2522 = vmatprep.subr.bf16.mxu1 %v2662_v6 }
 0x184   : > { %2463 = vmatpush3.bf16.msra.mxu0 %v2662_v6  ;;  %2530 = vmatpush3.bf16.msra.mxu1 %v2662_v6 }
 0x185   : > { %1221 = vperm.xlu1 %2657, %v1103_v61   ;;  %1216 = vperm.xlu0 %2656, %v1102_v62   ;;  %v1055_v62 = vld [vmem:[#allocation2 + $0x68] sm:$0xff] }
 0x186   : > { %2464 = vmatprep.subr.bf16.mxu0 %v2663_v9  ;;  %2523 = vmatprep.subr.bf16.mxu1 %v2663_v9 }
 0x188   : > { %2465 = vmatpush3.bf16.msra.mxu0 %v2663_v9  ;;  %2531 = vmatpush3.bf16.msra.mxu1 %v2663_v9 }
 0x189   : > { %1151 = vperm.xlu1 %2657, %v1089_v1   ;;  %1146 = vperm.xlu0 %2656, %v1088_v2  }
 0x18a   : > { %2466 = vmatprep.subr.bf16.mxu0 %v2664_v12  ;;  %2524 = vmatprep.subr.bf16.mxu1 %v2664_v12 }
 0x18c   : > { %2467 = vmatpush3.bf16.msra.mxu0 %v2664_v12  ;;  %2532 = vmatpush3.bf16.msra.mxu1 %v2664_v12 }
 0x18d   : > { %1231 = vperm.xlu1 %2657, %v1105_v4   ;;  %1226 = vperm.xlu0 %2656, %v1104_v5  }
 0x18e   : > { %2468 = vmatprep.subr.bf16.mxu0 %v2665_v15  ;;  %2525 = vmatprep.subr.bf16.mxu1 %v2665_v15 }
 0x190   : > { %2469 = vmatpush3.bf16.msra.mxu0 %v2665_v15  ;;  %2533 = vmatpush3.bf16.msra.mxu1 %v2665_v15 }
 0x191   : > { %1161 = vperm.xlu1 %2657, %v1091_v7   ;;  %1156 = vperm.xlu0 %2656, %v1090_v8   ;;  %v1071_v8 = vld [vmem:[#allocation2 + $0x90] sm:$0xff] }
 0x195   : > { %1241 = vperm.xlu1 %2657, %v1107_v10   ;;  %1236 = vperm.xlu0 %2656, %v1106_v11   ;;  %v1070_v11 = vld [vmem:[#allocation2 + $0xe0] sm:$0xff] }
 0x199   : > { %1171 = vperm.xlu1 %2657, %v1093_v13   ;;  %1166 = vperm.xlu0 %2656, %v1092_v14  }
 0x19d   : > { %1251 = vperm.xlu1 %2657, %v1109_v16   ;;  %1246 = vperm.xlu0 %2656, %v1108_v17  }
 0x1a1   : > { %1181 = vperm.xlu1 %2657, %v1095_v18   ;;  %1176 = vperm.xlu0 %2656, %v1094_v19  }
 0x1a5   : > { %1261 = vperm.xlu1 %2657, %v1111_v20   ;;  %1256 = vperm.xlu0 %2656, %v1110_v21  }
 0x1a9   : > { %1191 = vperm.xlu1 %2657, %v1097_v22   ;;  %1186 = vperm.xlu0 %2656, %v1096_v23   ;;  %v1057_v22 = vld [vmem:[#allocation2 + $0x48] sm:$0xff] }
 0x1ad   : > { %1271 = vperm.xlu1 %2657, %v1113_v24   ;;  %1266 = vperm.xlu0 %2656, %v1112_v25   ;;  %v1056_v24 = vld [vmem:[#allocation2 + $0x30] sm:$0xff] }
 0x1ec   : > { %v3138_v28 = vpop.permute.xlu1 %1196  ;;  %v3140_v29 = vpop.permute.xlu0 %1116 }
 0x1ed   : > { %v1290_v30 = vmul.f32 %v3138_v28, %v1066_v26  ;;  %v1274_v31 = vmul.f32 %v3140_v29, %v1050_v27 }
 0x1ef   : > { %v1322_v34 = vsub.f32 0.0, %v1290_v30  ;;  %v1306_v35 = vsub.f32 0.0, %v1274_v31 }
 0x1f0   : > { %v3144_v36 = vpop.permute.xlu1 %1201  ;;  %v3146_v37 = vpop.permute.xlu0 %1121 }
 0x1f1   : > { %v1370_v38 = vmul.f32 1.442695, %v1322_v34  ;;  %v1338_v39 = vmul.f32 1.442695, %v1306_v35  ;;  %v1291_v40 = vmul.f32 %v3144_v36, %v1067_v32  ;;  %v1275_v41 = vmul.f32 %v3146_v37, %v1051_v33 }
 0x1f3   : > { %2666 = vpow2.f32 %v1370_v38  ;;  %v1323_v44 = vsub.f32 0.0, %v1291_v40  ;;  %v1307_v45 = vsub.f32 0.0, %v1275_v41  ;;  %v1073_v40 = vld [vmem:[#allocation2 + $0xc0] sm:$0xff] }
 0x1f4   : > { %2668 = vpow2.f32 %v1338_v39  ;;  %v3150_v46 = vpop.permute.xlu1 %1131  ;;  %v3152_v47 = vpop.permute.xlu0 %1126 }
 0x1f5   : > { %v1372_v48 = vmul.f32 1.442695, %v1323_v44  ;;  %v1340_v49 = vmul.f32 1.442695, %v1307_v45  ;;  %v1277_v50 = vmul.f32 %v3150_v46, %v1053_v42  ;;  %v1276_v51 = vmul.f32 %v3152_v47, %v1052_v43  ;;  %v1072_v42 = vld [vmem:[#allocation2 + $0x70] sm:$0xff] }
 0x1f7   : > { %2670 = vpow2.f32 %v1372_v48  ;;  %v1309_v54 = vsub.f32 0.0, %v1277_v50  ;;  %v1308_v55 = vsub.f32 0.0, %v1276_v51 }
 0x1f8   : > { %2672 = vpow2.f32 %v1340_v49  ;;  %v3156_v56 = vpop.permute.xlu1 %1211  ;;  %v3158_v57 = vpop.permute.xlu0 %1206  ;;  %v1466_v49 = vlaneseq }
 0x1f9   : > { %v1344_v58 = vmul.f32 1.442695, %v1309_v54  ;;  %v1342_v59 = vmul.f32 1.442695, %v1308_v55  ;;  %v1293_v60 = vmul.f32 %v3156_v56, %v1069_v52  ;;  %v1292_v61 = vmul.f32 %v3158_v57, %v1068_v53 }
 0x1fb   : > { %2674 = vpow2.f32 %v1344_v58  ;;  %v1325_v0 = vsub.f32 0.0, %v1293_v60  ;;  %v1324_v1 = vsub.f32 0.0, %v1292_v61  ;;  %v1058_v61 = vld [vmem:[#allocation2 + $0x80] sm:$0xff] }
 0x1fc   : > { %2676 = vpow2.f32 %v1342_v59  ;;  %v3162_v2 = vpop.permute.xlu1 %1141  ;;  %v3164_v3 = vpop.permute.xlu0 %1136  ;;  %v1059_v59 = vld [vmem:[#allocation2 + $0x88] sm:$0xff] }
 0x1fd   : > { %v1376_v4 = vmul.f32 1.442695, %v1325_v0  ;;  %v1374_v5 = vmul.f32 1.442695, %v1324_v1  ;;  %v1279_v6 = vmul.f32 %v3162_v2, %v1055_v62  ;;  %v1278_v7 = vmul.f32 %v3164_v3, %v1054_v63 }
 0x1ff   : > { %2678 = vpow2.f32 %v1376_v4  ;;  %v1311_v9 = vsub.f32 0.0, %v1279_v6  ;;  %v1310_v10 = vsub.f32 0.0, %v1278_v7  ;;  %v1467_v4 = vand.u32 127, %v1466_v49 }
 0x200   : > { %v2667_v12 = vpop.eup %2666  ;;  %2680 = vpow2.f32 %v1374_v5  ;;  %v3168_v13 = vpop.permute.xlu1 %1221 }
 0x201   : > { %v3170_v14 = vpop.permute.xlu0 %1216  ;;  %v2669_v15 = vpop.eup %2668  ;;  %v1418_v16 = vadd.f32 1.0, %v2667_v12  ;;  %v1348_v17 = vmul.f32 1.442695, %v1311_v9  ;;  %v1295_v18 = vmul.f32 %v3168_v13, %v1071_v8  ;;  %v1346_v20 = vmul.f32 1.442695, %v1310_v10  ;;  %v1075_v12 = vld [vmem:[#allocation2 + $0xd0] sm:$0xff] }
 0x202   : > { %v1402_v19 = vadd.f32 1.0, %v2669_v15  ;;  %v1294_v21 = vmul.f32 %v3170_v14, %v1070_v11  ;;  %v1074_v15 = vld [vmem:[#allocation2 + $0xa8] sm:$0xff]  ;;  %vm1468_vm0 = vcmp.lt.s32.totalorder %v1467_v4, 16 }
 0x203   : > { %2682 = vrcp.f32 %v1418_v16  ;;  %v1327_v23 = vsub.f32 0.0, %v1295_v18  ;;  %vm3205_vm1 = vmpackc.low %vm1468_vm0, %vm1468_vm0 }
 0x204   : > { %v2671_v25 = vpop.eup %2670  ;;  %2684 = vrcp.f32 %v1402_v19  ;;  %v1326_v26 = vsub.f32 0.0, %v1294_v21  ;;  %v3174_v27 = vpop.permute.xlu1 %1151 }
 0x205   : > { %v3176_v30 = vpop.permute.xlu0 %1146  ;;  %v2673_v31 = vpop.eup %2672  ;;  %v1419_v32 = vadd.f32 1.0, %v2671_v25  ;;  %2686 = vpow2.f32 %v1348_v17  ;;  %v1380_v33 = vmul.f32 1.442695, %v1327_v23  ;;  %v1281_v34 = vmul.f32 %v3174_v27, %v1057_v22 }
 0x206   : > { %v1403_v35 = vadd.f32 1.0, %v2673_v31  ;;  %2688 = vpow2.f32 %v1346_v20  ;;  %v1378_v38 = vmul.f32 1.442695, %v1326_v26  ;;  %v1280_v39 = vmul.f32 %v3176_v30, %v1056_v24  ;;  %v1061_v31 = vld [vmem:[#allocation2 + $0xb8] sm:$0xff] }
 0x207   : > { %2690 = vrcp.f32 %v1419_v32  ;;  %v1313_v41 = vsub.f32 0.0, %v1281_v34 }
 0x208   : > { %v2675_v43 = vpop.eup %2674  ;;  %2692 = vrcp.f32 %v1403_v35  ;;  %v1312_v44 = vsub.f32 0.0, %v1280_v39  ;;  %v3180_v45 = vpop.permute.xlu1 %1231 }
 0x209   : > { %v3182_v48 = vpop.permute.xlu0 %1226  ;;  %v2677_v50 = vpop.eup %2676  ;;  %v1405_v51 = vadd.f32 1.0, %v2675_v43  ;;  %2694 = vpow2.f32 %v1380_v33  ;;  %v1352_v52 = vmul.f32 1.442695, %v1313_v41  ;;  %v1297_v53 = vmul.f32 %v3180_v45, %v1073_v40 }
 0x20a   : > { %v1404_v54 = vadd.f32 1.0, %v2677_v50  ;;  %2696 = vpow2.f32 %v1378_v38  ;;  %v1350_v55 = vmul.f32 1.442695, %v1312_v44  ;;  %v1296_v58 = vmul.f32 %v3182_v48, %v1072_v42  ;;  %v1060_v38 = vld [vmem:[#allocation2 + $0xe8] sm:$0xff] }
 0x20b   : > { %2698 = vrcp.f32 %v1405_v51  ;;  %v1329_v60 = vsub.f32 0.0, %v1297_v53 }
 0x20c   : > { %v2679_v62 = vpop.eup %2678  ;;  %2700 = vrcp.f32 %v1404_v54  ;;  %v1328_v63 = vsub.f32 0.0, %v1296_v58  ;;  %v3186_v0 = vpop.permute.xlu1 %1161  ;;  %v1077_v58 = vld [vmem:[#allocation2 + $0x28] sm:$0xff] }
 0x20d   : > { %v3188_v1 = vpop.permute.xlu0 %1156  ;;  %v2681_v5 = vpop.eup %2680  ;;  %v1421_v6 = vadd.f32 1.0, %v2679_v62  ;;  %2702 = vpow2.f32 %v1352_v52  ;;  %v1384_v7 = vmul.f32 1.442695, %v1329_v60  ;;  %v1283_v8 = vmul.f32 %v3186_v0, %v1059_v59  ;;  %v1076_v59 = vld [vmem:[#allocation2 + $0x10] sm:$0xff] }
 0x20e   : > { %v1420_v9 = vadd.f32 1.0, %v2681_v5  ;;  %2704 = vpow2.f32 %v1350_v55  ;;  %v1382_v10 = vmul.f32 1.442695, %v1328_v63  ;;  %v1282_v11 = vmul.f32 %v3188_v1, %v1058_v61 }
 0x20f   : > { %2706 = vrcp.f32 %v1421_v6  ;;  %v1315_v16 = vsub.f32 0.0, %v1283_v8 }
 0x210   : > { %v2683_v17 = vpop.eup %2682  ;;  %2708 = vrcp.f32 %v1420_v9  ;;  %v1314_v18 = vsub.f32 0.0, %v1282_v11  ;;  %v3192_v19 = vpop.permute.xlu1 %1241 }
 0x211   : > { %v3194_v20 = vpop.permute.xlu0 %1236  ;;  %v2685_v21 = vpop.eup %2684  ;;  %2710 = vpow2.f32 %v1384_v7  ;;  %v1356_v22 = vmul.f32 1.442695, %v1315_v16  ;;  %v1299_v23 = vmul.f32 %v3192_v19, %v1075_v12 }
 0x212   : > { %v1298_v24 = vmul.f32 %v3194_v20, %v1074_v15  ;;  %v2687_v25 = vpop.eup %2686  ;;  %2712 = vpow2.f32 %v1382_v10  ;;  %v1354_v26 = vmul.f32 1.442695, %v1314_v18 }
 0x213   : > { %v2689_v32 = vpop.eup %2688  ;;  %v1407_v33 = vadd.f32 1.0, %v2687_v25  ;;  %2714 = vpow2.f32 %v1356_v22  ;;  %v1331_v34 = vsub.f32 0.0, %v1299_v23 }
 0x214   : > { %v1330_v35 = vsub.f32 0.0, %v1298_v24  ;;  %v2691_v39 = vpop.eup %2690  ;;  %v1406_v40 = vadd.f32 1.0, %v2689_v32  ;;  %2716 = vpow2.f32 %v1354_v26  ;;  %v3198_v41 = vpop.permute.xlu1 %1171  ;;  %v1062_v24 = vld [vmem:[#allocation2 + $0x60] sm:$0xff] }
 0x215   : > { %v3200_v42 = vpop.permute.xlu0 %1166  ;;  %v2693_v43 = vpop.eup %2692  ;;  %2718 = vrcp.f32 %v1407_v33  ;;  %v1388_v44 = vmul.f32 1.442695, %v1331_v34  ;;  %v1285_v50 = vmul.f32 %v3198_v41, %v1061_v31  ;;  %v2133_v55 = vpack.c.bf16 %v2691_v39, %v2683_v17  ;;  %v1063_v17 = vld [vmem:[#allocation2 + $0xf0] sm:$0xff] }
 0x216   : > { %v1386_v49 = vmul.f32 1.442695, %v1330_v35  ;;  %v2695_v52 = vpop.eup %2694  ;;  %2720 = vrcp.f32 %v1406_v40  ;;  %v1284_v53 = vmul.f32 %v3200_v42, %v1060_v38  ;;  %v2109_v54 = vpack.c.bf16 %v2693_v43, %v2685_v21 }
 0x217   : > { %v2697_v60 = vpop.eup %2696  ;;  %v1423_v61 = vadd.f32 1.0, %v2695_v52  ;;  %2722 = vpow2.f32 %v1388_v44  ;;  %v1317_v62 = vsub.f32 0.0, %v1285_v50  ;;  %2486 = vmatprep.mubr.msk.bf16.mxu1 %vm3205_vm1, %v2133_v55  ;;  %v1079_v44 = vld [vmem:[#allocation2 + $0xf8] sm:$0xff] }
 0x218   : > { %v2699_v63 = vpop.eup %2698  ;;  %v1422_v5 = vadd.f32 1.0, %v2697_v60  ;;  %2724 = vpow2.f32 %v1386_v49  ;;  %v1316_v4 = vsub.f32 0.0, %v1284_v53  ;;  %2470 = vmatprep.mubr.msk.bf16.mxu0 %vm3205_vm1, %v2109_v54  ;;  %v3214_v6 = vpop.permute.xlu1 %1251  ;;  %v1078_v53 = vld [vmem:[#allocation2 + $0xa0] sm:$0xff] }
 0x219   : > { %v3216_v7 = vpop.permute.xlu0 %1246  ;;  %v2701_v8 = vpop.eup %2700  ;;  %2726 = vrcp.f32 %v1423_v61  ;;  %v1360_v9 = vmul.f32 1.442695, %v1317_v62  ;;  %v1301_v10 = vmul.f32 %v3214_v6, %v1077_v58 }
 0x21a   : > { %v1300_v11 = vmul.f32 %v3216_v7, %v1076_v59  ;;  %v2703_v12 = vpop.eup %2702  ;;  %2728 = vrcp.f32 %v1422_v5  ;;  %v1358_v15 = vmul.f32 1.442695, %v1316_v4  ;;  %v2112_v16 = vpack.c.bf16 %v2699_v63, %v2701_v8 }
 0x21b   : > { %v2705_v18 = vpop.eup %2704  ;;  %v1409_v21 = vadd.f32 1.0, %v2703_v12  ;;  %2730 = vpow2.f32 %v1360_v9  ;;  %v1333_v22 = vsub.f32 0.0, %v1301_v10 }
 0x21c   : > { %v1332_v23 = vsub.f32 0.0, %v1300_v11  ;;  %v2707_v25 = vpop.eup %2706  ;;  %v1408_v26 = vadd.f32 1.0, %v2705_v18  ;;  %2732 = vpow2.f32 %v1358_v15  ;;  %2471 = vmatmul.mubr.msk.bf16.vlgmr.msra.gmra.mxu0 %vm3205_vm1, %v2112_v16  ;;  %v3222_v31 = vpop.permute.xlu1 %1181  ;;  %v1065_v11 = vld [vmem:[#allocation2 + $0x78] sm:$0xff]  ;;  %v1064_v16 = vld [vmem:[#allocation2 + $0x8] sm:$0xff] }
 0x21d   : > { %v3224_v32 = vpop.permute.xlu0 %1176  ;;  %v2709_v33 = vpop.eup %2708  ;;  %2734 = vrcp.f32 %v1409_v21  ;;  %v1392_v34 = vmul.f32 1.442695, %v1333_v22  ;;  %v1287_v38 = vmul.f32 %v3222_v31, %v1063_v17 }
 0x21e   : > { %v1390_v35 = vmul.f32 1.442695, %v1332_v23  ;;  %v2711_v39 = vpop.eup %2710  ;;  %2736 = vrcp.f32 %v1408_v26  ;;  %v1286_v40 = vmul.f32 %v3224_v32, %v1062_v24  ;;  %v2136_v43 = vpack.c.bf16 %v2707_v25, %v2709_v33 }
 0x21f   : > { %v2713_v49 = vpop.eup %2712  ;;  %v1425_v50 = vadd.f32 1.0, %v2711_v39  ;;  %2738 = vpow2.f32 %v1392_v34  ;;  %v1319_v52 = vsub.f32 0.0, %v1287_v38 }
 0x220   : > { %v2715_v54 = vpop.eup %2714  ;;  %v1424_v55 = vadd.f32 1.0, %v2713_v49  ;;  %2740 = vpow2.f32 %v1390_v35  ;;  %v1318_v58 = vsub.f32 0.0, %v1286_v40  ;;  %2487 = vmatmul.mubr.msk.bf16.vlgmr.msra.gmra.mxu1 %vm3205_vm1, %v2136_v43  ;;  %v3230_v59 = vpop.permute.xlu1 %1261  ;;  %v1081_v40 = vld [vmem:[#allocation2 + $0x98] sm:$0xff]  ;;  %v1080_v49 = vld [vmem:[#allocation2 + $0x20] sm:$0xff] }
 0x221   : > { %v3232_v60 = vpop.permute.xlu0 %1256  ;;  %v2717_v61 = vpop.eup %2716  ;;  %2742 = vrcp.f32 %v1425_v50  ;;  %v1411_v62 = vadd.f32 1.0, %v2715_v54  ;;  %v1364_v63 = vmul.f32 1.442695, %v1319_v52  ;;  %v1303_v5 = vmul.f32 %v3230_v59, %v1079_v44 }
 0x222   : > { %v2719_v4 = vpop.eup %2718  ;;  %2744 = vrcp.f32 %v1424_v55  ;;  %v1410_v8 = vadd.f32 1.0, %v2717_v61  ;;  %v1362_v9 = vmul.f32 1.442695, %v1318_v58  ;;  %v1302_v10 = vmul.f32 %v3232_v60, %v1078_v53 }
 0x223   : > { %v2721_v12 = vpop.eup %2720  ;;  %2746 = vrcp.f32 %v1411_v62  ;;  %v1335_v15 = vsub.f32 0.0, %v1303_v5 }
 0x224   : > { %v2723_v17 = vpop.eup %2722  ;;  %2748 = vrcp.f32 %v1410_v8  ;;  %v1334_v18 = vsub.f32 0.0, %v1302_v10  ;;  %v2115_v21 = vpack.c.bf16 %v2719_v4, %v2721_v12  ;;  %v3236_v22 = vpop.permute.xlu1 %1191 }
 0x225   : > { %v3238_v23 = vpop.permute.xlu0 %1186  ;;  %v2725_v24 = vpop.eup %2724  ;;  %v1427_v25 = vadd.f32 1.0, %v2723_v17  ;;  %2750 = vpow2.f32 %v1364_v63  ;;  %v1396_v26 = vmul.f32 1.442695, %v1335_v15  ;;  %v1289_v33 = vmul.f32 %v3236_v22, %v1065_v11 }
 0x226   : > { %v2727_v34 = vpop.eup %2726  ;;  %v1426_v35 = vadd.f32 1.0, %v2725_v24  ;;  %2752 = vpow2.f32 %v1362_v9  ;;  %v1394_v38 = vmul.f32 1.442695, %v1334_v18  ;;  %2474 = vmatprep.mubr.msk.bf16.mxu0 %vm3205_vm1, %v2115_v21  ;;  %v1288_v39 = vmul.f32 %v3238_v23, %v1064_v16 }
 0x227   : > { %v2729_v43 = vpop.eup %2728  ;;  %2754 = vrcp.f32 %v1427_v25  ;;  %v1321_v44 = vsub.f32 0.0, %v1289_v33 }
 0x228   : > { %v2731_v50 = vpop.eup %2730  ;;  %2756 = vrcp.f32 %v1426_v35  ;;  %v1320_v52 = vsub.f32 0.0, %v1288_v39  ;;  %v2139_v53 = vpack.c.bf16 %v2727_v34, %v2729_v43  ;;  %v3244_v54 = vpop.permute.xlu1 %1271 }
 0x229   : > { %v3246_v55 = vpop.permute.xlu0 %1266  ;;  %v2733_v58 = vpop.eup %2732  ;;  %v1413_v61 = vadd.f32 1.0, %v2731_v50  ;;  %2758 = vpow2.f32 %v1396_v26  ;;  %v1368_v62 = vmul.f32 1.442695, %v1321_v44  ;;  %v1305_v63 = vmul.f32 %v3244_v54, %v1081_v40 }
 0x22a   : > { %v2735_v5 = vpop.eup %2734  ;;  %v1412_v4 = vadd.f32 1.0, %v2733_v58  ;;  %2760 = vpow2.f32 %v1394_v38  ;;  %v1366_v8 = vmul.f32 1.442695, %v1320_v52  ;;  %2490 = vmatprep.mubr.msk.bf16.mxu1 %vm3205_vm1, %v2139_v53  ;;  %v1304_v9 = vmul.f32 %v3246_v55, %v1080_v49 }
 0x22b   : > { %v2737_v10 = vpop.eup %2736  ;;  %2762 = vrcp.f32 %v1413_v61  ;;  %v1337_v11 = vsub.f32 0.0, %v1305_v63 }
 0x22c   : > { %v2739_v12 = vpop.eup %2738  ;;  %2764 = vrcp.f32 %v1412_v4  ;;  %v1336_v15 = vsub.f32 0.0, %v1304_v9  ;;  %v2118_v16 = vpack.c.bf16 %v2735_v5, %v2737_v10 }
 0x22d   : > { %v2741_v17 = vpop.eup %2740  ;;  %v1429_v18 = vadd.f32 1.0, %v2739_v12  ;;  %2766 = vpow2.f32 %v1368_v62  ;;  %v1400_v21 = vmul.f32 1.442695, %v1337_v11 }
 0x22e   : > { %v2743_v24 = vpop.eup %2742  ;;  %v1428_v25 = vadd.f32 1.0, %v2741_v17  ;;  %2768 = vpow2.f32 %v1366_v8  ;;  %v1398_v26 = vmul.f32 1.442695, %v1336_v15  ;;  %2475 = vmatmul.mubr.msk.bf16.gmra.mxu0 %vm3205_vm1, %v2118_v16 }
 0x22f   : > { %v2745_v33 = vpop.eup %2744  ;;  %2770 = vrcp.f32 %v1429_v18 }
 0x230   : > { %v2747_v34 = vpop.eup %2746  ;;  %2772 = vrcp.f32 %v1428_v25  ;;  %v2142_v35 = vpack.c.bf16 %v2743_v24, %v2745_v33 }
 0x231   : > { %v2749_v38 = vpop.eup %2748  ;;  %2774 = vpow2.f32 %v1400_v21 }
 0x232   : > { %v2751_v39 = vpop.eup %2750  ;;  %2776 = vpow2.f32 %v1398_v26  ;;  %2491 = vmatmul.mubr.msk.bf16.gmra.mxu1 %vm3205_vm1, %v2142_v35  ;;  %v2121_v40 = vpack.c.bf16 %v2747_v34, %v2749_v38 }
 0x233   : > { %v2753_v43 = vpop.eup %2752  ;;  %v1415_v44 = vadd.f32 1.0, %v2751_v39 }
 0x234   : > { %v2755_v49 = vpop.eup %2754  ;;  %v1414_v50 = vadd.f32 1.0, %v2753_v43  ;;  %2478 = vmatprep.mubr.msk.bf16.mxu0 %vm3205_vm1, %v2121_v40 }
 0x235   : > { %v2757_v52 = vpop.eup %2756  ;;  %2778 = vrcp.f32 %v1415_v44 }
 0x236   : > { %v2759_v53 = vpop.eup %2758  ;;  %2780 = vrcp.f32 %v1414_v50  ;;  %v2145_v58 = vpack.c.bf16 %v2755_v49, %v2757_v52 }
 0x237   : > { %v2761_v61 = vpop.eup %2760  ;;  %v1431_v62 = vadd.f32 1.0, %v2759_v53 }
 0x238   : > { %v2763_v63 = vpop.eup %2762  ;;  %v1430_v5 = vadd.f32 1.0, %v2761_v61  ;;  %2494 = vmatprep.mubr.msk.bf16.mxu1 %vm3205_vm1, %v2145_v58  ;;  %v3275_v58 = vld [vmem:[%s3381_s3] ss:$0 sm:$0xff] }
 0x239   : > { %v2765_v4 = vpop.eup %2764  ;;  %2782 = vrcp.f32 %v1431_v62 }
 0x23a   : > { %v2767_v8 = vpop.eup %2766  ;;  %2784 = vrcp.f32 %v1430_v5  ;;  %v2124_v9 = vpack.c.bf16 %v2763_v63, %v2765_v4 }
 0x23b   : > { %v2769_v10 = vpop.eup %2768  ;;  %v1417_v11 = vadd.f32 1.0, %v2767_v8 }
 0x23c   : > { %v2771_v12 = vpop.eup %2770  ;;  %v1416_v15 = vadd.f32 1.0, %v2769_v10  ;;  %2479 = vmatmul.mubr.msk.bf16.gmra.mxu0 %vm3205_vm1, %v2124_v9 }
 0x23d   : > { %v2773_v16 = vpop.eup %2772  ;;  %2786 = vrcp.f32 %v1417_v11 }
 0x23e   : > { %v2775_v17 = vpop.eup %2774  ;;  %2788 = vrcp.f32 %v1416_v15  ;;  %v2148_v18 = vpack.c.bf16 %v2771_v12, %v2773_v16 }
 0x23f   : > { %v2777_v21 = vpop.eup %2776  ;;  %v1433_v24 = vadd.f32 1.0, %v2775_v17 }
 0x240   : > { %v1432_v25 = vadd.f32 1.0, %v2777_v21  ;;  %2495 = vmatmul.mubr.msk.bf16.gmra.mxu1 %vm3205_vm1, %v2148_v18 }
 0x241   : > { %2790 = vrcp.f32 %v1433_v24 }
 0x242   : > { %v2779_v26 = vpop.eup %2778  ;;  %2792 = vrcp.f32 %v1432_v25 }
 0x243   : > { %v2781_v33 = vpop.eup %2780 }
 0x244   : > { %v2127_v34 = vpack.c.bf16 %v2779_v26, %v2781_v33 }
 0x246   : > { %v2783_v35 = vpop.eup %2782  ;;  %2482 = vmatprep.mubr.msk.bf16.mxu0 %vm3205_vm1, %v2127_v34 }
 0x247   : > { %v2785_v38 = vpop.eup %2784 }
 0x248   : > { %v2151_v39 = vpack.c.bf16 %v2783_v35, %v2785_v38 }
 0x24a   : > { %v2787_v40 = vpop.eup %2786  ;;  %2498 = vmatprep.mubr.msk.bf16.mxu1 %vm3205_vm1, %v2151_v39 }
 0x24b   : > { %v2789_v43 = vpop.eup %2788 }
 0x24c   : > { %v2130_v44 = vpack.c.bf16 %v2787_v40, %v2789_v43 }
 0x24e   : > { %v2791_v49 = vpop.eup %2790  ;;  %2483 = vmatmul.mubr.msk.bf16.gmra.mxu0 %vm3205_vm1, %v2130_v44 }
 0x24f   : > { %v2793_v50 = vpop.eup %2792 }
 0x250   : > { %v2154_v52 = vpack.c.bf16 %v2791_v49, %v2793_v50 }
 0x252   : > { %2499 = vmatmul.mubr.msk.bf16.gmra.mxu1 %vm3205_vm1, %v2154_v52 }
 0x2dc   : > { %v2472_v53 = vpop.f32.mrf.mxu0 }
 0x2dd   : > { %v1631_v62 = vadd.f32 %v2472_v53, %v3275_v58 }
 0x2de   : > { %v1622_v61 = vpop.f32.mrf.mxu0 }
 0x2df   : > { %v1623_v63 = vadd.f32 %v3275_v58, %v1622_v61  ;;  %v1751_v51 = vmul.f32 %v1631_v62, %v3152_v47 }
 0x2e0   : > { %v2473_v5 = vpop.f32.mrf.mxu0  ;;  %v2488_v4 = vpop.f32.mrf.mxu1 }
 0x2e1   : > { %v1634_v8 = vadd.f32 %v2473_v5, %v3275_v58  ;;  %v1695_v12 = vadd.f32 %v2488_v4, %v3275_v58  ;;  %v1749_v16 = vmul.f32 %v1623_v63, %v3140_v29 }
 0x2e2   : > { %v1625_v9 = vpop.f32.mrf.mxu0  ;;  %v1686_v10 = vpop.f32.mrf.mxu1 }
 0x2e3   : > { %v1752_v11 = vmul.f32 %v1634_v8, %v3150_v46  ;;  %v1626_v15 = vadd.f32 %v3275_v58, %v1625_v9  ;;  %v1687_v24 = vadd.f32 %v3275_v58, %v1686_v10  ;;  %v1767_v46 = vmul.f32 %v1695_v12, %v3158_v57 }
 0x2e4   : > { %v2489_v17 = vpop.f32.mrf.mxu1 }
 0x2e5   : > { %v2231_v18 = vpack.c.bf16 %v1752_v11, %v1751_v51  ;;  %v1750_v21 = vmul.f32 %v1626_v15, %v3146_v37  ;;  %v1698_v25 = vadd.f32 %v2489_v17, %v3275_v58  ;;  %v1765_v29 = vmul.f32 %v1687_v24, %v3138_v28 }
 0x2e6   : > { %v1689_v47 = vpop.f32.mrf.mxu1 }
 0x2e7   : > { %2303 = vst [vmem:[%s3022_s12 + $0x8] sm:$0xff] %v2231_v18   ;;  %v2226_v26 = vpack.c.bf16 %v1750_v21, %v1749_v16  ;;  %v1768_v33 = vmul.f32 %v1698_v25, %v3156_v56  ;;  %v1690_v34 = vadd.f32 %v3275_v58, %v1689_v47 }
 0x2e9   : > { %2227 = vst [vmem:[%s3022_s12] sm:$0xff] %v2226_v26   ;;  %v2271_v35 = vpack.c.bf16 %v1768_v33, %v1767_v46  ;;  %v1766_v38 = vmul.f32 %v1690_v34, %v3144_v36 }
 0x2eb   : > { %2311 = vst [vmem:[%s3022_s12 + $0x48] sm:$0xff] %v2271_v35   ;;  %v2266_v37 = vpack.c.bf16 %v1766_v38, %v1765_v29 }
 0x2ed   : > { %2310 = vst [vmem:[%s3022_s12 + $0x40] sm:$0xff] %v2266_v37  }
 0x2ee   : > { %v2476_v39 = vpop.f32.mrf.mxu0 }
 0x2ef   : > { %v1647_v43 = vadd.f32 %v2476_v39, %v3275_v58 }
 0x2f0   : > { %v1638_v40 = vpop.f32.mrf.mxu0 }
 0x2f1   : > { %v1639_v57 = vadd.f32 %v3275_v58, %v1638_v40  ;;  %v1755_v28 = vmul.f32 %v1647_v43, %v3176_v30 }
 0x2f2   : > { %v2477_v44 = vpop.f32.mrf.mxu0  ;;  %v2492_v56 = vpop.f32.mrf.mxu1 }
 0x2f3   : > { %v1650_v49 = vadd.f32 %v2477_v44, %v3275_v58  ;;  %v1711_v53 = vadd.f32 %v2492_v56, %v3275_v58  ;;  %v1753_v62 = vmul.f32 %v1639_v57, %v3164_v3 }
 0x2f4   : > { %v1641_v50 = vpop.f32.mrf.mxu0  ;;  %v1702_v52 = vpop.f32.mrf.mxu1 }
 0x2f5   : > { %v1756_v36 = vmul.f32 %v1650_v49, %v3174_v27  ;;  %v1642_v61 = vadd.f32 %v3275_v58, %v1641_v50  ;;  %v1703_v8 = vadd.f32 %v3275_v58, %v1702_v52  ;;  %v1771_v27 = vmul.f32 %v1711_v53, %v3182_v48 }
 0x2f6   : > { %v2493_v63 = vpop.f32.mrf.mxu1 }
 0x2f7   : > { %v2241_v5 = vpack.c.bf16 %v1756_v36, %v1755_v28  ;;  %v1754_v4 = vmul.f32 %v1642_v61, %v3162_v2  ;;  %v1714_v9 = vadd.f32 %v2493_v63, %v3275_v58  ;;  %v1769_v3 = vmul.f32 %v1703_v8, %v3170_v14 }
 0x2f8   : > { %v1705_v30 = vpop.f32.mrf.mxu1 }
 0x2f9   : > { %2305 = vst [vmem:[%s3022_s12 + $0x18] sm:$0xff] %v2241_v5   ;;  %v2236_v10 = vpack.c.bf16 %v1754_v4, %v1753_v62  ;;  %v1772_v51 = vmul.f32 %v1714_v9, %v3180_v45  ;;  %v1706_v11 = vadd.f32 %v3275_v58, %v1705_v30 }
 0x2fb   : > { %2304 = vst [vmem:[%s3022_s12 + $0x10] sm:$0xff] %v2236_v10   ;;  %v2281_v12 = vpack.c.bf16 %v1772_v51, %v1771_v27  ;;  %v1770_v2 = vmul.f32 %v1706_v11, %v3168_v13 }
 0x2fc   : > { %v2480_v15 = vpop.f32.mrf.mxu0 }
 0x2fd   : > { %2313 = vst [vmem:[%s3022_s12 + $0x58] sm:$0xff] %v2281_v12   ;;  %v2276_v16 = vpack.c.bf16 %v1770_v2, %v1769_v3  ;;  %v1663_v18 = vadd.f32 %v2480_v15, %v3275_v58 }
 0x2fe   : > { %v1654_v17 = vpop.f32.mrf.mxu0 }
 0x2ff   : > { %2312 = vst [vmem:[%s3022_s12 + $0x50] sm:$0xff] %v2276_v16   ;;  %v1655_v48 = vadd.f32 %v3275_v58, %v1654_v17  ;;  %v1759_v14 = vmul.f32 %v1663_v18, %v3200_v42 }
 0x300   : > { %v2481_v21 = vpop.f32.mrf.mxu0  ;;  %v2496_v45 = vpop.f32.mrf.mxu1 }
 0x301   : > { %v1666_v24 = vadd.f32 %v2481_v21, %v3275_v58  ;;  %v1727_v46 = vadd.f32 %v2496_v45, %v3275_v58  ;;  %v1757_v33 = vmul.f32 %v1655_v48, %v3188_v1 }
 0x302   : > { %v1657_v25 = vpop.f32.mrf.mxu0  ;;  %v1718_v47 = vpop.f32.mrf.mxu1 }
 0x303   : > { %v1760_v13 = vmul.f32 %v1666_v24, %v3198_v41  ;;  %v1658_v26 = vadd.f32 %v3275_v58, %v1657_v25  ;;  %v1719_v38 = vadd.f32 %v3275_v58, %v1718_v47  ;;  %v1775_v41 = vmul.f32 %v1727_v46, %v3216_v7 }
 0x304   : > { %v2497_v34 = vpop.f32.mrf.mxu1 }
 0x305   : > { %v2251_v29 = vpack.c.bf16 %v1760_v13, %v1759_v14  ;;  %v1758_v35 = vmul.f32 %v1658_v26, %v3186_v0  ;;  %v1730_v37 = vadd.f32 %v2497_v34, %v3275_v58  ;;  %v1773_v1 = vmul.f32 %v1719_v38, %v3194_v20 }
 0x306   : > { %v1721_v42 = vpop.f32.mrf.mxu1 }
 0x307   : > { %2307 = vst [vmem:[%s3022_s12 + $0x28] sm:$0xff] %v2251_v29   ;;  %v2246_v39 = vpack.c.bf16 %v1758_v35, %v1757_v33  ;;  %v1776_v40 = vmul.f32 %v1730_v37, %v3214_v6  ;;  %v1722_v43 = vadd.f32 %v3275_v58, %v1721_v42 }
 0x309   : > { %2306 = vst [vmem:[%s3022_s12 + $0x20] sm:$0xff] %v2246_v39   ;;  %v2291_v57 = vpack.c.bf16 %v1776_v40, %v1775_v41  ;;  %v1774_v44 = vmul.f32 %v1722_v43, %v3192_v19 }
 0x30b   : > { %2315 = vst [vmem:[%s3022_s12 + $0x68] sm:$0xff] %v2291_v57   ;;  %v2286_v0 = vpack.c.bf16 %v1774_v44, %v1773_v1 }
 0x30d   : > { %2314 = vst [vmem:[%s3022_s12 + $0x60] sm:$0xff] %v2286_v0  }
 0x30e   : > { %v2484_v56 = vpop.f32.mrf.mxu0 }
 0x30f   : > { %v1679_v50 = vadd.f32 %v2484_v56, %v3275_v58 }
 0x310   : > { %v1670_v49 = vpop.f32.mrf.mxu0 }
 0x311   : > { %v1671_v7 = vadd.f32 %v3275_v58, %v1670_v49  ;;  %v1763_v20 = vmul.f32 %v1679_v50, %v3238_v23 }
 0x312   : > { %v2485_v52 = vpop.f32.mrf.mxu0  ;;  %v2500_v6 = vpop.f32.mrf.mxu1 }
 0x313   : > { %v1682_v28 = vadd.f32 %v2485_v52, %v3275_v58  ;;  %v1743_v61 = vadd.f32 %v2500_v6, %v3275_v58  ;;  %v1761_v63 = vmul.f32 %v1671_v7, %v3224_v32 }
 0x314   : > { %v1673_v36 = vpop.f32.mrf.mxu0  ;;  %v1734_v53 = vpop.f32.mrf.mxu1 }
 0x315   : > { %v1764_v19 = vmul.f32 %v1682_v28, %v3236_v22  ;;  %v1674_v62 = vadd.f32 %v3275_v58, %v1673_v36  ;;  %v1735_v9 = vadd.f32 %v3275_v58, %v1734_v53  ;;  %v1779_v22 = vmul.f32 %v1743_v61, %v3246_v55 }
 0x316   : > { %v2501_v5 = vpop.f32.mrf.mxu1 }
 0x317   : > { %v2261_v4 = vpack.c.bf16 %v1764_v19, %v1763_v20  ;;  %v1762_v8 = vmul.f32 %v1674_v62, %v3222_v31  ;;  %v1746_v30 = vadd.f32 %v2501_v5, %v3275_v58  ;;  %v1777_v32 = vmul.f32 %v1735_v9, %v3232_v60 }
 0x318   : > { %v1737_v23 = vpop.f32.mrf.mxu1 }
 0x319   : > { %2309 = vst [vmem:[%s3022_s12 + $0x38] sm:$0xff] %v2261_v4   ;;  %v2256_v27 = vpack.c.bf16 %v1762_v8, %v1761_v63  ;;  %v1780_v10 = vmul.f32 %v1746_v30, %v3244_v54  ;;  %v1738_v51 = vadd.f32 %v3275_v58, %v1737_v23 }
 0x31b   : > { %2308 = vst [vmem:[%s3022_s12 + $0x30] sm:$0xff] %v2256_v27   ;;  %v2301_v11 = vpack.c.bf16 %v1780_v10, %v1779_v22  ;;  %v1778_v3 = vmul.f32 %v1738_v51, %v3230_v59 }
 0x31d   : > { %2317 = vst [vmem:[%s3022_s12 + $0x78] sm:$0xff] %v2301_v11   ;;  %v2296_v31 = vpack.c.bf16 %v1778_v3, %v1777_v32 }
 0x31f   : > { %2316 = vst [vmem:[%s3022_s12 + $0x70] sm:$0xff] %v2296_v31  }
 0x320 PF: > { %s15_s24 = sadd.s32 1, %s2848_s24   ;;  %s3386_s18 = smov %s2828_s19 }
 0x321   : > { %p12_p13 = scmp.ge.s32.totalorder %s15_s24, 6   ;;  %s3387_s19 = smov %s2933_s6 }
 0x322   : > { %s3388_s20 = smov %s2840_s22  ;;  %s3389_s21 = smov %s2844_s23 }
 0x323   : > { %s3390_s22 = smov %s3393_s25  ;;  %s3391_s23 = smov %s3397_s26 }
 0x324   :  { %14 = sbr.rel (!%p12_p13) target bundleno = 4 (0x4), region = 125 }

// kernel: hgcn_forward.5
= control target key start
LH: loop header
LB: loop body
LE: loop exit
PB: predicated region body
PF: predicated region fallthrough
CT: control target
= control target key end

     0   :  { %s2980_s24 = smov 0   ;;  %s2982_s25 = smov 0   ;;  %s3425_s0 = inlined_call_operand.vmem [shape: bf16[512,512], index: 0, kind: input, shape index: {}]   ;;  %s3426_s1 = inlined_call_operand.vmem [shape: bf16[512,128], index: 1, kind: input, shape index: {}]   ;;  %s3427_s2 = inlined_call_operand.vmem [shape: bf16[128,128], index: 2, kind: input, shape index: {}]   ;;  %s3428_s3 = inlined_call_operand.vmem [shape: f32[1,128], index: 3, kind: input, shape index: {}]   ;;  %s3429_s4 = inlined_call_operand.vmem [shape: bf16[128,128], index: 4, kind: input, shape index: {}]   ;;  %s3430_s5 = inlined_call_operand.vmem [shape: f32[1,128], index: 5, kind: input, shape index: {}]   ;;  %s3431_s6 = inlined_call_operand.vmem [shape: f32[512,1], index: 6, kind: input, shape index: {}]   ;;  %s3432_s7 = inlined_call_operand.vmem [shape: f32[512,128], index: 7, kind: output, shape index: {}]  }
   0x1   :  { %s2984_s26 = smov 0   ;;  %s2986_s27 = smov 0  }
   0x2   :  { %s2988_s28 = smov 0   ;;  %s2990_s29 = smov 0  }
   0x3   :  { %s2992_s30 = smov 0  }
   0x4 LB: > { %s26_s8 = sadd.s32 1, %s2928_s28  ;;  %s29_s9 = sadd.s32 1, %s2932_s29  ;;  %s2936_s30 = sphi %s2992_s30, %s17_s30   ;;  %s2932_s29 = sphi %s2990_s29, %s3440_s29   ;;  %s2928_s28 = sphi %s2988_s28, %s3439_s28   ;;  %s2924_s27 = sphi %s2986_s27, %s3438_s27   ;;  %s2920_s26 = sphi %s2984_s26, %s3437_s26   ;;  %s2916_s25 = sphi %s2982_s25, %s3436_s25   ;;  %s2912_s24 = sphi %s2980_s24, %s3435_s24  }
   0x5   : > { %p27_p0 = scmp.ge.s32.totalorder %s26_s8, 2  ;;  %p45_p1 = scmp.ne.s32.totalorder %s2916_s25, %s2912_s24 }
   0x6   : > { %p46_p2 = scmp.eq.s32.totalorder %s2936_s30, 0  ;;  %s38_s13 = sadd.s32 1, %s2916_s25 }
   0x7   : > { %s3442_s8 = smov (%p27_p0, %s26_s8), 0  ;;  %s3444_s9 = smov (!%p27_p0, %s29_s9), %s2932_s29 }
   0x8   : > { %p47_p3 = por %p46_p2, %p45_p1  ;;  %p31_p4 = scmp.ge.s32.totalorder %s3444_s9, 2 }
   0x9   : > { %s34_s10 = ssub.s32 %s2928_s28, %s3442_s8  ;;  %p2209_p6 = scmp.ge.s32.totalorder %s2936_s30, 4 }
   0xa   : > { %s3446_s9 = smov (%p31_p4, %s3444_s9), 0 }
   0xb   : > { %s33_s11 = ssub.s32 %s2932_s29, %s3446_s9  ;;  %243 = sbr.rel (%p2209_p6) target bundleno = 39 (0x27), region = 36 }
   0xc   : > { %s35_s12 = sor.u32 %s34_s10, %s33_s11 }
   0xd   : > { %p36_p5 = scmp.eq.s32.totalorder %s35_s12, 0 }
   0xf   : > { %s3031_s14 = scalar_select %p36_p5, %s2916_s25, %s38_s13  }
  0x10   : > { %246 = sbr.rel (!%p47_p3) target bundleno = 39 (0x27), region = 40  ;;  %s248_s15 = sand.u32 (%p47_p3), 1, %s2916_s25  }
  0x11   : > { %s2212_s16 = sshll.u32 (%p47_p3), %s2928_s28, 1  ;;  %s2210_s17 = sshll.u32 (%p47_p3), %s248_s15, 8 }
  0x12   : > { %s2341_s18 = sshll.u32 (%p47_p3), %s2932_s29, 7  ;;  %s3045_s10 = scalar_lea.vmem (%p47_p3), [#allocation3], %s2210_s17 }
  0x13   : > { %s254_s19 = sadd.s32 (%p47_p3), %s2341_s18, %s2212_s16 }
  0x14   : > { %s2214_s20 = sshll.u32 (%p47_p3), %s254_s19, 2 }
  0x15   : > { %s3040_s23 = scalar_lea.vmem %s3425_s0, %s2214_s20 }
  0x16   : > { %v347_v0 = vld [vmem:[%s3040_s23] sm:$0xff]  ;;  %v349_v1 = vld [vmem:[%s3040_s23 + $0x10] sm:$0xff] }
  0x17   : > { %v351_v2 = vld [vmem:[%s3040_s23 + $0x20] sm:$0xff]  ;;  %348 = vst [vmem:[%s3045_s10] sm:$0xff] %v347_v0  ;;  %350 = vst [vmem:[%s3045_s10 + $0x8] sm:$0xff] %v349_v1  ;;  %v353_v3 = vld [vmem:[%s3040_s23 + $0x30] sm:$0xff] }
  0x18   : > { %352 = vst [vmem:[%s3045_s10 + $0x10] sm:$0xff] %v351_v2  ;;  %v355_v4 = vld [vmem:[%s3040_s23 + $0x40] sm:$0xff]  ;;  %v357_v5 = vld [vmem:[%s3040_s23 + $0x50] sm:$0xff]  ;;  %354 = vst [vmem:[%s3045_s10 + $0x18] sm:$0xff] %v353_v3 }
  0x19   : > { %356 = vst [vmem:[%s3045_s10 + $0x20] sm:$0xff] %v355_v4  ;;  %358 = vst [vmem:[%s3045_s10 + $0x28] sm:$0xff] %v357_v5  ;;  %v359_v6 = vld [vmem:[%s3040_s23 + $0x60] sm:$0xff]  ;;  %v361_v7 = vld [vmem:[%s3040_s23 + $0x70] sm:$0xff] }
  0x1a   : > { %v363_v8 = vld [vmem:[%s3040_s23 + $0x80] sm:$0xff]  ;;  %360 = vst [vmem:[%s3045_s10 + $0x30] sm:$0xff] %v359_v6  ;;  %362 = vst [vmem:[%s3045_s10 + $0x38] sm:$0xff] %v361_v7  ;;  %v365_v9 = vld [vmem:[%s3040_s23 + $0x90] sm:$0xff] }
  0x1b   : > { %364 = vst [vmem:[%s3045_s10 + $0x40] sm:$0xff] %v363_v8  ;;  %v367_v10 = vld [vmem:[%s3040_s23 + $0xa0] sm:$0xff]  ;;  %v369_v11 = vld [vmem:[%s3040_s23 + $0xb0] sm:$0xff]  ;;  %366 = vst [vmem:[%s3045_s10 + $0x48] sm:$0xff] %v365_v9 }
  0x1c   : > { %368 = vst [vmem:[%s3045_s10 + $0x50] sm:$0xff] %v367_v10  ;;  %370 = vst [vmem:[%s3045_s10 + $0x58] sm:$0xff] %v369_v11  ;;  %v371_v12 = vld [vmem:[%s3040_s23 + $0xc0] sm:$0xff]  ;;  %v373_v13 = vld [vmem:[%s3040_s23 + $0xd0] sm:$0xff] }
  0x1d   : > { %v375_v14 = vld [vmem:[%s3040_s23 + $0xe0] sm:$0xff]  ;;  %372 = vst [vmem:[%s3045_s10 + $0x60] sm:$0xff] %v371_v12  ;;  %374 = vst [vmem:[%s3045_s10 + $0x68] sm:$0xff] %v373_v13  ;;  %v377_v15 = vld [vmem:[%s3040_s23 + $0xf0] sm:$0xff] }
  0x1e   : > { %376 = vst [vmem:[%s3045_s10 + $0x70] sm:$0xff] %v375_v14  ;;  %v379_v16 = vld [vmem:[%s3040_s23 + $0x100] sm:$0xff]  ;;  %v381_v17 = vld [vmem:[%s3040_s23 + $0x110] sm:$0xff]  ;;  %378 = vst [vmem:[%s3045_s10 + $0x78] sm:$0xff] %v377_v15 }
  0x1f   : > { %380 = vst [vmem:[%s3045_s10 + $0x80] sm:$0xff] %v379_v16  ;;  %382 = vst [vmem:[%s3045_s10 + $0x88] sm:$0xff] %v381_v17  ;;  %v383_v18 = vld [vmem:[%s3040_s23 + $0x120] sm:$0xff]  ;;  %v385_v19 = vld [vmem:[%s3040_s23 + $0x130] sm:$0xff] }
  0x20   : > { %v387_v20 = vld [vmem:[%s3040_s23 + $0x140] sm:$0xff]  ;;  %384 = vst [vmem:[%s3045_s10 + $0x90] sm:$0xff] %v383_v18  ;;  %386 = vst [vmem:[%s3045_s10 + $0x98] sm:$0xff] %v385_v19  ;;  %v389_v21 = vld [vmem:[%s3040_s23 + $0x150] sm:$0xff] }
  0x21   : > { %388 = vst [vmem:[%s3045_s10 + $0xa0] sm:$0xff] %v387_v20  ;;  %v391_v22 = vld [vmem:[%s3040_s23 + $0x160] sm:$0xff]  ;;  %v393_v23 = vld [vmem:[%s3040_s23 + $0x170] sm:$0xff]  ;;  %390 = vst [vmem:[%s3045_s10 + $0xa8] sm:$0xff] %v389_v21 }
  0x22   : > { %392 = vst [vmem:[%s3045_s10 + $0xb0] sm:$0xff] %v391_v22  ;;  %394 = vst [vmem:[%s3045_s10 + $0xb8] sm:$0xff] %v393_v23  ;;  %v395_v24 = vld [vmem:[%s3040_s23 + $0x180] sm:$0xff]  ;;  %v397_v25 = vld [vmem:[%s3040_s23 + $0x190] sm:$0xff] }
  0x23   : > { %v399_v26 = vld [vmem:[%s3040_s23 + $0x1a0] sm:$0xff]  ;;  %396 = vst [vmem:[%s3045_s10 + $0xc0] sm:$0xff] %v395_v24  ;;  %398 = vst [vmem:[%s3045_s10 + $0xc8] sm:$0xff] %v397_v25  ;;  %v401_v27 = vld [vmem:[%s3040_s23 + $0x1b0] sm:$0xff] }
  0x24   : > { %400 = vst [vmem:[%s3045_s10 + $0xd0] sm:$0xff] %v399_v26  ;;  %v403_v28 = vld [vmem:[%s3040_s23 + $0x1c0] sm:$0xff]  ;;  %v405_v29 = vld [vmem:[%s3040_s23 + $0x1d0] sm:$0xff]  ;;  %402 = vst [vmem:[%s3045_s10 + $0xd8] sm:$0xff] %v401_v27 }
  0x25   : > { %404 = vst [vmem:[%s3045_s10 + $0xe0] sm:$0xff] %v403_v28  ;;  %406 = vst [vmem:[%s3045_s10 + $0xe8] sm:$0xff] %v405_v29  ;;  %v407_v30 = vld [vmem:[%s3040_s23 + $0x1e0] sm:$0xff]  ;;  %v409_v31 = vld [vmem:[%s3040_s23 + $0x1f0] sm:$0xff] }
  0x26   : > { %408 = vst [vmem:[%s3045_s10 + $0xf0] sm:$0xff] %v407_v30  ;;  %410 = vst [vmem:[%s3045_s10 + $0xf8] sm:$0xff] %v409_v31 }
  0x27 PF: > { %p2215_p7 = scmp.ge.s32.totalorder %s2936_s30, 1  ;;  %p424_p8 = scmp.lt.s32.totalorder %s2936_s30, 5 }
  0x29   : > { %p425_p9 = pnand %p2215_p7, %p424_p8 }
  0x2a   : > { %s431_s11 = sand.u32 (!%p425_p9), 1, %s2912_s24   ;;  %s2217_s12 = sshll.u32 (!%p425_p9), %s2924_s27, 5 }
  0x2b   : > { %428 = sbr.rel (%p425_p9) target bundleno = 1002 (0x3ea), region = 82  ;;  %s2216_s13 = sshll.u32 (!%p425_p9), %s431_s11, 8 }
  0x2c   : > { %p470_p10 = scmp.lt.s32.totalorder (!%p425_p9), %s2217_s12, 63  ;;  %s3122_s22 = scalar_lea.vmem (!%p425_p9), [#allocation3], %s2216_s13 }
  0x2d   : > { %p2221_p11 = scmp.ne.s32.totalorder (!%p425_p9), %s2920_s26, 0 }
  0x30   : > { %s3448_s12 = smov (!%p470_p10, %s2217_s12), 63  ;;  %485 = sbr.rel (%p2221_p11) target bundleno = 70 (0x46), region = 90 }
  0x31   : > { %s2218_s15 = sshll.u32 %s3448_s12, 3 }
  0x32   : > { %s3115_s18 = scalar_lea.vmem %s3431_s6, %s2218_s15  ;;  %s3120_s21 = scalar_lea.vmem %s3432_s7, %s2218_s15 }
  0x35   : > { %v2938_v32 = vmov 0.0  }
  0x36   : > { %486 = vst [vmem:[#allocation2 + $0xb0] sm:$0xff] %v2938_v32  ;;  %487 = vst [vmem:[#allocation2] sm:$0xff] %v2938_v32 }
  0x37   : > { %488 = vst [vmem:[#allocation2 + $0xd8] sm:$0xff] %v2938_v32  ;;  %489 = vst [vmem:[#allocation2 + $0x18] sm:$0xff] %v2938_v32 }
  0x38   : > { %490 = vst [vmem:[#allocation2 + $0x50] sm:$0xff] %v2938_v32  ;;  %491 = vst [vmem:[#allocation2 + $0x68] sm:$0xff] %v2938_v32 }
  0x39   : > { %492 = vst [vmem:[#allocation2 + $0x30] sm:$0xff] %v2938_v32  ;;  %493 = vst [vmem:[#allocation2 + $0x48] sm:$0xff] %v2938_v32 }
  0x3a   : > { %494 = vst [vmem:[#allocation2 + $0x80] sm:$0xff] %v2938_v32  ;;  %495 = vst [vmem:[#allocation2 + $0x88] sm:$0xff] %v2938_v32 }
  0x3b   : > { %496 = vst [vmem:[#allocation2 + $0xe8] sm:$0xff] %v2938_v32  ;;  %497 = vst [vmem:[#allocation2 + $0xb8] sm:$0xff] %v2938_v32 }
  0x3c   : > { %498 = vst [vmem:[#allocation2 + $0x60] sm:$0xff] %v2938_v32  ;;  %499 = vst [vmem:[#allocation2 + $0xf0] sm:$0xff] %v2938_v32 }
  0x3d   : > { %500 = vst [vmem:[#allocation2 + $0x8] sm:$0xff] %v2938_v32  ;;  %501 = vst [vmem:[#allocation2 + $0x78] sm:$0xff] %v2938_v32 }
  0x3e   : > { %502 = vst [vmem:[#allocation2 + $0x38] sm:$0xff] %v2938_v32  ;;  %503 = vst [vmem:[#allocation2 + $0x58] sm:$0xff] %v2938_v32 }
  0x3f   : > { %504 = vst [vmem:[#allocation2 + $0x40] sm:$0xff] %v2938_v32  ;;  %505 = vst [vmem:[#allocation2 + $0xc8] sm:$0xff] %v2938_v32 }
  0x40   : > { %506 = vst [vmem:[#allocation2 + $0xe0] sm:$0xff] %v2938_v32  ;;  %507 = vst [vmem:[#allocation2 + $0x90] sm:$0xff] %v2938_v32 }
  0x41   : > { %508 = vst [vmem:[#allocation2 + $0x70] sm:$0xff] %v2938_v32  ;;  %509 = vst [vmem:[#allocation2 + $0xc0] sm:$0xff] %v2938_v32 }
  0x42   : > { %510 = vst [vmem:[#allocation2 + $0xa8] sm:$0xff] %v2938_v32  ;;  %511 = vst [vmem:[#allocation2 + $0xd0] sm:$0xff] %v2938_v32 }
  0x43   : > { %512 = vst [vmem:[#allocation2 + $0x10] sm:$0xff] %v2938_v32  ;;  %513 = vst [vmem:[#allocation2 + $0x28] sm:$0xff] %v2938_v32 }
  0x44   : > { %514 = vst [vmem:[#allocation2 + $0xa0] sm:$0xff] %v2938_v32  ;;  %515 = vst [vmem:[#allocation2 + $0xf8] sm:$0xff] %v2938_v32 }
  0x45   : > { %516 = vst [vmem:[#allocation2 + $0x20] sm:$0xff] %v2938_v32  ;;  %517 = vst [vmem:[#allocation2 + $0x98] sm:$0xff] %v2938_v32 }
  0x46 PF: > { %s2222_s24 = sshll.u32 %s2920_s26, 8  ;;  %v2690_v33 = vld [vmem:[%s3122_s22 + $0x4] ss:$8 sps:$4 sm:$0xff]   ;;  %v2688_v51 = vld [vmem:[%s3122_s22] ss:$8 sps:$4 sm:$0xff]   ;;  %v519_v19 = vld [vmem:[#allocation2 + $0xb0] sm:$0xff] }
  0x47   : > { %s583_s27 = sshra.s32 %s2222_s24, 3  ;;  %v2693_v34 = vld [vmem:[%s3122_s22 + $0x84] ss:$8 sps:$4 sm:$0xff]   ;;  %907 = vmatprep.mubr.bf16.mxu0 %v2690_v33  ;;  %v2691_v52 = vld [vmem:[%s3122_s22 + $0x80] ss:$8 sps:$4 sm:$0xff]   ;;  %v535_v21 = vld [vmem:[#allocation2 + $0x38] sm:$0xff] }
  0x48   : > { %s2223_s23 = sshll.u32 %s583_s27, 2  ;;  %971 = vmatprep.mubr.bf16.mxu1 %v2693_v34  ;;  %v2694_v53 = vld [vmem:[%s3122_s22 + $0x14] ss:$8 sps:$4 sm:$0xff]   ;;  %v2698_v55 = vld [vmem:[%s3122_s22 + $0x10] ss:$8 sps:$4 sm:$0xff]   ;;  %v520_v29 = vld [vmem:[#allocation2] sm:$0xff] }
  0x49   : > { %s3131_s12 = scalar_lea.vmem %s3426_s1, %s2223_s23  ;;  %v2696_v54 = vld [vmem:[%s3122_s22 + $0x94] ss:$8 sps:$4 sm:$0xff]   ;;  %v2699_v56 = vld [vmem:[%s3122_s22 + $0x90] ss:$8 sps:$4 sm:$0xff]   ;;  %v2700_v57 = vld [vmem:[%s3122_s22 + $0x24] ss:$8 sps:$4 sm:$0xff]  }
  0x4a   : > { %v2672_v35 = vld [vmem:[%s3131_s12 + $0x78] sm:$0xff]   ;;  %v2674_v37 = vld [vmem:[%s3131_s12 + $0x70] sm:$0xff]   ;;  %v2676_v39 = vld [vmem:[%s3131_s12 + $0x68] sm:$0xff]   ;;  %p2272_p12 = scmp.ne.s32.totalorder %s2920_s26, 1 }
  0x4b   : > { %v2673_v36 = vld [vmem:[%s3131_s12 + $0x38] sm:$0xff]   ;;  %2342 = vmatprep.subr.bf16.mxu0 %v2672_v35  ;;  %2598 = vmatprep.subr.bf16.mxu1 %v2672_v35  ;;  %v2675_v38 = vld [vmem:[%s3131_s12 + $0x30] sm:$0xff]   ;;  %v2677_v40 = vld [vmem:[%s3131_s12 + $0x28] sm:$0xff]  }
  0x4c   : > { %2343 = vmatpush3.bf16.msra.mxu0 %v2673_v36  ;;  %2606 = vmatpush3.bf16.msra.mxu1 %v2673_v36  ;;  %v2678_v41 = vld [vmem:[%s3131_s12 + $0x60] sm:$0xff]   ;;  %v2680_v43 = vld [vmem:[%s3131_s12 + $0x58] sm:$0xff]   ;;  %v2682_v45 = vld [vmem:[%s3131_s12 + $0x50] sm:$0xff]  }
  0x4d   : > { %2344 = vmatprep.subr.bf16.mxu0 %v2674_v37  ;;  %2599 = vmatprep.subr.bf16.mxu1 %v2674_v37  ;;  %v2679_v42 = vld [vmem:[%s3131_s12 + $0x20] sm:$0xff]   ;;  %v2681_v44 = vld [vmem:[%s3131_s12 + $0x18] sm:$0xff]   ;;  %v2683_v46 = vld [vmem:[%s3131_s12 + $0x10] sm:$0xff]  }
  0x4e   : > { %v2684_v47 = vld [vmem:[%s3131_s12 + $0x48] sm:$0xff]   ;;  %v2686_v49 = vld [vmem:[%s3131_s12 + $0x40] sm:$0xff]   ;;  %v2706_v61 = vld [vmem:[%s3122_s22 + $0x34] ss:$8 sps:$4 sm:$0xff]  }
  0x4f   : > { %v2685_v48 = vld [vmem:[%s3131_s12 + $0x8] sm:$0xff]   ;;  %v2687_v50 = vld [vmem:[%s3131_s12] sm:$0xff]   ;;  %v2708_v62 = vld [vmem:[%s3122_s22 + $0xb4] ss:$8 sps:$4 sm:$0xff]  }
  0x50   : > { %2345 = vmatpush3.bf16.msra.mxu0 %v2675_v38  ;;  %2607 = vmatpush3.bf16.msra.mxu1 %v2675_v38  ;;  %v2702_v58 = vld [vmem:[%s3122_s22 + $0xa4] ss:$8 sps:$4 sm:$0xff]   ;;  %v2704_v59 = vld [vmem:[%s3122_s22 + $0x20] ss:$8 sps:$4 sm:$0xff]   ;;  %v2710_v63 = vld [vmem:[%s3122_s22 + $0x30] ss:$8 sps:$4 sm:$0xff]  }
  0x51   : > { %2346 = vmatprep.subr.bf16.mxu0 %v2676_v39  ;;  %2600 = vmatprep.subr.bf16.mxu1 %v2676_v39  ;;  %v2705_v60 = vld [vmem:[%s3122_s22 + $0xa0] ss:$8 sps:$4 sm:$0xff]   ;;  %v2711_v0 = vld [vmem:[%s3122_s22 + $0xb0] ss:$8 sps:$4 sm:$0xff]   ;;  %v2712_v1 = vld [vmem:[%s3122_s22 + $0x44] ss:$8 sps:$4 sm:$0xff]  }
  0x52   : > { %v2714_v2 = vld [vmem:[%s3122_s22 + $0xc4] ss:$8 sps:$4 sm:$0xff]   ;;  %v2716_v3 = vld [vmem:[%s3122_s22 + $0x40] ss:$8 sps:$4 sm:$0xff]   ;;  %v2718_v5 = vld [vmem:[%s3122_s22 + $0x54] ss:$8 sps:$4 sm:$0xff]  }
  0x53   : > { %v2717_v4 = vld [vmem:[%s3122_s22 + $0xc0] ss:$8 sps:$4 sm:$0xff]   ;;  %v2720_v6 = vld [vmem:[%s3122_s22 + $0xd4] ss:$8 sps:$4 sm:$0xff]   ;;  %v2722_v7 = vld [vmem:[%s3122_s22 + $0x50] ss:$8 sps:$4 sm:$0xff]  }
  0x54   : > { %2347 = vmatpush3.bf16.msra.mxu0 %v2677_v40  ;;  %2608 = vmatpush3.bf16.msra.mxu1 %v2677_v40  ;;  %v2723_v8 = vld [vmem:[%s3122_s22 + $0xd0] ss:$8 sps:$4 sm:$0xff]   ;;  %v2724_v9 = vld [vmem:[%s3122_s22 + $0x64] ss:$8 sps:$4 sm:$0xff]   ;;  %v2728_v11 = vld [vmem:[%s3122_s22 + $0x60] ss:$8 sps:$4 sm:$0xff]  }
  0x55   : > { %2348 = vmatprep.subr.bf16.mxu0 %v2678_v41  ;;  %2601 = vmatprep.subr.bf16.mxu1 %v2678_v41  ;;  %v2726_v10 = vld [vmem:[%s3122_s22 + $0xe4] ss:$8 sps:$4 sm:$0xff]   ;;  %v2729_v12 = vld [vmem:[%s3122_s22 + $0xe0] ss:$8 sps:$4 sm:$0xff]   ;;  %v2730_v13 = vld [vmem:[%s3122_s22 + $0x74] ss:$8 sps:$4 sm:$0xff]  }
  0x56   : > { %v2732_v14 = vld [vmem:[%s3122_s22 + $0xf4] ss:$8 sps:$4 sm:$0xff]   ;;  %v2734_v15 = vld [vmem:[%s3122_s22 + $0x70] ss:$8 sps:$4 sm:$0xff]   ;;  %v537_v41 = vld [vmem:[#allocation2 + $0x40] sm:$0xff] }
  0x57   : > { %v2735_v16 = vld [vmem:[%s3122_s22 + $0xf0] ss:$8 sps:$4 sm:$0xff]  }
  0x58   : > { %2349 = vmatpush3.bf16.msra.mxu0 %v2679_v42  ;;  %2609 = vmatpush3.bf16.msra.mxu1 %v2679_v42  ;;  %v536_v31 = vld [vmem:[#allocation2 + $0x58] sm:$0xff] }
  0x59   : > { %2350 = vmatprep.subr.bf16.mxu0 %v2680_v43  ;;  %2602 = vmatprep.subr.bf16.mxu1 %v2680_v43  ;;  %v521_v39 = vld [vmem:[#allocation2 + $0xd8] sm:$0xff] }
  0x5c   : > { %2351 = vmatpush3.bf16.msra.mxu0 %v2681_v44  ;;  %2610 = vmatpush3.bf16.msra.mxu1 %v2681_v44 }
  0x5d   : > { %2352 = vmatprep.subr.bf16.mxu0 %v2682_v45  ;;  %2603 = vmatprep.subr.bf16.mxu1 %v2682_v45 }
  0x60   : > { %2353 = vmatpush3.bf16.msra.mxu0 %v2683_v46  ;;  %2611 = vmatpush3.bf16.msra.mxu1 %v2683_v46 }
  0x61   : > { %2354 = vmatprep.subr.bf16.mxu0 %v2684_v47  ;;  %2604 = vmatprep.subr.bf16.mxu1 %v2684_v47 }
  0x64   : > { %2355 = vmatpush3.bf16.msra.mxu0 %v2685_v48  ;;  %2612 = vmatpush3.bf16.msra.mxu1 %v2685_v48 }
  0x65   : > { %2356 = vmatprep.subr.bf16.mxu0 %v2686_v49  ;;  %2605 = vmatprep.subr.bf16.mxu1 %v2686_v49  ;;  %v522_v49 = vld [vmem:[#allocation2 + $0x18] sm:$0xff] }
  0x68   : > { %2357 = vmatpush3.bf16.msra.mxu0 %v2687_v50  ;;  %2613 = vmatpush3.bf16.msra.mxu1 %v2687_v50 }
  0x6b   : > { %908 = vmatmul.mubr.bf16.vlgmr.msra.gmra.mxu0 %v2688_v51  ;;  %972 = vmatmul.mubr.bf16.vlgmr.msra.gmra.mxu1 %v2691_v52  ;;  %v538_v51 = vld [vmem:[#allocation2 + $0xc8] sm:$0xff] }
  0x6c   : > { %915 = vmatprep.mubr.bf16.mxu0 %v2694_v53  ;;  %979 = vmatprep.mubr.bf16.mxu1 %v2696_v54 }
  0x73   : > { %916 = vmatmul.mubr.bf16.gmra.mxu0 %v2698_v55  ;;  %980 = vmatmul.mubr.bf16.gmra.mxu1 %v2699_v56 }
  0x74   : > { %923 = vmatprep.mubr.bf16.mxu0 %v2700_v57  ;;  %987 = vmatprep.mubr.bf16.mxu1 %v2702_v58 }
  0x7b   : > { %924 = vmatmul.mubr.bf16.gmra.mxu0 %v2704_v59  ;;  %988 = vmatmul.mubr.bf16.gmra.mxu1 %v2705_v60  ;;  %v523_v59 = vld [vmem:[#allocation2 + $0x50] sm:$0xff] }
  0x7c   : > { %931 = vmatprep.mubr.bf16.mxu0 %v2706_v61  ;;  %995 = vmatprep.mubr.bf16.mxu1 %v2708_v62  ;;  %v539_v61 = vld [vmem:[#allocation2 + $0xe0] sm:$0xff] }
  0x83   : > { %932 = vmatmul.mubr.bf16.gmra.mxu0 %v2710_v63  ;;  %996 = vmatmul.mubr.bf16.gmra.mxu1 %v2711_v0 }
  0x84   : > { %939 = vmatprep.mubr.bf16.mxu0 %v2712_v1  ;;  %1003 = vmatprep.mubr.bf16.mxu1 %v2714_v2 }
  0x8b   : > { %940 = vmatmul.mubr.bf16.gmra.mxu0 %v2716_v3  ;;  %1004 = vmatmul.mubr.bf16.gmra.mxu1 %v2717_v4 }
  0x8c   : > { %947 = vmatprep.mubr.bf16.mxu0 %v2718_v5  ;;  %1011 = vmatprep.mubr.bf16.mxu1 %v2720_v6  ;;  %v524_v5 = vld [vmem:[#allocation2 + $0x68] sm:$0xff] }
  0x93   : > { %948 = vmatmul.mubr.bf16.gmra.mxu0 %v2722_v7  ;;  %1012 = vmatmul.mubr.bf16.gmra.mxu1 %v2723_v8  ;;  %v540_v7 = vld [vmem:[#allocation2 + $0x90] sm:$0xff] }
  0x94   : > { %955 = vmatprep.mubr.bf16.mxu0 %v2724_v9  ;;  %1019 = vmatprep.mubr.bf16.mxu1 %v2726_v10 }
  0x9b   : > { %956 = vmatmul.mubr.bf16.gmra.mxu0 %v2728_v11  ;;  %1020 = vmatmul.mubr.bf16.gmra.mxu1 %v2729_v12 }
  0x9c   : > { %963 = vmatprep.mubr.bf16.mxu0 %v2730_v13  ;;  %1027 = vmatprep.mubr.bf16.mxu1 %v2732_v14 }
  0xa3   : > { %964 = vmatmul.mubr.bf16.gmra.mxu0 %v2734_v15  ;;  %1028 = vmatmul.mubr.bf16.gmra.mxu1 %v2735_v16  ;;  %v525_v15 = vld [vmem:[#allocation2 + $0x30] sm:$0xff] }
 0x12b   : > { %v2358_v17 = vpop.f32.mrf.mxu0  ;;  %v2406_v18 = vpop.f32.mrf.mxu1 }
 0x12d   : > { %v2359_v20 = vpop.f32.mrf.mxu0  ;;  %v2407_v22 = vpop.f32.mrf.mxu1 }
 0x12e   : > { %v2360_v23 = vadd.f32 %v2359_v20, %v2358_v17  ;;  %v2408_v24 = vadd.f32 %v2407_v22, %v2406_v18  ;;  %v541_v17 = vld [vmem:[#allocation2 + $0x70] sm:$0xff] }
 0x12f   : > { %v2361_v25 = vpop.f32.mrf.mxu0  ;;  %v2409_v26 = vpop.f32.mrf.mxu1 }
 0x130   : > { %v1036_v27 = vadd.f32 %v2360_v23, %v519_v19  ;;  %v1052_v28 = vadd.f32 %v2408_v24, %v535_v21 }
 0x131   : > { %v2362_v30 = vpop.f32.mrf.mxu0  ;;  %v2410_v32 = vpop.f32.mrf.mxu1 }
 0x132   : > { %1068 = vst [vmem:[#allocation2 + $0xb0] sm:$0xff] %v1036_v27  ;;  %1084 = vst [vmem:[#allocation2 + $0x38] sm:$0xff] %v1052_v28  ;;  %v2363_v33 = vadd.f32 %v2362_v30, %v2361_v25  ;;  %v2411_v34 = vadd.f32 %v2410_v32, %v2409_v26  ;;  %v526_v25 = vld [vmem:[#allocation2 + $0x48] sm:$0xff]  ;;  %v542_v27 = vld [vmem:[#allocation2 + $0xc0] sm:$0xff] }
 0x133   : > { %v2364_v35 = vpop.f32.mrf.mxu0  ;;  %v2412_v36 = vpop.f32.mrf.mxu1 }
 0x134   : > { %v1037_v37 = vadd.f32 %v2363_v33, %v520_v29  ;;  %v1053_v38 = vadd.f32 %v2411_v34, %v536_v31 }
 0x135   : > { %v2365_v40 = vpop.f32.mrf.mxu0  ;;  %v2413_v42 = vpop.f32.mrf.mxu1 }
 0x136   : > { %1069 = vst [vmem:[#allocation2] sm:$0xff] %v1037_v37  ;;  %1085 = vst [vmem:[#allocation2 + $0x58] sm:$0xff] %v1053_v38  ;;  %v2366_v43 = vadd.f32 %v2365_v40, %v2364_v35  ;;  %v2414_v44 = vadd.f32 %v2413_v42, %v2412_v36  ;;  %v527_v35 = vld [vmem:[#allocation2 + $0x80] sm:$0xff]  ;;  %v543_v37 = vld [vmem:[#allocation2 + $0xa8] sm:$0xff] }
 0x137   : > { %v2367_v45 = vpop.f32.mrf.mxu0  ;;  %v2415_v46 = vpop.f32.mrf.mxu1 }
 0x138   : > { %v1038_v47 = vadd.f32 %v2366_v43, %v521_v39  ;;  %v1054_v48 = vadd.f32 %v2414_v44, %v537_v41 }
 0x139   : > { %v2368_v50 = vpop.f32.mrf.mxu0  ;;  %v2416_v52 = vpop.f32.mrf.mxu1 }
 0x13a   : > { %1070 = vst [vmem:[#allocation2 + $0xd8] sm:$0xff] %v1038_v47  ;;  %1086 = vst [vmem:[#allocation2 + $0x40] sm:$0xff] %v1054_v48  ;;  %v2369_v53 = vadd.f32 %v2368_v50, %v2367_v45  ;;  %v2417_v54 = vadd.f32 %v2416_v52, %v2415_v46  ;;  %v528_v45 = vld [vmem:[#allocation2 + $0x88] sm:$0xff]  ;;  %v544_v47 = vld [vmem:[#allocation2 + $0xd0] sm:$0xff] }
 0x13b   : > { %v2370_v55 = vpop.f32.mrf.mxu0  ;;  %v2418_v56 = vpop.f32.mrf.mxu1 }
 0x13c   : > { %v1039_v57 = vadd.f32 %v2369_v53, %v522_v49  ;;  %v1055_v58 = vadd.f32 %v2417_v54, %v538_v51 }
 0x13d   : > { %v2371_v60 = vpop.f32.mrf.mxu0  ;;  %v2419_v62 = vpop.f32.mrf.mxu1 }
 0x13e   : > { %1071 = vst [vmem:[#allocation2 + $0x18] sm:$0xff] %v1039_v57  ;;  %1087 = vst [vmem:[#allocation2 + $0xc8] sm:$0xff] %v1055_v58  ;;  %v2372_v63 = vadd.f32 %v2371_v60, %v2370_v55  ;;  %v2420_v0 = vadd.f32 %v2419_v62, %v2418_v56  ;;  %v529_v55 = vld [vmem:[#allocation2 + $0xe8] sm:$0xff]  ;;  %v545_v57 = vld [vmem:[#allocation2 + $0x10] sm:$0xff] }
 0x13f   : > { %v2373_v1 = vpop.f32.mrf.mxu0  ;;  %v2421_v2 = vpop.f32.mrf.mxu1 }
 0x140   : > { %v1040_v3 = vadd.f32 %v2372_v63, %v523_v59  ;;  %v1056_v4 = vadd.f32 %v2420_v0, %v539_v61 }
 0x141   : > { %v2374_v6 = vpop.f32.mrf.mxu0  ;;  %v2422_v8 = vpop.f32.mrf.mxu1 }
 0x142   : > { %1072 = vst [vmem:[#allocation2 + $0x50] sm:$0xff] %v1040_v3  ;;  %1088 = vst [vmem:[#allocation2 + $0xe0] sm:$0xff] %v1056_v4  ;;  %v2375_v9 = vadd.f32 %v2374_v6, %v2373_v1  ;;  %v2423_v10 = vadd.f32 %v2422_v8, %v2421_v2  ;;  %v530_v1 = vld [vmem:[#allocation2 + $0xb8] sm:$0xff]  ;;  %v546_v3 = vld [vmem:[#allocation2 + $0x28] sm:$0xff] }
 0x143   : > { %v2376_v11 = vpop.f32.mrf.mxu0  ;;  %v2424_v12 = vpop.f32.mrf.mxu1 }
 0x144   : > { %v1041_v13 = vadd.f32 %v2375_v9, %v524_v5  ;;  %v1057_v14 = vadd.f32 %v2423_v10, %v540_v7 }
 0x145   : > { %v2377_v16 = vpop.f32.mrf.mxu0  ;;  %v2425_v18 = vpop.f32.mrf.mxu1 }
 0x146   : > { %1073 = vst [vmem:[#allocation2 + $0x68] sm:$0xff] %v1041_v13  ;;  %1089 = vst [vmem:[#allocation2 + $0x90] sm:$0xff] %v1057_v14  ;;  %v2378_v19 = vadd.f32 %v2377_v16, %v2376_v11  ;;  %v2426_v20 = vadd.f32 %v2425_v18, %v2424_v12  ;;  %v531_v11 = vld [vmem:[#allocation2 + $0x60] sm:$0xff] }
 0x147   : > { %v2379_v21 = vpop.f32.mrf.mxu0  ;;  %v2427_v22 = vpop.f32.mrf.mxu1  ;;  %v547_v13 = vld [vmem:[#allocation2 + $0xa0] sm:$0xff] }
 0x148   : > { %v1042_v23 = vadd.f32 %v2378_v19, %v525_v15  ;;  %v1058_v24 = vadd.f32 %v2426_v20, %v541_v17 }
 0x149   : > { %v2380_v26 = vpop.f32.mrf.mxu0  ;;  %v2428_v28 = vpop.f32.mrf.mxu1 }
 0x14a   : > { %1074 = vst [vmem:[#allocation2 + $0x30] sm:$0xff] %v1042_v23  ;;  %1090 = vst [vmem:[#allocation2 + $0x70] sm:$0xff] %v1058_v24  ;;  %v2381_v29 = vadd.f32 %v2380_v26, %v2379_v21  ;;  %v2429_v30 = vadd.f32 %v2428_v28, %v2427_v22  ;;  %v532_v21 = vld [vmem:[#allocation2 + $0xf0] sm:$0xff]  ;;  %v548_v23 = vld [vmem:[#allocation2 + $0xf8] sm:$0xff] }
 0x14b   : > { %v2382_v31 = vpop.f32.mrf.mxu0  ;;  %v2430_v32 = vpop.f32.mrf.mxu1 }
 0x14c   : > { %v1043_v33 = vadd.f32 %v2381_v29, %v526_v25  ;;  %v1059_v34 = vadd.f32 %v2429_v30, %v542_v27 }
 0x14d   : > { %v2383_v36 = vpop.f32.mrf.mxu0  ;;  %v2431_v38 = vpop.f32.mrf.mxu1 }
 0x14e   : > { %1075 = vst [vmem:[#allocation2 + $0x48] sm:$0xff] %v1043_v33  ;;  %1091 = vst [vmem:[#allocation2 + $0xc0] sm:$0xff] %v1059_v34  ;;  %v2384_v39 = vadd.f32 %v2383_v36, %v2382_v31  ;;  %v2432_v40 = vadd.f32 %v2431_v38, %v2430_v32  ;;  %v533_v31 = vld [vmem:[#allocation2 + $0x8] sm:$0xff]  ;;  %v549_v33 = vld [vmem:[#allocation2 + $0x20] sm:$0xff] }
 0x14f   : > { %v2385_v41 = vpop.f32.mrf.mxu0  ;;  %v2433_v42 = vpop.f32.mrf.mxu1 }
 0x150   : > { %v1044_v43 = vadd.f32 %v2384_v39, %v527_v35  ;;  %v1060_v44 = vadd.f32 %v2432_v40, %v543_v37 }
 0x151   : > { %v2386_v46 = vpop.f32.mrf.mxu0  ;;  %v2434_v48 = vpop.f32.mrf.mxu1 }
 0x152   : > { %1076 = vst [vmem:[#allocation2 + $0x80] sm:$0xff] %v1044_v43  ;;  %1092 = vst [vmem:[#allocation2 + $0xa8] sm:$0xff] %v1060_v44  ;;  %v2387_v49 = vadd.f32 %v2386_v46, %v2385_v41  ;;  %v2435_v50 = vadd.f32 %v2434_v48, %v2433_v42  ;;  %v534_v41 = vld [vmem:[#allocation2 + $0x78] sm:$0xff] }
 0x153   : > { %v2388_v51 = vpop.f32.mrf.mxu0  ;;  %v2436_v52 = vpop.f32.mrf.mxu1  ;;  %v550_v43 = vld [vmem:[#allocation2 + $0x98] sm:$0xff] }
 0x154   : > { %v1045_v53 = vadd.f32 %v2387_v49, %v528_v45  ;;  %v1061_v54 = vadd.f32 %v2435_v50, %v544_v47 }
 0x155   : > { %v2389_v56 = vpop.f32.mrf.mxu0  ;;  %v2437_v58 = vpop.f32.mrf.mxu1 }
 0x156   : > { %1077 = vst [vmem:[#allocation2 + $0x88] sm:$0xff] %v1045_v53  ;;  %1093 = vst [vmem:[#allocation2 + $0xd0] sm:$0xff] %v1061_v54  ;;  %v2390_v59 = vadd.f32 %v2389_v56, %v2388_v51  ;;  %v2438_v60 = vadd.f32 %v2437_v58, %v2436_v52 }
 0x157   : > { %v2391_v61 = vpop.f32.mrf.mxu0  ;;  %v2439_v62 = vpop.f32.mrf.mxu1 }
 0x158   : > { %v1046_v63 = vadd.f32 %v2390_v59, %v529_v55  ;;  %v1062_v0 = vadd.f32 %v2438_v60, %v545_v57 }
 0x159   : > { %v2392_v2 = vpop.f32.mrf.mxu0  ;;  %v2440_v4 = vpop.f32.mrf.mxu1 }
 0x15a   : > { %1078 = vst [vmem:[#allocation2 + $0xe8] sm:$0xff] %v1046_v63  ;;  %1094 = vst [vmem:[#allocation2 + $0x10] sm:$0xff] %v1062_v0  ;;  %v2393_v5 = vadd.f32 %v2392_v2, %v2391_v61  ;;  %v2441_v6 = vadd.f32 %v2440_v4, %v2439_v62 }
 0x15b   : > { %v2394_v7 = vpop.f32.mrf.mxu0  ;;  %v2442_v8 = vpop.f32.mrf.mxu1 }
 0x15c   : > { %v1047_v9 = vadd.f32 %v2393_v5, %v530_v1  ;;  %v1063_v10 = vadd.f32 %v2441_v6, %v546_v3 }
 0x15d   : > { %v2395_v12 = vpop.f32.mrf.mxu0  ;;  %v2443_v14 = vpop.f32.mrf.mxu1 }
 0x15e   : > { %1079 = vst [vmem:[#allocation2 + $0xb8] sm:$0xff] %v1047_v9  ;;  %1095 = vst [vmem:[#allocation2 + $0x28] sm:$0xff] %v1063_v10  ;;  %v2396_v15 = vadd.f32 %v2395_v12, %v2394_v7  ;;  %v2444_v16 = vadd.f32 %v2443_v14, %v2442_v8 }
 0x15f   : > { %v2397_v17 = vpop.f32.mrf.mxu0  ;;  %v2445_v18 = vpop.f32.mrf.mxu1 }
 0x160   : > { %v1048_v19 = vadd.f32 %v2396_v15, %v531_v11  ;;  %v1064_v20 = vadd.f32 %v2444_v16, %v547_v13 }
 0x161   : > { %v2398_v22 = vpop.f32.mrf.mxu0  ;;  %v2446_v24 = vpop.f32.mrf.mxu1 }
 0x162   : > { %1080 = vst [vmem:[#allocation2 + $0x60] sm:$0xff] %v1048_v19  ;;  %1096 = vst [vmem:[#allocation2 + $0xa0] sm:$0xff] %v1064_v20  ;;  %v2399_v25 = vadd.f32 %v2398_v22, %v2397_v17  ;;  %v2447_v26 = vadd.f32 %v2446_v24, %v2445_v18 }
 0x163   : > { %v2400_v27 = vpop.f32.mrf.mxu0  ;;  %v2448_v28 = vpop.f32.mrf.mxu1 }
 0x164   : > { %v1049_v29 = vadd.f32 %v2399_v25, %v532_v21  ;;  %v1065_v30 = vadd.f32 %v2447_v26, %v548_v23 }
 0x165   : > { %v2401_v32 = vpop.f32.mrf.mxu0  ;;  %v2449_v34 = vpop.f32.mrf.mxu1 }
 0x166   : > { %1081 = vst [vmem:[#allocation2 + $0xf0] sm:$0xff] %v1049_v29  ;;  %1097 = vst [vmem:[#allocation2 + $0xf8] sm:$0xff] %v1065_v30  ;;  %v2402_v35 = vadd.f32 %v2401_v32, %v2400_v27  ;;  %v2450_v36 = vadd.f32 %v2449_v34, %v2448_v28 }
 0x167   : > { %v2403_v37 = vpop.f32.mrf.mxu0  ;;  %v2451_v38 = vpop.f32.mrf.mxu1 }
 0x168   : > { %v1050_v39 = vadd.f32 %v2402_v35, %v533_v31  ;;  %v1066_v40 = vadd.f32 %v2450_v36, %v549_v33 }
 0x169   : > { %v2404_v42 = vpop.f32.mrf.mxu0  ;;  %v2452_v44 = vpop.f32.mrf.mxu1 }
 0x16a   : > { %1082 = vst [vmem:[#allocation2 + $0x8] sm:$0xff] %v1050_v39  ;;  %1098 = vst [vmem:[#allocation2 + $0x20] sm:$0xff] %v1066_v40  ;;  %v2405_v45 = vadd.f32 %v2404_v42, %v2403_v37  ;;  %v2453_v46 = vadd.f32 %v2452_v44, %v2451_v38  ;;  %1103 = sbr.rel (%p2272_p12) target bundleno = 1002 (0x3ea), region = 94 }
 0x16c   : > { %v1051_v47 = vadd.f32 %v2405_v45, %v534_v41  ;;  %v1067_v48 = vadd.f32 %v2453_v46, %v550_v43 }
 0x16e   : > { %1083 = vst [vmem:[#allocation2 + $0x78] sm:$0xff] %v1051_v47  ;;  %1099 = vst [vmem:[#allocation2 + $0x98] sm:$0xff] %v1067_v48 }
 0x16f   : > { %v1138_v49 = vld [vmem:[%s3115_s18 + $0x10] sm:$0xff]  ;;  %v1136_v50 = vld [vmem:[%s3115_s18] sm:$0xff]  ;;  %v2939_v51 = vmov 0   ;;  %v1139_v52 = vld [vmem:[%s3115_s18 + $0x18] sm:$0xff] }
 0x170   : > { %2737 = vset.pattern.permute.xlu1 %v2939_v51  ;;  %2736 = vset.pattern.permute.xlu0 %v2939_v51  ;;  %v1137_v53 = vld [vmem:[%s3115_s18 + $0x8] sm:$0xff]  ;;  %v1140_v55 = vld [vmem:[%s3115_s18 + $0x20] sm:$0xff]  ;;  %v1143_v56 = vld [vmem:[%s3115_s18 + $0x38] sm:$0xff] }
 0x171   : > { %1180 = vperm.xlu1 %2737, %v1138_v49   ;;  %1170 = vperm.xlu0 %2736, %v1136_v50   ;;  %v1141_v54 = vld [vmem:[%s3115_s18 + $0x28] sm:$0xff]  ;;  %v1142_v57 = vld [vmem:[%s3115_s18 + $0x30] sm:$0xff]  ;;  %v2738_v58 = vld [vmem:[%s3427_s2 + $0x38] sm:$0xff]  }
 0x172   : > { %v1145_v59 = vld [vmem:[%s3115_s18 + $0x48] sm:$0xff]  ;;  %v1144_v60 = vld [vmem:[%s3115_s18 + $0x40] sm:$0xff]  ;;  %2502 = vmatprep.subr.bf16.mxu0 %v2738_v58  ;;  %v2739_v61 = vld [vmem:[%s3427_s2 + $0x30] sm:$0xff]  }
 0x173   : > { %2503 = vmatpush3.bf16.msra.mxu0 %v2738_v58  ;;  %v1147_v62 = vld [vmem:[%s3115_s18 + $0x58] sm:$0xff]  ;;  %v1146_v63 = vld [vmem:[%s3115_s18 + $0x50] sm:$0xff]  ;;  %v2740_v0 = vld [vmem:[%s3427_s2 + $0x28] sm:$0xff]  }
 0x174   : > { %2504 = vmatprep.subr.bf16.mxu0 %v2739_v61  ;;  %v1149_v1 = vld [vmem:[%s3115_s18 + $0x68] sm:$0xff]  ;;  %v1148_v2 = vld [vmem:[%s3115_s18 + $0x60] sm:$0xff]  ;;  %v1151_v4 = vld [vmem:[%s3115_s18 + $0x78] sm:$0xff] }
 0x175   : > { %1185 = vperm.xlu1 %2737, %v1139_v52   ;;  %1175 = vperm.xlu0 %2736, %v1137_v53   ;;  %v2741_v3 = vld [vmem:[%s3427_s2 + $0x20] sm:$0xff]   ;;  %v2742_v5 = vld [vmem:[%s3427_s2 + $0x18] sm:$0xff]   ;;  %v1150_v6 = vld [vmem:[%s3115_s18 + $0x70] sm:$0xff] }
 0x176   : > { %v2743_v7 = vld [vmem:[%s3427_s2 + $0x10] sm:$0xff]   ;;  %v1153_v8 = vld [vmem:[%s3115_s18 + $0x88] sm:$0xff]  ;;  %v1152_v9 = vld [vmem:[%s3115_s18 + $0x80] sm:$0xff] }
 0x177   : > { %2505 = vmatpush3.bf16.msra.mxu0 %v2739_v61  ;;  %v2744_v10 = vld [vmem:[%s3427_s2 + $0x8] sm:$0xff]   ;;  %v1155_v11 = vld [vmem:[%s3115_s18 + $0x98] sm:$0xff]  ;;  %v1154_v12 = vld [vmem:[%s3115_s18 + $0x90] sm:$0xff] }
 0x178   : > { %2506 = vmatprep.subr.bf16.mxu0 %v2740_v0  ;;  %v2745_v13 = vld [vmem:[%s3427_s2] sm:$0xff]   ;;  %v1157_v14 = vld [vmem:[%s3115_s18 + $0xa8] sm:$0xff]  ;;  %v1159_v16 = vld [vmem:[%s3115_s18 + $0xb8] sm:$0xff] }
 0x179   : > { %1195 = vperm.xlu1 %2737, %v1141_v54   ;;  %1190 = vperm.xlu0 %2736, %v1140_v55   ;;  %v1156_v15 = vld [vmem:[%s3115_s18 + $0xa0] sm:$0xff]  ;;  %v1158_v17 = vld [vmem:[%s3115_s18 + $0xb0] sm:$0xff]  ;;  %v1161_v18 = vld [vmem:[%s3115_s18 + $0xc8] sm:$0xff] }
 0x17a   : > { %v1160_v19 = vld [vmem:[%s3115_s18 + $0xc0] sm:$0xff]  ;;  %v1163_v20 = vld [vmem:[%s3115_s18 + $0xd8] sm:$0xff]  ;;  %v1162_v21 = vld [vmem:[%s3115_s18 + $0xd0] sm:$0xff] }
 0x17b   : > { %2507 = vmatpush3.bf16.msra.mxu0 %v2740_v0  ;;  %v1165_v22 = vld [vmem:[%s3115_s18 + $0xe8] sm:$0xff]  ;;  %v1164_v23 = vld [vmem:[%s3115_s18 + $0xe0] sm:$0xff]  ;;  %v1167_v24 = vld [vmem:[%s3115_s18 + $0xf8] sm:$0xff] }
 0x17c   : > { %2508 = vmatprep.subr.bf16.mxu0 %v2741_v3  ;;  %v1166_v25 = vld [vmem:[%s3115_s18 + $0xf0] sm:$0xff]  ;;  %v2746_v26 = vld [vmem:[%s3429_s4 + $0x38] sm:$0xff]   ;;  %v2748_v28 = vld [vmem:[%s3429_s4 + $0x28] sm:$0xff]  }
 0x17d   : > { %1205 = vperm.xlu1 %2737, %v1143_v56   ;;  %1200 = vperm.xlu0 %2736, %v1142_v57   ;;  %v2747_v27 = vld [vmem:[%s3429_s4 + $0x30] sm:$0xff]   ;;  %v2749_v29 = vld [vmem:[%s3429_s4 + $0x20] sm:$0xff]   ;;  %v2750_v30 = vld [vmem:[%s3429_s4 + $0x18] sm:$0xff]  }
 0x17e   : > { %2550 = vmatprep.subr.bf16.mxu1 %v2746_v26  ;;  %v1106_v31 = vld [vmem:[#allocation2 + $0xd8] sm:$0xff]  ;;  %v1104_v32 = vld [vmem:[#allocation2 + $0xb0] sm:$0xff]  ;;  %v1105_v38 = vld [vmem:[#allocation2] sm:$0xff] }
 0x17f   : > { %2509 = vmatpush3.bf16.msra.mxu0 %v2741_v3  ;;  %2551 = vmatpush3.bf16.msra.mxu1 %v2746_v26  ;;  %v1107_v37 = vld [vmem:[#allocation2 + $0x18] sm:$0xff]  ;;  %v1109_v47 = vld [vmem:[#allocation2 + $0x68] sm:$0xff]  ;;  %v1108_v48 = vld [vmem:[#allocation2 + $0x50] sm:$0xff] }
 0x180   : > { %2510 = vmatprep.subr.bf16.mxu0 %v2742_v5  ;;  %2552 = vmatprep.subr.bf16.mxu1 %v2747_v27  ;;  %v1111_v57 = vld [vmem:[#allocation2 + $0x48] sm:$0xff]  ;;  %v1110_v58 = vld [vmem:[#allocation2 + $0x30] sm:$0xff] }
 0x181   : > { %1215 = vperm.xlu1 %2737, %v1145_v59   ;;  %1210 = vperm.xlu0 %2736, %v1144_v60   ;;  %v1113_v3 = vld [vmem:[#allocation2 + $0x88] sm:$0xff] }
 0x183   : > { %2511 = vmatpush3.bf16.msra.mxu0 %v2742_v5  ;;  %2553 = vmatpush3.bf16.msra.mxu1 %v2747_v27  ;;  %v1117_v27 = vld [vmem:[#allocation2 + $0xf0] sm:$0xff] }
 0x184   : > { %2512 = vmatprep.subr.bf16.mxu0 %v2743_v7  ;;  %2554 = vmatprep.subr.bf16.mxu1 %v2748_v28 }
 0x185   : > { %1225 = vperm.xlu1 %2737, %v1147_v62   ;;  %1220 = vperm.xlu0 %2736, %v1146_v63  }
 0x187   : > { %2513 = vmatpush3.bf16.msra.mxu0 %v2743_v7  ;;  %2555 = vmatpush3.bf16.msra.mxu1 %v2748_v28 }
 0x188   : > { %2514 = vmatprep.subr.bf16.mxu0 %v2744_v10  ;;  %2556 = vmatprep.subr.bf16.mxu1 %v2749_v29 }
 0x189   : > { %1235 = vperm.xlu1 %2737, %v1149_v1   ;;  %1230 = vperm.xlu0 %2736, %v1148_v2  }
 0x18b   : > { %2515 = vmatpush3.bf16.msra.mxu0 %v2744_v10  ;;  %2557 = vmatpush3.bf16.msra.mxu1 %v2749_v29  ;;  %v1116_v29 = vld [vmem:[#allocation2 + $0x60] sm:$0xff] }
 0x18c   : > { %2516 = vmatprep.subr.bf16.mxu0 %v2745_v13  ;;  %2558 = vmatprep.subr.bf16.mxu1 %v2750_v30 }
 0x18d   : > { %1245 = vperm.xlu1 %2737, %v1151_v4   ;;  %1240 = vperm.xlu0 %2736, %v1150_v6   ;;  %v1112_v4 = vld [vmem:[#allocation2 + $0x80] sm:$0xff] }
 0x18f   : > { %2517 = vmatpush3.bf16.msra.mxu0 %v2745_v13  ;;  %2559 = vmatpush3.bf16.msra.mxu1 %v2750_v30  ;;  %v1115_v13 = vld [vmem:[#allocation2 + $0xb8] sm:$0xff] }
 0x191   : > { %1255 = vperm.xlu1 %2737, %v1153_v8   ;;  %1250 = vperm.xlu0 %2736, %v1152_v9  }
 0x195   : > { %1265 = vperm.xlu1 %2737, %v1155_v11   ;;  %1260 = vperm.xlu0 %2736, %v1154_v12  }
 0x199   : > { %1275 = vperm.xlu1 %2737, %v1157_v14   ;;  %1270 = vperm.xlu0 %2736, %v1156_v15  }
 0x19d   : > { %1285 = vperm.xlu1 %2737, %v1159_v16   ;;  %1280 = vperm.xlu0 %2736, %v1158_v17   ;;  %v1114_v16 = vld [vmem:[#allocation2 + $0xe8] sm:$0xff] }
 0x1a1   : > { %1295 = vperm.xlu1 %2737, %v1161_v18   ;;  %1290 = vperm.xlu0 %2736, %v1160_v19  }
 0x1a5   : > { %1305 = vperm.xlu1 %2737, %v1163_v20   ;;  %1300 = vperm.xlu0 %2736, %v1162_v21  }
 0x1a9   : > { %1315 = vperm.xlu1 %2737, %v1165_v22   ;;  %1310 = vperm.xlu0 %2736, %v1164_v23  }
 0x1ad   : > { %1325 = vperm.xlu1 %2737, %v1167_v24   ;;  %1320 = vperm.xlu0 %2736, %v1166_v25  }
 0x1ec   : > { %v1181_v33 = vpop.permute.xlu1 %1180  ;;  %v1171_v34 = vpop.permute.xlu0 %1170 }
 0x1ed   : > { %v1330_v35 = vmul.f32 %v1181_v33, %v1106_v31  ;;  %v1328_v36 = vmul.f32 %v1171_v34, %v1104_v32 }
 0x1ef   : > { %v1362_v39 = vsub.f32 0.0, %v1330_v35  ;;  %v1360_v40 = vsub.f32 0.0, %v1328_v36 }
 0x1f0   : > { %v1186_v41 = vpop.permute.xlu1 %1185  ;;  %v1176_v42 = vpop.permute.xlu0 %1175 }
 0x1f1   : > { %v1396_v43 = vmul.f32 1.442695, %v1362_v39  ;;  %v1392_v44 = vmul.f32 1.442695, %v1360_v40  ;;  %v1331_v45 = vmul.f32 %v1186_v41, %v1107_v37  ;;  %v1329_v46 = vmul.f32 %v1176_v42, %v1105_v38  ;;  %v1119_v41 = vld [vmem:[#allocation2 + $0x78] sm:$0xff] }
 0x1f3   : > { %2754 = vpow2.f32 %v1396_v43  ;;  %v1363_v49 = vsub.f32 0.0, %v1331_v45  ;;  %v1361_v50 = vsub.f32 0.0, %v1329_v46  ;;  %v1118_v43 = vld [vmem:[#allocation2 + $0x8] sm:$0xff] }
 0x1f4   : > { %2756 = vpow2.f32 %v1392_v44  ;;  %v1196_v51 = vpop.permute.xlu1 %1195  ;;  %v1191_v52 = vpop.permute.xlu0 %1190 }
 0x1f5   : > { %v1398_v53 = vmul.f32 1.442695, %v1363_v49  ;;  %v1394_v54 = vmul.f32 1.442695, %v1361_v50  ;;  %v1333_v55 = vmul.f32 %v1196_v51, %v1109_v47  ;;  %v1332_v56 = vmul.f32 %v1191_v52, %v1108_v48 }
 0x1f6   : > { %v1520_v48 = vlaneseq }
 0x1f7   : > { %2758 = vpow2.f32 %v1398_v53  ;;  %v1365_v59 = vsub.f32 0.0, %v1333_v55  ;;  %v1364_v60 = vsub.f32 0.0, %v1332_v56  ;;  %v1121_v56 = vld [vmem:[#allocation2 + $0x58] sm:$0xff] }
 0x1f8   : > { %2760 = vpow2.f32 %v1394_v54  ;;  %v1206_v61 = vpop.permute.xlu1 %1205  ;;  %v1201_v62 = vpop.permute.xlu0 %1200 }
 0x1f9   : > { %v1402_v63 = vmul.f32 1.442695, %v1365_v59  ;;  %v1400_v0 = vmul.f32 1.442695, %v1364_v60  ;;  %v1335_v1 = vmul.f32 %v1206_v61, %v1111_v57  ;;  %v1334_v2 = vmul.f32 %v1201_v62, %v1110_v58  ;;  %v1120_v58 = vld [vmem:[#allocation2 + $0x38] sm:$0xff] }
 0x1fb   : > { %2762 = vpow2.f32 %v1402_v63  ;;  %v1367_v5 = vsub.f32 0.0, %v1335_v1  ;;  %v1366_v6 = vsub.f32 0.0, %v1334_v2  ;;  %v1521_v63 = vand.u32 127, %v1520_v48 }
 0x1fc   : > { %2764 = vpow2.f32 %v1400_v0  ;;  %v1216_v7 = vpop.permute.xlu1 %1215  ;;  %v1211_v8 = vpop.permute.xlu0 %1210 }
 0x1fd   : > { %v1406_v9 = vmul.f32 1.442695, %v1367_v5  ;;  %v1404_v10 = vmul.f32 1.442695, %v1366_v6  ;;  %v1337_v11 = vmul.f32 %v1216_v7, %v1113_v3  ;;  %v1336_v12 = vmul.f32 %v1211_v8, %v1112_v4  ;;  %v1123_v7 = vld [vmem:[#allocation2 + $0xc8] sm:$0xff]  ;;  %v1122_v8 = vld [vmem:[#allocation2 + $0x40] sm:$0xff] }
 0x1fe   : > { %vm1522_vm0 = vcmp.lt.s32.totalorder %v1521_v63, 32 }
 0x1ff   : > { %2766 = vpow2.f32 %v1406_v9  ;;  %v1369_v14 = vsub.f32 0.0, %v1337_v11  ;;  %v1368_v15 = vsub.f32 0.0, %v1336_v12  ;;  %vm3253_vm1 = vmpackc.low %vm1522_vm0, %vm1522_vm0 }
 0x200   : > { %v2755_v17 = vpop.eup %2754  ;;  %2768 = vpow2.f32 %v1404_v10  ;;  %v1226_v18 = vpop.permute.xlu1 %1225 }
 0x201   : > { %v1221_v19 = vpop.permute.xlu0 %1220  ;;  %v2757_v20 = vpop.eup %2756  ;;  %v1458_v21 = vadd.f32 1.0, %v2755_v17  ;;  %v1410_v22 = vmul.f32 1.442695, %v1369_v14  ;;  %v1339_v23 = vmul.f32 %v1226_v18, %v1115_v13  ;;  %v1408_v25 = vmul.f32 1.442695, %v1368_v15 }
 0x202   : > { %v1456_v24 = vadd.f32 1.0, %v2757_v20  ;;  %v1338_v26 = vmul.f32 %v1221_v19, %v1114_v16  ;;  %v1125_v20 = vld [vmem:[#allocation2 + $0x90] sm:$0xff] }
 0x203   : > { %2770 = vrcp.f32 %v1458_v21  ;;  %v1371_v28 = vsub.f32 0.0, %v1339_v23 }
 0x204   : > { %v2759_v30 = vpop.eup %2758  ;;  %2772 = vrcp.f32 %v1456_v24  ;;  %v1370_v31 = vsub.f32 0.0, %v1338_v26  ;;  %v1236_v32 = vpop.permute.xlu1 %1235 }
 0x205   : > { %v1231_v33 = vpop.permute.xlu0 %1230  ;;  %v2761_v34 = vpop.eup %2760  ;;  %v1459_v35 = vadd.f32 1.0, %v2759_v30  ;;  %2774 = vpow2.f32 %v1410_v22  ;;  %v1414_v36 = vmul.f32 1.442695, %v1371_v28  ;;  %v1341_v37 = vmul.f32 %v1236_v32, %v1117_v27 }
 0x206   : > { %v1457_v38 = vadd.f32 1.0, %v2761_v34  ;;  %2776 = vpow2.f32 %v1408_v25  ;;  %v1412_v39 = vmul.f32 1.442695, %v1370_v31  ;;  %v1340_v40 = vmul.f32 %v1231_v33, %v1116_v29  ;;  %v1124_v25 = vld [vmem:[#allocation2 + $0xe0] sm:$0xff] }
 0x207   : > { %2778 = vrcp.f32 %v1459_v35  ;;  %v1373_v42 = vsub.f32 0.0, %v1341_v37 }
 0x208   : > { %v2763_v44 = vpop.eup %2762  ;;  %2780 = vrcp.f32 %v1457_v38  ;;  %v1372_v45 = vsub.f32 0.0, %v1340_v40  ;;  %v1246_v46 = vpop.permute.xlu1 %1245  ;;  %v1127_v38 = vld [vmem:[#allocation2 + $0xc0] sm:$0xff] }
 0x209   : > { %v1241_v47 = vpop.permute.xlu0 %1240  ;;  %v2765_v49 = vpop.eup %2764  ;;  %v1461_v50 = vadd.f32 1.0, %v2763_v44  ;;  %2782 = vpow2.f32 %v1414_v36  ;;  %v1418_v51 = vmul.f32 1.442695, %v1373_v42  ;;  %v1343_v52 = vmul.f32 %v1246_v46, %v1119_v41 }
 0x20a   : > { %v1460_v53 = vadd.f32 1.0, %v2765_v49  ;;  %2784 = vpow2.f32 %v1412_v39  ;;  %v1416_v54 = vmul.f32 1.442695, %v1372_v45  ;;  %v1342_v55 = vmul.f32 %v1241_v47, %v1118_v43  ;;  %v1126_v39 = vld [vmem:[#allocation2 + $0x70] sm:$0xff] }
 0x20b   : > { %2786 = vrcp.f32 %v1461_v50  ;;  %v1375_v57 = vsub.f32 0.0, %v1343_v52 }
 0x20c   : > { %v2767_v59 = vpop.eup %2766  ;;  %2788 = vrcp.f32 %v1460_v53  ;;  %v1374_v60 = vsub.f32 0.0, %v1342_v55  ;;  %v1256_v61 = vpop.permute.xlu1 %1255 }
 0x20d   : > { %v1251_v62 = vpop.permute.xlu0 %1250  ;;  %v2769_v0 = vpop.eup %2768  ;;  %v1463_v1 = vadd.f32 1.0, %v2767_v59  ;;  %2790 = vpow2.f32 %v1418_v51  ;;  %v1422_v2 = vmul.f32 1.442695, %v1375_v57  ;;  %v1345_v3 = vmul.f32 %v1256_v61, %v1121_v56  ;;  %v1129_v56 = vld [vmem:[#allocation2 + $0xd0] sm:$0xff]  ;;  %v1128_v61 = vld [vmem:[#allocation2 + $0xa8] sm:$0xff] }
 0x20e   : > { %v1462_v4 = vadd.f32 1.0, %v2769_v0  ;;  %2792 = vpow2.f32 %v1416_v54  ;;  %v1420_v5 = vmul.f32 1.442695, %v1374_v60  ;;  %v1344_v6 = vmul.f32 %v1251_v62, %v1120_v58 }
 0x20f   : > { %2794 = vrcp.f32 %v1463_v1  ;;  %v1377_v9 = vsub.f32 0.0, %v1345_v3 }
 0x210   : > { %v2771_v10 = vpop.eup %2770  ;;  %2796 = vrcp.f32 %v1462_v4  ;;  %v1376_v11 = vsub.f32 0.0, %v1344_v6  ;;  %v1266_v12 = vpop.permute.xlu1 %1265 }
 0x211   : > { %v1261_v13 = vpop.permute.xlu0 %1260  ;;  %v2773_v14 = vpop.eup %2772  ;;  %2798 = vpow2.f32 %v1422_v2  ;;  %v1426_v15 = vmul.f32 1.442695, %v1377_v9  ;;  %v1347_v16 = vmul.f32 %v1266_v12, %v1123_v7 }
 0x212   : > { %v1346_v17 = vmul.f32 %v1261_v13, %v1122_v8  ;;  %v2775_v18 = vpop.eup %2774  ;;  %2800 = vpow2.f32 %v1420_v5  ;;  %v1424_v19 = vmul.f32 1.442695, %v1376_v11  ;;  %v1131_v8 = vld [vmem:[#allocation2 + $0x28] sm:$0xff]  ;;  %v1130_v13 = vld [vmem:[#allocation2 + $0x10] sm:$0xff] }
 0x213   : > { %v2777_v21 = vpop.eup %2776  ;;  %v1465_v22 = vadd.f32 1.0, %v2775_v18  ;;  %2802 = vpow2.f32 %v1426_v15  ;;  %v1379_v23 = vsub.f32 0.0, %v1347_v16 }
 0x214   : > { %v1378_v24 = vsub.f32 0.0, %v1346_v17  ;;  %v2779_v26 = vpop.eup %2778  ;;  %v1464_v27 = vadd.f32 1.0, %v2777_v21  ;;  %2804 = vpow2.f32 %v1424_v19  ;;  %v1276_v28 = vpop.permute.xlu1 %1275 }
 0x215   : > { %v1271_v29 = vpop.permute.xlu0 %1270  ;;  %v2781_v30 = vpop.eup %2780  ;;  %2806 = vrcp.f32 %v1465_v22  ;;  %v1430_v31 = vmul.f32 1.442695, %v1379_v23  ;;  %v1349_v33 = vmul.f32 %v1276_v28, %v1125_v20  ;;  %v2286_v40 = vpack.c.bf16 %v2779_v26, %v2771_v10 }
 0x216   : > { %v1428_v32 = vmul.f32 1.442695, %v1378_v24  ;;  %v2783_v35 = vpop.eup %2782  ;;  %2808 = vrcp.f32 %v1464_v27  ;;  %v1348_v36 = vmul.f32 %v1271_v29, %v1124_v25  ;;  %v2283_v37 = vpack.c.bf16 %v2781_v30, %v2773_v14  ;;  %v1133_v27 = vld [vmem:[#allocation2 + $0xf8] sm:$0xff]  ;;  %v1132_v30 = vld [vmem:[#allocation2 + $0xa0] sm:$0xff] }
 0x217   : > { %v2785_v41 = vpop.eup %2784  ;;  %v1467_v42 = vadd.f32 1.0, %v2783_v35  ;;  %2810 = vpow2.f32 %v1430_v31  ;;  %v1381_v43 = vsub.f32 0.0, %v1349_v33 }
 0x218   : > { %v2787_v44 = vpop.eup %2786  ;;  %v1466_v45 = vadd.f32 1.0, %v2785_v41  ;;  %2812 = vpow2.f32 %v1428_v32  ;;  %v1380_v46 = vsub.f32 0.0, %v1348_v36  ;;  %2518 = vmatprep.mubr.msk.bf16.mxu0 %vm3253_vm1, %v2283_v37  ;;  %v1286_v47 = vpop.permute.xlu1 %1285 }
 0x219   : > { %v1281_v48 = vpop.permute.xlu0 %1280  ;;  %v2789_v49 = vpop.eup %2788  ;;  %2814 = vrcp.f32 %v1467_v42  ;;  %v1434_v50 = vmul.f32 1.442695, %v1381_v43  ;;  %v1351_v51 = vmul.f32 %v1286_v47, %v1127_v38  ;;  %2519 = vmatmul.mubr.msk.bf16.vlgmr.msra.gmra.mxu0 %vm3253_vm1, %v2286_v40 }
 0x21a   : > { %v1350_v52 = vmul.f32 %v1281_v48, %v1126_v39  ;;  %v2791_v53 = vpop.eup %2790  ;;  %2816 = vrcp.f32 %v1466_v45  ;;  %v1432_v54 = vmul.f32 1.442695, %v1380_v46  ;;  %v2289_v55 = vpack.c.bf16 %v2787_v44, %v2789_v49  ;;  %v1135_v45 = vld [vmem:[#allocation2 + $0x98] sm:$0xff]  ;;  %v1134_v48 = vld [vmem:[#allocation2 + $0x20] sm:$0xff] }
 0x21b   : > { %v2793_v57 = vpop.eup %2792  ;;  %v1469_v58 = vadd.f32 1.0, %v2791_v53  ;;  %2818 = vpow2.f32 %v1434_v50  ;;  %v1383_v59 = vsub.f32 0.0, %v1351_v51 }
 0x21c   : > { %v1382_v60 = vsub.f32 0.0, %v1350_v52  ;;  %v2795_v62 = vpop.eup %2794  ;;  %v1468_v63 = vadd.f32 1.0, %v2793_v57  ;;  %2820 = vpow2.f32 %v1432_v54  ;;  %2522 = vmatprep.mubr.msk.bf16.mxu0 %vm3253_vm1, %v2289_v55  ;;  %v1296_v0 = vpop.permute.xlu1 %1295 }
 0x21d   : > { %v1291_v1 = vpop.permute.xlu0 %1290  ;;  %v2797_v2 = vpop.eup %2796  ;;  %2822 = vrcp.f32 %v1469_v58  ;;  %v1438_v3 = vmul.f32 1.442695, %v1383_v59  ;;  %v1353_v5 = vmul.f32 %v1296_v0, %v1129_v56 }
 0x21e   : > { %v1436_v4 = vmul.f32 1.442695, %v1382_v60  ;;  %v2799_v6 = vpop.eup %2798  ;;  %2824 = vrcp.f32 %v1468_v63  ;;  %v1352_v7 = vmul.f32 %v1291_v1, %v1128_v61  ;;  %v2292_v9 = vpack.c.bf16 %v2795_v62, %v2797_v2 }
 0x21f   : > { %v2801_v10 = vpop.eup %2800  ;;  %v1471_v11 = vadd.f32 1.0, %v2799_v6  ;;  %2826 = vpow2.f32 %v1438_v3  ;;  %v1385_v12 = vsub.f32 0.0, %v1353_v5 }
 0x220   : > { %v2803_v14 = vpop.eup %2802  ;;  %v1470_v15 = vadd.f32 1.0, %v2801_v10  ;;  %2828 = vpow2.f32 %v1436_v4  ;;  %v1384_v16 = vsub.f32 0.0, %v1352_v7  ;;  %v1306_v17 = vpop.permute.xlu1 %1305 }
 0x221   : > { %v1301_v18 = vpop.permute.xlu0 %1300  ;;  %v2805_v19 = vpop.eup %2804  ;;  %2830 = vrcp.f32 %v1471_v11  ;;  %v1473_v20 = vadd.f32 1.0, %v2803_v14  ;;  %v1442_v21 = vmul.f32 1.442695, %v1385_v12  ;;  %v1355_v22 = vmul.f32 %v1306_v17, %v1131_v8  ;;  %2523 = vmatmul.mubr.msk.bf16.gmra.mxu0 %vm3253_vm1, %v2292_v9 }
 0x222   : > { %v2807_v23 = vpop.eup %2806  ;;  %2832 = vrcp.f32 %v1470_v15  ;;  %v1472_v24 = vadd.f32 1.0, %v2805_v19  ;;  %v1440_v25 = vmul.f32 1.442695, %v1384_v16  ;;  %v1354_v26 = vmul.f32 %v1301_v18, %v1130_v13 }
 0x223   : > { %v2809_v28 = vpop.eup %2808  ;;  %2834 = vrcp.f32 %v1473_v20  ;;  %v1387_v29 = vsub.f32 0.0, %v1355_v22 }
 0x224   : > { %v2811_v31 = vpop.eup %2810  ;;  %2836 = vrcp.f32 %v1472_v24  ;;  %v1386_v32 = vsub.f32 0.0, %v1354_v26  ;;  %v2295_v33 = vpack.c.bf16 %v2807_v23, %v2809_v28  ;;  %v1316_v35 = vpop.permute.xlu1 %1315 }
 0x225   : > { %v1311_v36 = vpop.permute.xlu0 %1310  ;;  %v2813_v37 = vpop.eup %2812  ;;  %v1475_v38 = vadd.f32 1.0, %v2811_v31  ;;  %2838 = vpow2.f32 %v1442_v21  ;;  %v1446_v39 = vmul.f32 1.442695, %v1387_v29  ;;  %v1357_v40 = vmul.f32 %v1316_v35, %v1133_v27 }
 0x226   : > { %v2815_v41 = vpop.eup %2814  ;;  %v1474_v42 = vadd.f32 1.0, %v2813_v37  ;;  %2840 = vpow2.f32 %v1440_v25  ;;  %v1444_v43 = vmul.f32 1.442695, %v1386_v32  ;;  %2526 = vmatprep.mubr.msk.bf16.mxu0 %vm3253_vm1, %v2295_v33  ;;  %v1356_v44 = vmul.f32 %v1311_v36, %v1132_v30 }
 0x227   : > { %v2817_v46 = vpop.eup %2816  ;;  %2842 = vrcp.f32 %v1475_v38  ;;  %v1389_v47 = vsub.f32 0.0, %v1357_v40 }
 0x228   : > { %v2819_v49 = vpop.eup %2818  ;;  %2844 = vrcp.f32 %v1474_v42  ;;  %v1388_v50 = vsub.f32 0.0, %v1356_v44  ;;  %v1326_v51 = vpop.permute.xlu1 %1325  ;;  %v2298_v53 = vpack.c.bf16 %v2815_v41, %v2817_v46 }
 0x229   : > { %v1321_v52 = vpop.permute.xlu0 %1320  ;;  %v2821_v54 = vpop.eup %2820  ;;  %v1477_v55 = vadd.f32 1.0, %v2819_v49  ;;  %2846 = vpow2.f32 %v1446_v39  ;;  %v1450_v56 = vmul.f32 1.442695, %v1389_v47  ;;  %v1359_v57 = vmul.f32 %v1326_v51, %v1135_v45 }
 0x22a   : > { %v2823_v58 = vpop.eup %2822  ;;  %v1476_v59 = vadd.f32 1.0, %v2821_v54  ;;  %2848 = vpow2.f32 %v1444_v43  ;;  %v1448_v60 = vmul.f32 1.442695, %v1388_v50  ;;  %v1358_v61 = vmul.f32 %v1321_v52, %v1134_v48  ;;  %2527 = vmatmul.mubr.msk.bf16.gmra.mxu0 %vm3253_vm1, %v2298_v53  ;;  %v2751_v52 = vld [vmem:[%s3429_s4 + $0x10] sm:$0xff]   ;;  %v2752_v53 = vld [vmem:[%s3429_s4 + $0x8] sm:$0xff]   ;;  %v2753_v54 = vld [vmem:[%s3429_s4] sm:$0xff]  }
 0x22b   : > { %v2825_v62 = vpop.eup %2824  ;;  %2850 = vrcp.f32 %v1477_v55  ;;  %v1391_v63 = vsub.f32 0.0, %v1359_v57  ;;  %2560 = vmatprep.subr.bf16.mxu1 %v2751_v52 }
 0x22c   : > { %v2827_v0 = vpop.eup %2826  ;;  %2852 = vrcp.f32 %v1476_v59  ;;  %v1390_v1 = vsub.f32 0.0, %v1358_v61  ;;  %v2301_v2 = vpack.c.bf16 %v2823_v58, %v2825_v62  ;;  %2561 = vmatpush3.bf16.msra.mxu1 %v2751_v52 }
 0x22d   : > { %v2829_v3 = vpop.eup %2828  ;;  %v1479_v4 = vadd.f32 1.0, %v2827_v0  ;;  %2854 = vpow2.f32 %v1450_v56  ;;  %v1454_v5 = vmul.f32 1.442695, %v1391_v63  ;;  %2562 = vmatprep.subr.bf16.mxu1 %v2752_v53  ;;  %v3301_v56 = vld [vmem:[%s3428_s3] ss:$0 sm:$0xff] }
 0x22e   : > { %v2831_v6 = vpop.eup %2830  ;;  %v1478_v7 = vadd.f32 1.0, %v2829_v3  ;;  %2856 = vpow2.f32 %v1448_v60  ;;  %v1452_v8 = vmul.f32 1.442695, %v1390_v1  ;;  %2530 = vmatprep.mubr.msk.bf16.mxu0 %vm3253_vm1, %v2301_v2 }
 0x22f   : > { %v2833_v9 = vpop.eup %2832  ;;  %2858 = vrcp.f32 %v1479_v4 }
 0x230   : > { %v2835_v10 = vpop.eup %2834  ;;  %2860 = vrcp.f32 %v1478_v7  ;;  %v2304_v11 = vpack.c.bf16 %v2831_v6, %v2833_v9  ;;  %2563 = vmatpush3.bf16.msra.mxu1 %v2752_v53 }
 0x231   : > { %v2837_v12 = vpop.eup %2836  ;;  %2862 = vpow2.f32 %v1454_v5  ;;  %2564 = vmatprep.subr.bf16.mxu1 %v2753_v54 }
 0x232   : > { %v2839_v13 = vpop.eup %2838  ;;  %2864 = vpow2.f32 %v1452_v8  ;;  %2531 = vmatmul.mubr.msk.bf16.gmra.mxu0 %vm3253_vm1, %v2304_v11  ;;  %v2307_v14 = vpack.c.bf16 %v2835_v10, %v2837_v12 }
 0x233   : > { %v2841_v15 = vpop.eup %2840  ;;  %v1481_v16 = vadd.f32 1.0, %v2839_v13 }
 0x234   : > { %v2843_v17 = vpop.eup %2842  ;;  %v1480_v18 = vadd.f32 1.0, %v2841_v15  ;;  %2534 = vmatprep.mubr.msk.bf16.mxu0 %vm3253_vm1, %v2307_v14  ;;  %2565 = vmatpush3.bf16.msra.mxu1 %v2753_v54 }
 0x235   : > { %v2845_v19 = vpop.eup %2844  ;;  %2866 = vrcp.f32 %v1481_v16 }
 0x236   : > { %v2847_v20 = vpop.eup %2846  ;;  %2868 = vrcp.f32 %v1480_v18  ;;  %v2310_v21 = vpack.c.bf16 %v2843_v17, %v2845_v19 }
 0x237   : > { %v2849_v22 = vpop.eup %2848  ;;  %v1483_v23 = vadd.f32 1.0, %v2847_v20 }
 0x238   : > { %v2851_v24 = vpop.eup %2850  ;;  %v1482_v25 = vadd.f32 1.0, %v2849_v22 }
 0x239   : > { %v2853_v26 = vpop.eup %2852  ;;  %2870 = vrcp.f32 %v1483_v23 }
 0x23a   : > { %v2855_v27 = vpop.eup %2854  ;;  %2872 = vrcp.f32 %v1482_v25  ;;  %2535 = vmatmul.mubr.msk.bf16.gmra.mxu0 %vm3253_vm1, %v2310_v21  ;;  %v2313_v28 = vpack.c.bf16 %v2851_v24, %v2853_v26 }
 0x23b   : > { %v2857_v29 = vpop.eup %2856  ;;  %v1485_v30 = vadd.f32 1.0, %v2855_v27 }
 0x23c   : > { %v2859_v31 = vpop.eup %2858  ;;  %v1484_v32 = vadd.f32 1.0, %v2857_v29  ;;  %2538 = vmatprep.mubr.msk.bf16.mxu0 %vm3253_vm1, %v2313_v28 }
 0x23d   : > { %v2861_v33 = vpop.eup %2860  ;;  %2874 = vrcp.f32 %v1485_v30 }
 0x23e   : > { %v2863_v35 = vpop.eup %2862  ;;  %2876 = vrcp.f32 %v1484_v32  ;;  %v2316_v36 = vpack.c.bf16 %v2859_v31, %v2861_v33 }
 0x23f   : > { %v2865_v37 = vpop.eup %2864  ;;  %v1487_v38 = vadd.f32 1.0, %v2863_v35 }
 0x240   : > { %v1486_v39 = vadd.f32 1.0, %v2865_v37 }
 0x241   : > { %2878 = vrcp.f32 %v1487_v38 }
 0x242   : > { %v2867_v40 = vpop.eup %2866  ;;  %2880 = vrcp.f32 %v1486_v39  ;;  %2539 = vmatmul.mubr.msk.bf16.gmra.mxu0 %vm3253_vm1, %v2316_v36 }
 0x243   : > { %v2869_v41 = vpop.eup %2868 }
 0x244   : > { %v2319_v42 = vpack.c.bf16 %v2867_v40, %v2869_v41 }
 0x246   : > { %v2871_v43 = vpop.eup %2870  ;;  %2542 = vmatprep.mubr.msk.bf16.mxu0 %vm3253_vm1, %v2319_v42 }
 0x247   : > { %v2873_v44 = vpop.eup %2872 }
 0x248   : > { %v2322_v45 = vpack.c.bf16 %v2871_v43, %v2873_v44 }
 0x24a   : > { %v2875_v46 = vpop.eup %2874  ;;  %2543 = vmatmul.mubr.msk.bf16.gmra.mxu0 %vm3253_vm1, %v2322_v45 }
 0x24b   : > { %v2877_v47 = vpop.eup %2876 }
 0x24c   : > { %v2325_v48 = vpack.c.bf16 %v2875_v46, %v2877_v47 }
 0x24e   : > { %v2879_v49 = vpop.eup %2878  ;;  %2546 = vmatprep.mubr.msk.bf16.mxu0 %vm3253_vm1, %v2325_v48 }
 0x24f   : > { %v2881_v50 = vpop.eup %2880 }
 0x250   : > { %v2328_v51 = vpack.c.bf16 %v2879_v49, %v2881_v50 }
 0x252   : > { %2547 = vmatmul.mubr.msk.bf16.gmra.mxu0 %vm3253_vm1, %v2328_v51 }
 0x2d9   : > { %v2520_v34 = vpop.f32.mrf.mxu0 }
 0x2da   : > { %v1685_v60 = vadd.f32 %v2520_v34, %v3301_v56 }
 0x2db   : > { %v1676_v55 = vpop.f32.mrf.mxu0 }
 0x2dc   : > { %v1677_v58 = vadd.f32 %v3301_v56, %v1676_v55  ;;  %v1805_v3 = vmax.f32 %v1685_v60, 0.0 }
 0x2dd   : > { %v2521_v57 = vpop.f32.mrf.mxu0 }
 0x2de   : > { %v1688_v59 = vadd.f32 %v2521_v57, %v3301_v56  ;;  %v1803_v1 = vmax.f32 %v1677_v58, 0.0 }
 0x2df   : > { %v1679_v61 = vpop.f32.mrf.mxu0 }
 0x2e0   : > { %v1680_v62 = vadd.f32 %v3301_v56, %v1679_v61  ;;  %v1806_v63 = vmax.f32 %v1688_v59, 0.0 }
 0x2e1   : > { %v2524_v0 = vpop.f32.mrf.mxu0 }
 0x2e2   : > { %v1804_v2 = vmax.f32 %v1680_v62, 0.0  ;;  %v1836_v6 = vpack.c.bf16 %v1806_v63, %v1805_v3  ;;  %v1701_v10 = vadd.f32 %v2524_v0, %v3301_v56 }
 0x2e3   : > { %v1692_v4 = vpop.f32.mrf.mxu0 }
 0x2e4   : > { %v1835_v5 = vpack.c.bf16 %v1804_v2, %v1803_v1  ;;  %v1693_v8 = vadd.f32 %v3301_v56, %v1692_v4  ;;  %v1809_v17 = vmax.f32 %v1701_v10, 0.0 }
 0x2e5   : > { %v2525_v7 = vpop.f32.mrf.mxu0 }
 0x2e6   : > { %v1704_v9 = vadd.f32 %v2525_v7, %v3301_v56  ;;  %2566 = vmatprep.mubr.bf16.mxu1 %v1835_v5  ;;  %v1807_v14 = vmax.f32 %v1693_v8, 0.0 }
 0x2e7   : > { %v1695_v11 = vpop.f32.mrf.mxu0  ;;  %2567 = vmatmul.mubr.bf16.vlgmr.msra.gmra.mxu1 %v1836_v6 }
 0x2e8   : > { %v1696_v12 = vadd.f32 %v3301_v56, %v1695_v11  ;;  %v1810_v13 = vmax.f32 %v1704_v9, 0.0 }
 0x2ea   : > { %v1808_v15 = vmax.f32 %v1696_v12, 0.0  ;;  %v2528_v16 = vpop.f32.mrf.mxu0  ;;  %v1838_v20 = vpack.c.bf16 %v1810_v13, %v1809_v17 }
 0x2eb   : > { %v1717_v24 = vadd.f32 %v2528_v16, %v3301_v56 }
 0x2ec   : > { %v1837_v18 = vpack.c.bf16 %v1808_v15, %v1807_v14  ;;  %v1708_v19 = vpop.f32.mrf.mxu0 }
 0x2ed   : > { %v1709_v22 = vadd.f32 %v3301_v56, %v1708_v19  ;;  %v1813_v31 = vmax.f32 %v1717_v24, 0.0 }
 0x2ee   : > { %v2529_v21 = vpop.f32.mrf.mxu0  ;;  %2570 = vmatprep.mubr.bf16.mxu1 %v1837_v18 }
 0x2ef   : > { %v1720_v23 = vadd.f32 %v2529_v21, %v3301_v56  ;;  %2571 = vmatmul.mubr.bf16.gmra.mxu1 %v1838_v20  ;;  %v1811_v29 = vmax.f32 %v1709_v22, 0.0 }
 0x2f0   : > { %v1711_v25 = vpop.f32.mrf.mxu0 }
 0x2f1   : > { %v1712_v26 = vadd.f32 %v3301_v56, %v1711_v25  ;;  %v1814_v27 = vmax.f32 %v1720_v23, 0.0 }
 0x2f2   : > { %v2532_v28 = vpop.f32.mrf.mxu0 }
 0x2f3   : > { %v1812_v30 = vmax.f32 %v1712_v26, 0.0  ;;  %v1840_v35 = vpack.c.bf16 %v1814_v27, %v1813_v31  ;;  %v1733_v39 = vadd.f32 %v2532_v28, %v3301_v56 }
 0x2f4   : > { %v1724_v32 = vpop.f32.mrf.mxu0 }
 0x2f5   : > { %v1839_v33 = vpack.c.bf16 %v1812_v30, %v1811_v29  ;;  %v1725_v37 = vadd.f32 %v3301_v56, %v1724_v32  ;;  %v1817_v46 = vmax.f32 %v1733_v39, 0.0 }
 0x2f6   : > { %v2533_v36 = vpop.f32.mrf.mxu0 }
 0x2f7   : > { %v1736_v38 = vadd.f32 %v2533_v36, %v3301_v56  ;;  %2574 = vmatprep.mubr.bf16.mxu1 %v1839_v33  ;;  %v1815_v44 = vmax.f32 %v1725_v37, 0.0 }
 0x2f8   : > { %v1727_v40 = vpop.f32.mrf.mxu0  ;;  %2575 = vmatmul.mubr.bf16.gmra.mxu1 %v1840_v35 }
 0x2f9   : > { %v1728_v41 = vadd.f32 %v3301_v56, %v1727_v40  ;;  %v1818_v42 = vmax.f32 %v1736_v38, 0.0 }
 0x2fa   : > { %v2536_v43 = vpop.f32.mrf.mxu0 }
 0x2fb   : > { %v1816_v45 = vmax.f32 %v1728_v41, 0.0  ;;  %v1842_v49 = vpack.c.bf16 %v1818_v42, %v1817_v46  ;;  %v1749_v53 = vadd.f32 %v2536_v43, %v3301_v56  ;;  %v3338_v41 = vld [vmem:[%s3430_s5] ss:$0 sm:$0xff] }
 0x2fc   : > { %v1740_v47 = vpop.f32.mrf.mxu0 }
 0x2fd   : > { %v1841_v48 = vpack.c.bf16 %v1816_v45, %v1815_v44  ;;  %v1741_v51 = vadd.f32 %v3301_v56, %v1740_v47  ;;  %v1821_v60 = vmax.f32 %v1749_v53, 0.0 }
 0x2fe   : > { %v2537_v50 = vpop.f32.mrf.mxu0 }
 0x2ff   : > { %v1752_v52 = vadd.f32 %v2537_v50, %v3301_v56  ;;  %2578 = vmatprep.mubr.bf16.mxu1 %v1841_v48  ;;  %v1819_v58 = vmax.f32 %v1741_v51, 0.0 }
 0x300   : > { %v1743_v54 = vpop.f32.mrf.mxu0  ;;  %2579 = vmatmul.mubr.bf16.gmra.mxu1 %v1842_v49 }
 0x301   : > { %v1744_v34 = vadd.f32 %v3301_v56, %v1743_v54  ;;  %v1822_v55 = vmax.f32 %v1752_v52, 0.0 }
 0x302   : > { %v2540_v57 = vpop.f32.mrf.mxu0 }
 0x303   : > { %v1820_v59 = vmax.f32 %v1744_v34, 0.0  ;;  %v1844_v63 = vpack.c.bf16 %v1822_v55, %v1821_v60  ;;  %v1765_v3 = vadd.f32 %v2540_v57, %v3301_v56 }
 0x304   : > { %v1756_v61 = vpop.f32.mrf.mxu0 }
 0x305   : > { %v1843_v62 = vpack.c.bf16 %v1820_v59, %v1819_v58  ;;  %v1757_v1 = vadd.f32 %v3301_v56, %v1756_v61  ;;  %v1825_v10 = vmax.f32 %v1765_v3, 0.0 }
 0x306   : > { %v2541_v0 = vpop.f32.mrf.mxu0 }
 0x307   : > { %v1768_v2 = vadd.f32 %v2541_v0, %v3301_v56  ;;  %2582 = vmatprep.mubr.bf16.mxu1 %v1843_v62  ;;  %v1823_v8 = vmax.f32 %v1757_v1, 0.0 }
 0x308   : > { %v1759_v4 = vpop.f32.mrf.mxu0  ;;  %2583 = vmatmul.mubr.bf16.gmra.mxu1 %v1844_v63 }
 0x309   : > { %v1760_v5 = vadd.f32 %v3301_v56, %v1759_v4  ;;  %v1826_v6 = vmax.f32 %v1768_v2, 0.0 }
 0x30a   : > { %v2544_v7 = vpop.f32.mrf.mxu0 }
 0x30b   : > { %v1824_v9 = vmax.f32 %v1760_v5, 0.0  ;;  %v1846_v13 = vpack.c.bf16 %v1826_v6, %v1825_v10  ;;  %v1781_v17 = vadd.f32 %v2544_v7, %v3301_v56 }
 0x30c   : > { %v1772_v11 = vpop.f32.mrf.mxu0 }
 0x30d   : > { %v1845_v12 = vpack.c.bf16 %v1824_v9, %v1823_v8  ;;  %v1773_v15 = vadd.f32 %v3301_v56, %v1772_v11  ;;  %v1829_v24 = vmax.f32 %v1781_v17, 0.0 }
 0x30e   : > { %v2545_v14 = vpop.f32.mrf.mxu0 }
 0x30f   : > { %v1784_v16 = vadd.f32 %v2545_v14, %v3301_v56  ;;  %2586 = vmatprep.mubr.bf16.mxu1 %v1845_v12  ;;  %v1827_v22 = vmax.f32 %v1773_v15, 0.0 }
 0x310   : > { %v1775_v18 = vpop.f32.mrf.mxu0  ;;  %2587 = vmatmul.mubr.bf16.gmra.mxu1 %v1846_v13 }
 0x311   : > { %v1776_v19 = vadd.f32 %v3301_v56, %v1775_v18  ;;  %v1830_v20 = vmax.f32 %v1784_v16, 0.0 }
 0x312   : > { %v2548_v21 = vpop.f32.mrf.mxu0 }
 0x313   : > { %v1828_v23 = vmax.f32 %v1776_v19, 0.0  ;;  %v1848_v27 = vpack.c.bf16 %v1830_v20, %v1829_v24  ;;  %v1797_v31 = vadd.f32 %v2548_v21, %v3301_v56 }
 0x314   : > { %v1788_v25 = vpop.f32.mrf.mxu0 }
 0x315   : > { %v1847_v26 = vpack.c.bf16 %v1828_v23, %v1827_v22  ;;  %v1789_v29 = vadd.f32 %v3301_v56, %v1788_v25  ;;  %v1833_v38 = vmax.f32 %v1797_v31, 0.0 }
 0x316   : > { %v2549_v28 = vpop.f32.mrf.mxu0 }
 0x317   : > { %v1800_v30 = vadd.f32 %v2549_v28, %v3301_v56  ;;  %2590 = vmatprep.mubr.bf16.mxu1 %v1847_v26  ;;  %v1831_v36 = vmax.f32 %v1789_v29, 0.0 }
 0x318   : > { %v1791_v32 = vpop.f32.mrf.mxu0  ;;  %2591 = vmatmul.mubr.bf16.gmra.mxu1 %v1848_v27 }
 0x319   : > { %v1792_v33 = vadd.f32 %v3301_v56, %v1791_v32  ;;  %v1834_v35 = vmax.f32 %v1800_v30, 0.0 }
 0x31b   : > { %v1832_v37 = vmax.f32 %v1792_v33, 0.0  ;;  %v1850_v40 = vpack.c.bf16 %v1834_v35, %v1833_v38 }
 0x31d   : > { %v1849_v39 = vpack.c.bf16 %v1832_v37, %v1831_v36 }
 0x31f   : > { %2594 = vmatprep.mubr.bf16.mxu1 %v1849_v39 }
 0x320   : > { %2595 = vmatmul.mubr.bf16.gmra.mxu1 %v1850_v40 }
 0x3a7   : > { %v2568_v42 = vpop.f32.mrf.mxu1 }
 0x3a8   : > { %v1965_v56 = vadd.f32 %v2568_v42, %v3338_v41 }
 0x3a9   : > { %v1956_v43 = vpop.f32.mrf.mxu1 }
 0x3aa   : > { %2085 = vst [vmem:[%s3120_s21 + $0x10] sm:$0xff] %v1965_v56  ;;  %v1957_v44 = vadd.f32 %v3338_v41, %v1956_v43 }
 0x3ab   : > { %v2569_v45 = vpop.f32.mrf.mxu1 }
 0x3ac   : > { %2083 = vst [vmem:[%s3120_s21] sm:$0xff] %v1957_v44  ;;  %v1968_v46 = vadd.f32 %v2569_v45, %v3338_v41 }
 0x3ad   : > { %v1959_v47 = vpop.f32.mrf.mxu1 }
 0x3ae   : > { %2086 = vst [vmem:[%s3120_s21 + $0x18] sm:$0xff] %v1968_v46  ;;  %v1960_v48 = vadd.f32 %v3338_v41, %v1959_v47 }
 0x3af   : > { %v2572_v49 = vpop.f32.mrf.mxu1 }
 0x3b0   : > { %2084 = vst [vmem:[%s3120_s21 + $0x8] sm:$0xff] %v1960_v48  ;;  %v1981_v50 = vadd.f32 %v2572_v49, %v3338_v41 }
 0x3b1   : > { %v1972_v51 = vpop.f32.mrf.mxu1 }
 0x3b2   : > { %2089 = vst [vmem:[%s3120_s21 + $0x30] sm:$0xff] %v1981_v50  ;;  %v1973_v52 = vadd.f32 %v3338_v41, %v1972_v51 }
 0x3b3   : > { %v2573_v53 = vpop.f32.mrf.mxu1 }
 0x3b4   : > { %2087 = vst [vmem:[%s3120_s21 + $0x20] sm:$0xff] %v1973_v52  ;;  %v1984_v54 = vadd.f32 %v2573_v53, %v3338_v41 }
 0x3b5   : > { %v1975_v34 = vpop.f32.mrf.mxu1 }
 0x3b6   : > { %2090 = vst [vmem:[%s3120_s21 + $0x38] sm:$0xff] %v1984_v54  ;;  %v1976_v55 = vadd.f32 %v3338_v41, %v1975_v34 }
 0x3b8   : > { %2088 = vst [vmem:[%s3120_s21 + $0x28] sm:$0xff] %v1976_v55  ;;  %v2576_v57 = vpop.f32.mrf.mxu1 }
 0x3b9   : > { %v1997_v58 = vadd.f32 %v2576_v57, %v3338_v41 }
 0x3ba   : > { %v1988_v59 = vpop.f32.mrf.mxu1 }
 0x3bb   : > { %2093 = vst [vmem:[%s3120_s21 + $0x50] sm:$0xff] %v1997_v58  ;;  %v1989_v60 = vadd.f32 %v3338_v41, %v1988_v59 }
 0x3bc   : > { %v2577_v61 = vpop.f32.mrf.mxu1 }
 0x3bd   : > { %2091 = vst [vmem:[%s3120_s21 + $0x40] sm:$0xff] %v1989_v60  ;;  %v2000_v62 = vadd.f32 %v2577_v61, %v3338_v41 }
 0x3be   : > { %v1991_v63 = vpop.f32.mrf.mxu1 }
 0x3bf   : > { %2094 = vst [vmem:[%s3120_s21 + $0x58] sm:$0xff] %v2000_v62  ;;  %v1992_v0 = vadd.f32 %v3338_v41, %v1991_v63 }
 0x3c0   : > { %v2580_v1 = vpop.f32.mrf.mxu1 }
 0x3c1   : > { %2092 = vst [vmem:[%s3120_s21 + $0x48] sm:$0xff] %v1992_v0  ;;  %v2013_v2 = vadd.f32 %v2580_v1, %v3338_v41 }
 0x3c2   : > { %v2004_v3 = vpop.f32.mrf.mxu1 }
 0x3c3   : > { %2097 = vst [vmem:[%s3120_s21 + $0x70] sm:$0xff] %v2013_v2  ;;  %v2005_v4 = vadd.f32 %v3338_v41, %v2004_v3 }
 0x3c4   : > { %v2581_v5 = vpop.f32.mrf.mxu1 }
 0x3c5   : > { %2095 = vst [vmem:[%s3120_s21 + $0x60] sm:$0xff] %v2005_v4  ;;  %v2016_v6 = vadd.f32 %v2581_v5, %v3338_v41 }
 0x3c6   : > { %v2007_v7 = vpop.f32.mrf.mxu1 }
 0x3c7   : > { %2098 = vst [vmem:[%s3120_s21 + $0x78] sm:$0xff] %v2016_v6  ;;  %v2008_v8 = vadd.f32 %v3338_v41, %v2007_v7 }
 0x3c8   : > { %v2584_v9 = vpop.f32.mrf.mxu1 }
 0x3c9   : > { %2096 = vst [vmem:[%s3120_s21 + $0x68] sm:$0xff] %v2008_v8  ;;  %v2029_v10 = vadd.f32 %v2584_v9, %v3338_v41 }
 0x3ca   : > { %v2020_v11 = vpop.f32.mrf.mxu1 }
 0x3cb   : > { %2101 = vst [vmem:[%s3120_s21 + $0x90] sm:$0xff] %v2029_v10  ;;  %v2021_v12 = vadd.f32 %v3338_v41, %v2020_v11 }
 0x3cc   : > { %v2585_v13 = vpop.f32.mrf.mxu1 }
 0x3cd   : > { %2099 = vst [vmem:[%s3120_s21 + $0x80] sm:$0xff] %v2021_v12  ;;  %v2032_v14 = vadd.f32 %v2585_v13, %v3338_v41 }
 0x3ce   : > { %v2023_v15 = vpop.f32.mrf.mxu1 }
 0x3cf   : > { %2102 = vst [vmem:[%s3120_s21 + $0x98] sm:$0xff] %v2032_v14  ;;  %v2024_v16 = vadd.f32 %v3338_v41, %v2023_v15 }
 0x3d0   : > { %v2588_v17 = vpop.f32.mrf.mxu1 }
 0x3d1   : > { %2100 = vst [vmem:[%s3120_s21 + $0x88] sm:$0xff] %v2024_v16  ;;  %v2045_v18 = vadd.f32 %v2588_v17, %v3338_v41 }
 0x3d2   : > { %v2036_v19 = vpop.f32.mrf.mxu1 }
 0x3d3   : > { %2105 = vst [vmem:[%s3120_s21 + $0xb0] sm:$0xff] %v2045_v18  ;;  %v2037_v20 = vadd.f32 %v3338_v41, %v2036_v19 }
 0x3d4   : > { %v2589_v21 = vpop.f32.mrf.mxu1 }
 0x3d5   : > { %2103 = vst [vmem:[%s3120_s21 + $0xa0] sm:$0xff] %v2037_v20  ;;  %v2048_v22 = vadd.f32 %v2589_v21, %v3338_v41 }
 0x3d6   : > { %v2039_v23 = vpop.f32.mrf.mxu1 }
 0x3d7   : > { %2106 = vst [vmem:[%s3120_s21 + $0xb8] sm:$0xff] %v2048_v22  ;;  %v2040_v24 = vadd.f32 %v3338_v41, %v2039_v23 }
 0x3d8   : > { %v2592_v25 = vpop.f32.mrf.mxu1 }
 0x3d9   : > { %2104 = vst [vmem:[%s3120_s21 + $0xa8] sm:$0xff] %v2040_v24  ;;  %v2061_v26 = vadd.f32 %v2592_v25, %v3338_v41 }
 0x3da   : > { %v2052_v27 = vpop.f32.mrf.mxu1 }
 0x3db   : > { %2109 = vst [vmem:[%s3120_s21 + $0xd0] sm:$0xff] %v2061_v26  ;;  %v2053_v28 = vadd.f32 %v3338_v41, %v2052_v27 }
 0x3dc   : > { %v2593_v29 = vpop.f32.mrf.mxu1 }
 0x3dd   : > { %2107 = vst [vmem:[%s3120_s21 + $0xc0] sm:$0xff] %v2053_v28  ;;  %v2064_v30 = vadd.f32 %v2593_v29, %v3338_v41 }
 0x3de   : > { %v2055_v31 = vpop.f32.mrf.mxu1 }
 0x3df   : > { %2110 = vst [vmem:[%s3120_s21 + $0xd8] sm:$0xff] %v2064_v30  ;;  %v2056_v32 = vadd.f32 %v3338_v41, %v2055_v31 }
 0x3e0   : > { %v2596_v33 = vpop.f32.mrf.mxu1 }
 0x3e1   : > { %2108 = vst [vmem:[%s3120_s21 + $0xc8] sm:$0xff] %v2056_v32  ;;  %v2077_v35 = vadd.f32 %v2596_v33, %v3338_v41 }
 0x3e2   : > { %v2068_v36 = vpop.f32.mrf.mxu1 }
 0x3e3   : > { %2113 = vst [vmem:[%s3120_s21 + $0xf0] sm:$0xff] %v2077_v35  ;;  %v2069_v37 = vadd.f32 %v3338_v41, %v2068_v36 }
 0x3e4   : > { %v2597_v38 = vpop.f32.mrf.mxu1 }
 0x3e5   : > { %2111 = vst [vmem:[%s3120_s21 + $0xe0] sm:$0xff] %v2069_v37  ;;  %v2080_v39 = vadd.f32 %v2597_v38, %v3338_v41 }
 0x3e6   : > { %v2071_v40 = vpop.f32.mrf.mxu1 }
 0x3e7   : > { %2114 = vst [vmem:[%s3120_s21 + $0xf8] sm:$0xff] %v2080_v39  ;;  %v2072_v42 = vadd.f32 %v3338_v41, %v2071_v40 }
 0x3e9   : > { %2112 = vst [vmem:[%s3120_s21 + $0xe8] sm:$0xff] %v2072_v42 }
 0x3ea PF: > { %s17_s30 = sadd.s32 1, %s2936_s30   ;;  %s3435_s24 = smov %s2916_s25 }
 0x3eb   : > { %p14_p13 = scmp.ge.s32.totalorder %s17_s30, 6   ;;  %s3436_s25 = smov %s3031_s14 }
 0x3ec   : > { %s3437_s26 = smov %s2928_s28  ;;  %s3438_s27 = smov %s2932_s29 }
 0x3ed   : > { %s3439_s28 = smov %s3442_s8  ;;  %s3440_s29 = smov %s3446_s9 }
 0x3ee   :  { %16 = sbr.rel (!%p14_p13) target bundleno = 4 (0x4), region = 133 }

</bundles_post_ra>
